<compile_context>
chip_gen: v7x
topology: tpu7x:2x2x1
jax: 0.10.0
libtpu: 0.0.40
codegen_flags: <defaults>
</compile_context>

<pallas_src>
import jax
import jax.numpy as jnp
from jax.experimental import pallas as pl
from jax.experimental.pallas import tpu as pltpu

MAX_DOMAINS = 16     # max_domain_num
DOMAIN_DIM = 256     # domain_dim
FEAT_DIM = 768       # feat_dim
NUM_CLASSES = 384    # num_classes
MID_DIM = max(FEAT_DIM, NUM_CLASSES)  # MLP mid_channels


def _round_up(x, m):
    return (x + m - 1) // m * m


def model_kernel(scale_ref, embs_ref, wd_ref, bd_ref, w1_ref, b1_ref,
                 w2_ref, b2_ref, out_ref):
    # --- masked mean pooling (DomainMeaning) ---
    # scale = mask * (1/domain_num) was pre-folded in the wrapper, so this is a
    # single broadcast-multiply + sublane reduction (VPU/XLU, ample slack).
    scale = scale_ref[...]                                    # (TB, 16) f32
    embs = embs_ref[...]                                      # (TB, 16, 256) bf16/f32
    domain = jnp.sum(embs * scale[:, :, None], axis=1)        # (TB, 256) f32

    # --- projector_domain: Linear(256 -> 768), bf16 weights / f32 accum ---
    feat = jnp.dot(domain.astype(jnp.bfloat16), wd_ref[...],
                   preferred_element_type=jnp.float32) + bd_ref[...]

    # --- classifier MLP: Linear -> (BN=id) -> ReLU -> (Dropout=id) -> Linear
    h = jnp.dot(feat.astype(jnp.bfloat16), w1_ref[...],
                preferred_element_type=jnp.float32) + b1_ref[...]
    h = jnp.maximum(h, 0.0)
    y = jnp.dot(h.astype(jnp.bfloat16), w2_ref[...],
                preferred_element_type=jnp.float32) + b2_ref[...]
    out_ref[...] = y.astype(out_ref.dtype)


def _choose_tb(b_total, tile_b):
    # Cap at 512: keeps double-buffered embs + resident weights well below
    # v7x's 64 MiB physical VMEM.
    tb = _round_up(min(max(tile_b, 8), 512), 8)
    # Keep >= 2 grid steps when the batch allows it (pipelining; v7x megacore).
    while tb > 128 and b_total < 2 * tb:
        tb //= 2
    if b_total < tb:
        tb = max(_round_up(b_total, 8), 8)
    return tb


def model_forward(domain_num, domain_embs, params, *, tile_b=512,
                  out_dtype=jnp.bfloat16):
    """domain_num: (B,) int; domain_embs: (B, 16, 256) — ideally bf16 straight
    from the producer (it is consumed as-is, no wrapper-side cast of the
    dominant HBM stream); params: (wd, bd, w1, b1, w2, b2), bf16 weights and
    f32 biases."""
    wd, bd, w1, b1, w2, b2 = params
    b_total = int(domain_embs.shape[0])
    tb = _choose_tb(b_total, tile_b)
    # No jnp.pad: ragged last block is fine because all ops are row-wise and
    # the out-of-range rows are never written back.
    grid = (pl.cdiv(b_total, tb),)

    # Fold validity mask and 1/domain_num into one (B, 16) f32 scale (64 B/row)
    # so the kernel needs no iota/compare/divide and no 1-lane dnum block.
    dnum = domain_num.astype(jnp.int32)[:, None]
    idx = jnp.arange(MAX_DOMAINS, dtype=jnp.int32)[None, :]
    inv = 1.0 / jnp.maximum(dnum, 1).astype(jnp.float32)
    scale = jnp.where(idx < dnum, inv, 0.0)

    def resident(shape, single_buffer):
        # Constant index_map: the block is identical every grid step, so it is
        # DMA'd once and stays resident in VMEM. Buffered(1) drops the useless
        # second copy of never-changing weights (VMEM headroom on v5e/v7x).
        idx_map = lambda *_: (0,) * len(shape)
        if single_buffer:
            return pl.BlockSpec(shape, idx_map, pipeline_mode=pl.Buffered(1))
        return pl.BlockSpec(shape, idx_map)

    def run(single_buffer):
        return pl.pallas_call(
            model_kernel,
            out_shape=jax.ShapeDtypeStruct((b_total, NUM_CLASSES), out_dtype),
            grid=grid,
            in_specs=[
                pl.BlockSpec((tb, MAX_DOMAINS), lambda i: (i, 0)),         # scale
                pl.BlockSpec((tb, MAX_DOMAINS, DOMAIN_DIM),
                             lambda i: (i, 0, 0)),                         # embs
                resident((DOMAIN_DIM, FEAT_DIM), single_buffer),           # wd bf16
                resident((1, FEAT_DIM), single_buffer),                    # bd f32
                resident((FEAT_DIM, MID_DIM), single_buffer),              # w1 bf16
                resident((1, MID_DIM), single_buffer),                     # b1 f32
                resident((MID_DIM, NUM_CLASSES), single_buffer),           # w2 bf16
                resident((1, NUM_CLASSES), single_buffer),                 # b2 f32
            ],
            out_specs=pl.BlockSpec((tb, NUM_CLASSES), lambda i: (i, 0)),
            compiler_params=pltpu.CompilerParams(
                # batch tiles over both v7x TCs; no-op (but harmless) on v5e/v6e
                dimension_semantics=("parallel",),
                # tb=512 (~11-13 MiB incl. double-buffered embs) exceeds v5e's
                # 16 MiB default scoped limit margin; 48 MiB is < v7x's 64 MiB
                # physical VMEM so it is safe on every generation.
                vmem_limit_bytes=48 * 1024 * 1024,
            ),
        )(scale, domain_embs, wd, bd, w1, b1, w2, b2)

    try:
        return run(single_buffer=True)
    except Exception:
        # Fallback if this jax version rejects pipeline_mode=pl.Buffered(1);
        # identical semantics, just double-buffered resident weights.
        return run(single_buffer=False)


def reference_forward(domain_num, domain_embs, params):
    """Pure-JAX reference following the same bf16-weight / f32-accum path."""
    wd, bd, w1, b1, w2, b2 = params
    dnum = domain_num.astype(jnp.int32)[:, None]
    idx = jnp.arange(MAX_DOMAINS, dtype=jnp.int32)[None, :]
    inv = 1.0 / jnp.maximum(dnum, 1).astype(jnp.float32)
    scale = jnp.where(idx < dnum, inv, 0.0)
    domain = jnp.sum(domain_embs * scale[:, :, None], axis=1)       # f32

    feat = jnp.dot(domain.astype(jnp.bfloat16), wd,
                   preferred_element_type=jnp.float32) + bd
    h = jnp.maximum(jnp.dot(feat.astype(jnp.bfloat16), w1,
                            preferred_element_type=jnp.float32) + b1, 0.0)
    return jnp.dot(h.astype(jnp.bfloat16), w2,
                   preferred_element_type=jnp.float32) + b2


def init_params(key):
    ks = jax.random.split(key, 6)
    # Weights stored bf16 (halves weight DMA, matches MXU input dtype);
    # biases kept f32 (added to f32 accumulators).
    wd = (jax.random.normal(ks[0], (DOMAIN_DIM, FEAT_DIM), jnp.float32)
          * 0.02).astype(jnp.bfloat16)
    bd = jax.random.normal(ks[1], (1, FEAT_DIM), jnp.float32) * 0.01
    w1 = (jax.random.normal(ks[2], (FEAT_DIM, MID_DIM), jnp.float32)
          * 0.02).astype(jnp.bfloat16)
    b1 = jax.random.normal(ks[3], (1, MID_DIM), jnp.float32) * 0.01
    w2 = (jax.random.normal(ks[4], (MID_DIM, NUM_CLASSES), jnp.float32)
          * 0.02).astype(jnp.bfloat16)
    b2 = jax.random.normal(ks[5], (1, NUM_CLASSES), jnp.float32) * 0.01
    return wd, bd, w1, b1, w2, b2


if __name__ == "__main__":
    B = 8  # batch (number of proteins); wrapper tiles any batch size
    key = jax.random.PRNGKey(0)
    k_emb, k_num, k_par = jax.random.split(key, 3)

    # Producer-side inputs:
    #   data.domain_embs : (B, MAX_DOMAINS, DOMAIN_DIM) FAD domain embeddings,
    #                      streamed as bf16 (dominant HBM bytes).
    #   data.domain_num  : (B,) number of valid domains per protein.
    domain_embs = jax.random.normal(
        k_emb, (B, MAX_DOMAINS, DOMAIN_DIM), jnp.float32).astype(jnp.bfloat16)
    domain_num = jax.random.randint(k_num, (B,), 1, MAX_DOMAINS + 1, jnp.int32)

    params = init_params(k_par)

    out = model_forward(domain_num, domain_embs, params)
    out = jax.block_until_ready(out)

    ref = reference_forward(domain_num, domain_embs, params)
    assert out.shape == (B, NUM_CLASSES)
    assert jnp.allclose(out.astype(jnp.float32), ref, atol=2e-2, rtol=2e-2), \
        "mismatch vs reference"

    print("KERNEL_OK")
</pallas_src>

<mosaic_0001>
module attributes {stable_mosaic.version = 11 : i64} {
  func.func @model_kernel(%arg0: i32, %arg1: memref<8x16xf32, #tpu.memory_space<vmem>>, %arg2: memref<8x16x256xbf16, #tpu.memory_space<vmem>>, %arg3: memref<256x768xbf16, #tpu.memory_space<vmem>>, %arg4: memref<1x768xf32, #tpu.memory_space<vmem>>, %arg5: memref<768x768xbf16, #tpu.memory_space<vmem>>, %arg6: memref<1x768xf32, #tpu.memory_space<vmem>>, %arg7: memref<768x384xbf16, #tpu.memory_space<vmem>>, %arg8: memref<1x384xf32, #tpu.memory_space<vmem>>, %arg9: memref<8x384xbf16, #tpu.memory_space<vmem>>) attributes {dimension_semantics = [#tpu.dimension_semantics<parallel>], iteration_bounds = array<i64: 1>, scalar_prefetch = 0 : i64, scratch_operands = 0 : i64, tpu.core_type = #tpu.core_type<tc>, window_params = [{transform_indices = @transform_0, window_bounds = array<i64: 8, 16>}, {transform_indices = @transform_1, window_bounds = array<i64: 8, 16, 256>}, {pipeline_mode = #tpu.pipeline_mode<synchronous>, transform_indices = @transform_2, window_bounds = array<i64: 256, 768>}, {pipeline_mode = #tpu.pipeline_mode<synchronous>, transform_indices = @transform_3, window_bounds = array<i64: 1, 768>}, {pipeline_mode = #tpu.pipeline_mode<synchronous>, transform_indices = @transform_4, window_bounds = array<i64: 768, 768>}, {pipeline_mode = #tpu.pipeline_mode<synchronous>, transform_indices = @transform_5, window_bounds = array<i64: 1, 768>}, {pipeline_mode = #tpu.pipeline_mode<synchronous>, transform_indices = @transform_6, window_bounds = array<i64: 768, 384>}, {pipeline_mode = #tpu.pipeline_mode<synchronous>, transform_indices = @transform_7, window_bounds = array<i64: 1, 384>}, {transform_indices = @transform_8, window_bounds = array<i64: 8, 384>}]} {
    %c0 = arith.constant 0 : index
    %c0_0 = arith.constant 0 : index
    %0 = vector.load %arg1[%c0, %c0_0] : memref<8x16xf32, #tpu.memory_space<vmem>>, vector<8x16xf32>
    %c0_1 = arith.constant 0 : index
    %c0_2 = arith.constant 0 : index
    %c0_3 = arith.constant 0 : index
    %1 = vector.load %arg2[%c0_1, %c0_2, %c0_3] : memref<8x16x256xbf16, #tpu.memory_space<vmem>>, vector<8x16x256xbf16>
    %2 = vector.shape_cast %0 : vector<8x16xf32> to vector<8x16x1xf32>
    %3 = arith.extf %1 : vector<8x16x256xbf16> to vector<8x16x256xf32>
    %4 = vector.broadcast %2 : vector<8x16x1xf32> to vector<8x16x256xf32>
    %5 = arith.mulf %3, %4 : vector<8x16x256xf32>
    %cst = arith.constant dense<0.000000e+00> : vector<8x256xf32>
    %6 = vector.multi_reduction <add>, %5, %cst [1] : vector<8x16x256xf32> to vector<8x256xf32>
    %7 = arith.truncf %6 : vector<8x256xf32> to vector<8x256xbf16>
    %c0_4 = arith.constant 0 : index
    %c0_5 = arith.constant 0 : index
    %8 = vector.load %arg3[%c0_4, %c0_5] : memref<256x768xbf16, #tpu.memory_space<vmem>>, vector<256x768xbf16>
    %cst_6 = arith.constant dense<0.000000e+00> : vector<8x768xf32>
    %9 = tpu.matmul %7, %8, %cst_6 {dimension_numbers = #tpu.dot_dimension_numbers<[1], [0], [0], [1], [0, 0, 1, 1], [], []>} : vector<8x256xbf16>, vector<256x768xbf16>, vector<8x768xf32> -> vector<8x768xf32>
    %c0_7 = arith.constant 0 : index
    %c0_8 = arith.constant 0 : index
    %10 = vector.load %arg4[%c0_7, %c0_8] : memref<1x768xf32, #tpu.memory_space<vmem>>, vector<1x768xf32>
    %11 = vector.broadcast %10 : vector<1x768xf32> to vector<8x768xf32>
    %12 = arith.addf %9, %11 : vector<8x768xf32>
    %13 = arith.truncf %12 : vector<8x768xf32> to vector<8x768xbf16>
    %c0_9 = arith.constant 0 : index
    %c0_10 = arith.constant 0 : index
    %14 = vector.load %arg5[%c0_9, %c0_10] : memref<768x768xbf16, #tpu.memory_space<vmem>>, vector<768x768xbf16>
    %cst_11 = arith.constant dense<0.000000e+00> : vector<8x768xf32>
    %15 = tpu.matmul %13, %14, %cst_11 {dimension_numbers = #tpu.dot_dimension_numbers<[1], [0], [0], [1], [0, 0, 1, 1], [], []>} : vector<8x768xbf16>, vector<768x768xbf16>, vector<8x768xf32> -> vector<8x768xf32>
    %c0_12 = arith.constant 0 : index
    %c0_13 = arith.constant 0 : index
    %16 = vector.load %arg6[%c0_12, %c0_13] : memref<1x768xf32, #tpu.memory_space<vmem>>, vector<1x768xf32>
    %17 = vector.broadcast %16 : vector<1x768xf32> to vector<8x768xf32>
    %18 = arith.addf %15, %17 : vector<8x768xf32>
    %cst_14 = arith.constant 0.000000e+00 : f32
    %19 = vector.broadcast %cst_14 : f32 to vector<8x768xf32>
    %20 = arith.maximumf %18, %19 : vector<8x768xf32>
    %21 = arith.truncf %20 : vector<8x768xf32> to vector<8x768xbf16>
    %c0_15 = arith.constant 0 : index
    %c0_16 = arith.constant 0 : index
    %22 = vector.load %arg7[%c0_15, %c0_16] : memref<768x384xbf16, #tpu.memory_space<vmem>>, vector<768x384xbf16>
    %cst_17 = arith.constant dense<0.000000e+00> : vector<8x384xf32>
    %23 = tpu.matmul %21, %22, %cst_17 {dimension_numbers = #tpu.dot_dimension_numbers<[1], [0], [0], [1], [0, 0, 1, 1], [], []>} : vector<8x768xbf16>, vector<768x384xbf16>, vector<8x384xf32> -> vector<8x384xf32>
    %c0_18 = arith.constant 0 : index
    %c0_19 = arith.constant 0 : index
    %24 = vector.load %arg8[%c0_18, %c0_19] : memref<1x384xf32, #tpu.memory_space<vmem>>, vector<1x384xf32>
    %25 = vector.broadcast %24 : vector<1x384xf32> to vector<8x384xf32>
    %26 = arith.addf %23, %25 : vector<8x384xf32>
    %27 = arith.truncf %26 : vector<8x384xf32> to vector<8x384xbf16>
    %c0_20 = arith.constant 0 : index
    %c0_21 = arith.constant 0 : index
    %28 = vector.load %arg9[%c0_20, %c0_21] : memref<8x384xbf16, #tpu.memory_space<vmem>>, vector<8x384xbf16>
    tpu.vector_store %arg9[%c0_20, %c0_21], %27 {strides = array<i32>} : memref<8x384xbf16, #tpu.memory_space<vmem>>, vector<8x384xbf16>,
    return
  }
  func.func @transform_0(%arg0: i32) -> (i32, i32) {
    %c0_i32 = arith.constant 0 : i32
    %c0_i32_0 = arith.constant 0 : i32
    return %arg0, %c0_i32 : i32, i32
  }
  func.func @transform_1(%arg0: i32) -> (i32, i32, i32) {
    %c0_i32 = arith.constant 0 : i32
    %c0_i32_0 = arith.constant 0 : i32
    %c0_i32_1 = arith.constant 0 : i32
    return %arg0, %c0_i32, %c0_i32_0 : i32, i32, i32
  }
  func.func @transform_2(%arg0: i32) -> (i32, i32) {
    %c0_i32 = arith.constant 0 : i32
    %c0_i32_0 = arith.constant 0 : i32
    %c0_i32_1 = arith.constant 0 : i32
    return %c0_i32, %c0_i32_0 : i32, i32
  }
  func.func @transform_3(%arg0: i32) -> (i32, i32) {
    %c0_i32 = arith.constant 0 : i32
    %c0_i32_0 = arith.constant 0 : i32
    %c0_i32_1 = arith.constant 0 : i32
    return %c0_i32, %c0_i32_0 : i32, i32
  }
  func.func @transform_4(%arg0: i32) -> (i32, i32) {
    %c0_i32 = arith.constant 0 : i32
    %c0_i32_0 = arith.constant 0 : i32
    %c0_i32_1 = arith.constant 0 : i32
    return %c0_i32, %c0_i32_0 : i32, i32
  }
  func.func @transform_5(%arg0: i32) -> (i32, i32) {
    %c0_i32 = arith.constant 0 : i32
    %c0_i32_0 = arith.constant 0 : i32
    %c0_i32_1 = arith.constant 0 : i32
    return %c0_i32, %c0_i32_0 : i32, i32
  }
  func.func @transform_6(%arg0: i32) -> (i32, i32) {
    %c0_i32 = arith.constant 0 : i32
    %c0_i32_0 = arith.constant 0 : i32
    %c0_i32_1 = arith.constant 0 : i32
    return %c0_i32, %c0_i32_0 : i32, i32
  }
  func.func @transform_7(%arg0: i32) -> (i32, i32) {
    %c0_i32 = arith.constant 0 : i32
    %c0_i32_0 = arith.constant 0 : i32
    %c0_i32_1 = arith.constant 0 : i32
    return %c0_i32, %c0_i32_0 : i32, i32
  }
  func.func @transform_8(%arg0: i32) -> (i32, i32) {
    %c0_i32 = arith.constant 0 : i32
    %c0_i32_0 = arith.constant 0 : i32
    return %arg0, %c0_i32 : i32, i32
  }
}

module attributes {stable_mosaic.version = 11 : i64} {
  func.func @model_kernel(%arg0: i32, %arg1: memref<8x16xf32, #tpu.memory_space<vmem>>, %arg2: memref<8x16x256xbf16, #tpu.memory_space<vmem>>, %arg3: memref<256x768xbf16, #tpu.memory_space<vmem>>, %arg4: memref<1x768xf32, #tpu.memory_space<vmem>>, %arg5: memref<768x768xbf16, #tpu.memory_space<vmem>>, %arg6: memref<1x768xf32, #tpu.memory_space<vmem>>, %arg7: memref<768x384xbf16, #tpu.memory_space<vmem>>, %arg8: memref<1x384xf32, #tpu.memory_space<vmem>>, %arg9: memref<8x384xbf16, #tpu.memory_space<vmem>>) attributes {dimension_semantics = [#tpu.dimension_semantics<parallel>], iteration_bounds = array<i64: 1>, scalar_prefetch = 0 : i64, scratch_operands = 0 : i64, tpu.core_type = #tpu.core_type<tc>, window_params = [{transform_indices = @transform_0, window_bounds = array<i64: 8, 16>}, {transform_indices = @transform_1, window_bounds = array<i64: 8, 16, 256>}, {pipeline_mode = #tpu.pipeline_mode<synchronous>, transform_indices = @transform_2, window_bounds = array<i64: 256, 768>}, {pipeline_mode = #tpu.pipeline_mode<synchronous>, transform_indices = @transform_3, window_bounds = array<i64: 1, 768>}, {pipeline_mode = #tpu.pipeline_mode<synchronous>, transform_indices = @transform_4, window_bounds = array<i64: 768, 768>}, {pipeline_mode = #tpu.pipeline_mode<synchronous>, transform_indices = @transform_5, window_bounds = array<i64: 1, 768>}, {pipeline_mode = #tpu.pipeline_mode<synchronous>, transform_indices = @transform_6, window_bounds = array<i64: 768, 384>}, {pipeline_mode = #tpu.pipeline_mode<synchronous>, transform_indices = @transform_7, window_bounds = array<i64: 1, 384>}, {transform_indices = @transform_8, window_bounds = array<i64: 8, 384>}]} {
    %c0 = arith.constant 0 : index
    %c0_0 = arith.constant 0 : index
    %0 = vector.load %arg1[%c0, %c0_0] : memref<8x16xf32, #tpu.memory_space<vmem>>, vector<8x16xf32>
    %c0_1 = arith.constant 0 : index
    %c0_2 = arith.constant 0 : index
    %c0_3 = arith.constant 0 : index
    %1 = vector.load %arg2[%c0_1, %c0_2, %c0_3] : memref<8x16x256xbf16, #tpu.memory_space<vmem>>, vector<8x16x256xbf16>
    %2 = vector.shape_cast %0 : vector<8x16xf32> to vector<8x16x1xf32>
    %3 = arith.extf %1 : vector<8x16x256xbf16> to vector<8x16x256xf32>
    %4 = vector.broadcast %2 : vector<8x16x1xf32> to vector<8x16x256xf32>
    %5 = arith.mulf %3, %4 : vector<8x16x256xf32>
    %cst = arith.constant dense<0.000000e+00> : vector<8x256xf32>
    %6 = vector.multi_reduction <add>, %5, %cst [1] : vector<8x16x256xf32> to vector<8x256xf32>
    %7 = arith.truncf %6 : vector<8x256xf32> to vector<8x256xbf16>
    %c0_4 = arith.constant 0 : index
    %c0_5 = arith.constant 0 : index
    %8 = vector.load %arg3[%c0_4, %c0_5] : memref<256x768xbf16, #tpu.memory_space<vmem>>, vector<256x768xbf16>
    %cst_6 = arith.constant dense<0.000000e+00> : vector<8x768xf32>
    %9 = tpu.matmul %7, %8, %cst_6 {dimension_numbers = #tpu.dot_dimension_numbers<[1], [0], [0], [1], [0, 0, 1, 1], [], []>} : vector<8x256xbf16>, vector<256x768xbf16>, vector<8x768xf32> -> vector<8x768xf32>
    %c0_7 = arith.constant 0 : index
    %c0_8 = arith.constant 0 : index
    %10 = vector.load %arg4[%c0_7, %c0_8] : memref<1x768xf32, #tpu.memory_space<vmem>>, vector<1x768xf32>
    %11 = vector.broadcast %10 : vector<1x768xf32> to vector<8x768xf32>
    %12 = arith.addf %9, %11 : vector<8x768xf32>
    %13 = arith.truncf %12 : vector<8x768xf32> to vector<8x768xbf16>
    %c0_9 = arith.constant 0 : index
    %c0_10 = arith.constant 0 : index
    %14 = vector.load %arg5[%c0_9, %c0_10] : memref<768x768xbf16, #tpu.memory_space<vmem>>, vector<768x768xbf16>
    %cst_11 = arith.constant dense<0.000000e+00> : vector<8x768xf32>
    %15 = tpu.matmul %13, %14, %cst_11 {dimension_numbers = #tpu.dot_dimension_numbers<[1], [0], [0], [1], [0, 0, 1, 1], [], []>} : vector<8x768xbf16>, vector<768x768xbf16>, vector<8x768xf32> -> vector<8x768xf32>
    %c0_12 = arith.constant 0 : index
    %c0_13 = arith.constant 0 : index
    %16 = vector.load %arg6[%c0_12, %c0_13] : memref<1x768xf32, #tpu.memory_space<vmem>>, vector<1x768xf32>
    %17 = vector.broadcast %16 : vector<1x768xf32> to vector<8x768xf32>
    %18 = arith.addf %15, %17 : vector<8x768xf32>
    %cst_14 = arith.constant 0.000000e+00 : f32
    %19 = vector.broadcast %cst_14 : f32 to vector<8x768xf32>
    %20 = arith.maximumf %18, %19 : vector<8x768xf32>
    %21 = arith.truncf %20 : vector<8x768xf32> to vector<8x768xbf16>
    %c0_15 = arith.constant 0 : index
    %c0_16 = arith.constant 0 : index
    %22 = vector.load %arg7[%c0_15, %c0_16] : memref<768x384xbf16, #tpu.memory_space<vmem>>, vector<768x384xbf16>
    %cst_17 = arith.constant dense<0.000000e+00> : vector<8x384xf32>
    %23 = tpu.matmul %21, %22, %cst_17 {dimension_numbers = #tpu.dot_dimension_numbers<[1], [0], [0], [1], [0, 0, 1, 1], [], []>} : vector<8x768xbf16>, vector<768x384xbf16>, vector<8x384xf32> -> vector<8x384xf32>
    %c0_18 = arith.constant 0 : index
    %c0_19 = arith.constant 0 : index
    %24 = vector.load %arg8[%c0_18, %c0_19] : memref<1x384xf32, #tpu.memory_space<vmem>>, vector<1x384xf32>
    %25 = vector.broadcast %24 : vector<1x384xf32> to vector<8x384xf32>
    %26 = arith.addf %23, %25 : vector<8x384xf32>
    %27 = arith.truncf %26 : vector<8x384xf32> to vector<8x384xbf16>
    %c0_20 = arith.constant 0 : index
    %c0_21 = arith.constant 0 : index
    %28 = vector.load %arg9[%c0_20, %c0_21] : memref<8x384xbf16, #tpu.memory_space<vmem>>, vector<8x384xbf16>
    tpu.vector_store %arg9[%c0_20, %c0_21], %27 {strides = array<i32>} : memref<8x384xbf16, #tpu.memory_space<vmem>>, vector<8x384xbf16>,
    return
  }
  func.func @transform_0(%arg0: i32) -> (i32, i32) {
    %c0_i32 = arith.constant 0 : i32
    %c0_i32_0 = arith.constant 0 : i32
    return %arg0, %c0_i32 : i32, i32
  }
  func.func @transform_1(%arg0: i32) -> (i32, i32, i32) {
    %c0_i32 = arith.constant 0 : i32
    %c0_i32_0 = arith.constant 0 : i32
    %c0_i32_1 = arith.constant 0 : i32
    return %arg0, %c0_i32, %c0_i32_0 : i32, i32, i32
  }
  func.func @transform_2(%arg0: i32) -> (i32, i32) {
    %c0_i32 = arith.constant 0 : i32
    %c0_i32_0 = arith.constant 0 : i32
    %c0_i32_1 = arith.constant 0 : i32
    return %c0_i32, %c0_i32_0 : i32, i32
  }
  func.func @transform_3(%arg0: i32) -> (i32, i32) {
    %c0_i32 = arith.constant 0 : i32
    %c0_i32_0 = arith.constant 0 : i32
    %c0_i32_1 = arith.constant 0 : i32
    return %c0_i32, %c0_i32_0 : i32, i32
  }
  func.func @transform_4(%arg0: i32) -> (i32, i32) {
    %c0_i32 = arith.constant 0 : i32
    %c0_i32_0 = arith.constant 0 : i32
    %c0_i32_1 = arith.constant 0 : i32
    return %c0_i32, %c0_i32_0 : i32, i32
  }
  func.func @transform_5(%arg0: i32) -> (i32, i32) {
    %c0_i32 = arith.constant 0 : i32
    %c0_i32_0 = arith.constant 0 : i32
    %c0_i32_1 = arith.constant 0 : i32
    return %c0_i32, %c0_i32_0 : i32, i32
  }
  func.func @transform_6(%arg0: i32) -> (i32, i32) {
    %c0_i32 = arith.constant 0 : i32
    %c0_i32_0 = arith.constant 0 : i32
    %c0_i32_1 = arith.constant 0 : i32
    return %c0_i32, %c0_i32_0 : i32, i32
  }
  func.func @transform_7(%arg0: i32) -> (i32, i32) {
    %c0_i32 = arith.constant 0 : i32
    %c0_i32_0 = arith.constant 0 : i32
    %c0_i32_1 = arith.constant 0 : i32
    return %c0_i32, %c0_i32_0 : i32, i32
  }
  func.func @transform_8(%arg0: i32) -> (i32, i32) {
    %c0_i32 = arith.constant 0 : i32
    %c0_i32_0 = arith.constant 0 : i32
    return %arg0, %c0_i32 : i32, i32
  }
}

</mosaic_0001>

<bundles_post_ra>
// kernel: tpu_custom_call.1
= control target key start
LH: loop header
LB: loop body
LE: loop exit
PB: predicated region body
PF: predicated region fallthrough
CT: control target
= control target key end

     0   :  { %13 = vsyncpa [#allocation3], 0  ;;  %s6586_s0 = inlined_call_operand.hbm [shape: f32[8,16], index: 0, kind: input, shape index: {}]   ;;  %s6587_s1 = inlined_call_operand.hbm [shape: bf16[8,16,256], index: 1, kind: input, shape index: {}]   ;;  %s6588_s2 = inlined_call_operand.hbm [shape: bf16[256,768], index: 2, kind: input, shape index: {}]   ;;  %s6589_s3 = inlined_call_operand.hbm [shape: f32[1,768], index: 3, kind: input, shape index: {}]   ;;  %s6590_s4 = inlined_call_operand.hbm [shape: bf16[768,768], index: 4, kind: input, shape index: {}]   ;;  %s6591_s5 = inlined_call_operand.hbm [shape: f32[1,768], index: 5, kind: input, shape index: {}]   ;;  %s6592_s6 = inlined_call_operand.hbm [shape: bf16[768,384], index: 6, kind: input, shape index: {}]   ;;  %s6593_s7 = inlined_call_operand.hbm [shape: f32[1,384], index: 7, kind: input, shape index: {}]   ;;  %s6594_s8 = inlined_call_operand.hbm [shape: bf16[8,384], index: 8, kind: output, shape index: {}]  }
   0x1   :  { %14 = vsyncpa [#allocation6], 0 }
   0x2   :  { %15 = vsyncpa [#allocation9], 0 }
   0x3   :  { %16 = vsyncpa [#allocation12], 0 }
   0x4   :  { %17 = vsyncpa [#allocation15], 0 }
   0x5   :  { %18 = vsyncpa [#allocation4], 0  ;;  %s6249_s27 = smov [#allocation5]   ;;  %s6039_s9 = scalar_lea.hbm %s6587_s1, 2048 }
   0x6   :  { %s34_s28 = sshll.u32 %s6249_s27, 4  ;;  %p6040_p0 = scmp.ne.s32.totalorder %s6587_s1, %s6039_s9  ;;  %s35_s28 = int_to_ptr.vmem [resolvable:$true] %s34_s28 }
   0x7   :  { %p6043_p1 = scmp.lt.u32.totalorder %s6039_s9, %s6587_s1 }
   0x9   :  { %p6045_p2 = pnand %p6043_p1, %p6040_p0 }
   0xb   :  { %6048 = shalt.err (!%p6045_p2)
}
   0xc   :  { %s6049_s14 = scalar_lea.vmem %s35_s28, 2048  ;;  %p6054_p4 = scmp.lt.s32.totalorder %s35_s28, %s35_s28 }
   0xd   :  { %p6050_p3 = scmp.ne.s32.totalorder %s35_s28, %s6049_s14  ;;  %p6055_p5 = scmp.lt.s32.totalorder %s6049_s14, %s6049_s14 }
   0xf   :  { %p6056_p6 = por %p6055_p5, %p6054_p4 }
  0x11   :  { %p6057_p7 = pnand %p6056_p6, %p6050_p3 }
  0x13   :  { %6060 = shalt.err (!%p6057_p7)
}
  0x14   :  { %s6250_s15 = smov 128   ;;  %s6251_s16 = smov 8  }
  0x15   :  { %40 = dma.hbm_to_vmem [thread:$0]  %s6587_s1, 2048, %s35_s28, [#allocation6], %s6250_s15, %s6250_s15, %s6251_s16  }
  0x16   :  { %s6252_s19 = smov [#allocation8]   ;;  %s6253_s21 = smov [#allocation11]  }
  0x17   :  { %s59_s20 = sshll.u32 %s6252_s19, 4  ;;  %s81_s22 = sshll.u32 %s6253_s21, 4  ;;  %s60_s20 = int_to_ptr.vmem [resolvable:$true] %s59_s20  ;;  %s82_s22 = int_to_ptr.vmem [resolvable:$true] %s81_s22 }
  0x18   :  { %s6061_s25 = scalar_lea.hbm %s6589_s3, 96 }
  0x19   :  { %p6062_p8 = scmp.ne.s32.totalorder %s6589_s3, %s6061_s25  ;;  %p6065_p9 = scmp.lt.u32.totalorder %s6061_s25, %s6589_s3 }
  0x1b   :  { %p6067_p10 = pnand %p6065_p9, %p6062_p8 }
  0x1d   :  { %6070 = shalt.err (!%p6067_p10)
}
  0x1e   :  { %s6071_s1 = scalar_lea.vmem %s60_s20, 96  ;;  %p6076_p12 = scmp.lt.s32.totalorder %s60_s20, %s60_s20 }
  0x1f   :  { %p6072_p11 = scmp.ne.s32.totalorder %s60_s20, %s6071_s1  ;;  %p6077_p13 = scmp.lt.s32.totalorder %s6071_s1, %s6071_s1 }
  0x21   :  { %p6078_p0 = por %p6077_p13, %p6076_p12 }
  0x23   :  { %p6079_p1 = pnand %p6078_p0, %p6072_p11 }
  0x25   :  { %6082 = shalt.err (!%p6079_p1)
}
  0x26   :  { %62 = dma.hbm_to_vmem [thread:$0]  %s6589_s3, 96, %s60_s20, [#allocation9]  }
  0x27   :  { %s6083_s12 = scalar_lea.hbm %s6591_s5, 96 }
  0x28   :  { %p6084_p2 = scmp.ne.s32.totalorder %s6591_s5, %s6083_s12  ;;  %p6087_p3 = scmp.lt.u32.totalorder %s6083_s12, %s6591_s5 }
  0x2a   :  { %p6089_p4 = pnand %p6087_p3, %p6084_p2 }
  0x2c   :  { %6092 = shalt.err (!%p6089_p4)
}
  0x2d   :  { %s6093_s17 = scalar_lea.vmem %s82_s22, 96  ;;  %p6098_p6 = scmp.lt.s32.totalorder %s82_s22, %s82_s22 }
  0x2e   :  { %p6094_p5 = scmp.ne.s32.totalorder %s82_s22, %s6093_s17  ;;  %p6099_p7 = scmp.lt.s32.totalorder %s6093_s17, %s6093_s17 }
  0x30   :  { %p6100_p8 = por %p6099_p7, %p6098_p6 }
  0x32   :  { %p6101_p9 = pnand %p6100_p8, %p6094_p5 }
  0x34   :  { %6104 = shalt.err (!%p6101_p9)
}
  0x35   :  { %84 = dma.hbm_to_vmem [thread:$0]  %s6591_s5, 96, %s82_s22, [#allocation12]  }
  0x36   :  { %s6254_s19 = smov [#allocation2]   ;;  %s6255_s21 = smov [#allocation7]  }
  0x37   :  { %s25_s20 = sshll.u32 %s6254_s19, 4  ;;  %s46_s23 = sshll.u32 %s6255_s21, 4  ;;  %s26_s20 = int_to_ptr.vmem [resolvable:$true] %s25_s20  ;;  %s47_s23 = int_to_ptr.vmem [resolvable:$true] %s46_s23 }
  0x38   :  { %s6105_s26 = scalar_lea.hbm %s6586_s0, 128 }
  0x39   :  { %p6106_p10 = scmp.ne.s32.totalorder %s6586_s0, %s6105_s26  ;;  %p6109_p11 = scmp.lt.u32.totalorder %s6105_s26, %s6586_s0 }
  0x3b   :  { %p6111_p12 = pnand %p6109_p11, %p6106_p10 }
  0x3d   :  { %6114 = shalt.err (!%p6111_p12)
}
  0x3e   :  { %s6115_s5 = scalar_lea.vmem %s26_s20, 128  ;;  %p6120_p0 = scmp.lt.s32.totalorder %s26_s20, %s26_s20 }
  0x3f   :  { %p6116_p13 = scmp.ne.s32.totalorder %s26_s20, %s6115_s5  ;;  %p6121_p1 = scmp.lt.s32.totalorder %s6115_s5, %s6115_s5 }
  0x41   :  { %p6122_p2 = por %p6121_p1, %p6120_p0 }
  0x43   :  { %p6123_p3 = pnand %p6122_p2, %p6116_p13 }
  0x45   :  { %6126 = shalt.err (!%p6123_p3)
}
  0x46   :  { %28 = dma.hbm_to_vmem [thread:$0]  %s6586_s0, 128, %s26_s20, [#allocation3]  }
  0x47   :  { %s6127_s11 = scalar_lea.hbm %s6588_s2, 12288 }
  0x48   :  { %p6128_p4 = scmp.ne.s32.totalorder %s6588_s2, %s6127_s11  ;;  %p6131_p5 = scmp.lt.u32.totalorder %s6127_s11, %s6588_s2 }
  0x4a   :  { %p6133_p6 = pnand %p6131_p5, %p6128_p4 }
  0x4c   :  { %6136 = shalt.err (!%p6133_p6)
}
  0x4d   :  { %s6137_s16 = scalar_lea.vmem %s47_s23, 12288  ;;  %p6142_p8 = scmp.lt.s32.totalorder %s47_s23, %s47_s23 }
  0x4e   :  { %p6138_p7 = scmp.ne.s32.totalorder %s47_s23, %s6137_s16  ;;  %p6143_p9 = scmp.lt.s32.totalorder %s6137_s16, %s6137_s16 }
  0x50   :  { %p6144_p10 = por %p6143_p9, %p6142_p8 }
  0x52   :  { %p6145_p11 = pnand %p6144_p10, %p6138_p7 }
  0x54   :  { %6148 = shalt.err (!%p6145_p11)
}
  0x55   :  { %s6256_s0 = smov 384   ;;  %s6257_s17 = smov 24  }
  0x56   :  { %52 = dma.hbm_to_vmem [thread:$0]  %s6588_s2, 12288, %s47_s23, [#allocation6], %s6256_s0, %s6256_s0, %s6257_s17  }
  0x57   :  { %s6258_s19 = smov [#allocation10]   ;;  %s6259_s21 = smov [#allocation13]  }
  0x58   :  { %s68_s20 = sshll.u32 %s6258_s19, 4  ;;  %s90_s24 = sshll.u32 %s6259_s21, 4  ;;  %s69_s20 = int_to_ptr.vmem [resolvable:$true] %s68_s20  ;;  %s91_s24 = int_to_ptr.vmem [resolvable:$true] %s90_s24 }
  0x59   :  { %s6149_s27 = scalar_lea.hbm %s6590_s4, 36864 }
  0x5a   :  { %p6150_p12 = scmp.ne.s32.totalorder %s6590_s4, %s6149_s27  ;;  %p6153_p13 = scmp.lt.u32.totalorder %s6149_s27, %s6590_s4 }
  0x5c   :  { %p6155_p0 = pnand %p6153_p13, %p6150_p12 }
  0x5e   :  { %6158 = shalt.err (!%p6155_p0)
}
  0x5f   :  { %s6159_s2 = scalar_lea.vmem %s69_s20, 36864  ;;  %p6164_p2 = scmp.lt.s32.totalorder %s69_s20, %s69_s20 }
  0x60   :  { %p6160_p1 = scmp.ne.s32.totalorder %s69_s20, %s6159_s2  ;;  %p6165_p3 = scmp.lt.s32.totalorder %s6159_s2, %s6159_s2 }
  0x62   :  { %p6166_p4 = por %p6165_p3, %p6164_p2 }
  0x64   :  { %p6167_p5 = pnand %p6166_p4, %p6160_p1 }
  0x66   :  { %6170 = shalt.err (!%p6167_p5)
}
  0x67   :  { %74 = dma.hbm_to_vmem [thread:$0]  %s6590_s4, 36864, %s69_s20, [#allocation9], %s6256_s0, %s6256_s0, %s6257_s17  }
  0x68   :  { %s6171_s10 = scalar_lea.hbm %s6592_s6, 18432 }
  0x69   :  { %p6172_p6 = scmp.ne.s32.totalorder %s6592_s6, %s6171_s10  ;;  %p6175_p7 = scmp.lt.u32.totalorder %s6171_s10, %s6592_s6 }
  0x6b   :  { %p6177_p8 = pnand %p6175_p7, %p6172_p6 }
  0x6d   :  { %6180 = shalt.err (!%p6177_p8)
}
  0x6e   :  { %s6181_s15 = scalar_lea.vmem %s91_s24, 18432  ;;  %p6186_p10 = scmp.lt.s32.totalorder %s91_s24, %s91_s24 }
  0x6f   :  { %p6182_p9 = scmp.ne.s32.totalorder %s91_s24, %s6181_s15  ;;  %p6187_p11 = scmp.lt.s32.totalorder %s6181_s15, %s6181_s15 }
  0x71   :  { %p6188_p12 = por %p6187_p11, %p6186_p10 }
  0x73   :  { %p6189_p13 = pnand %p6188_p12, %p6182_p9 }
  0x75   :  { %6192 = shalt.err (!%p6189_p13)
}
  0x76   :  { %s6260_s4 = smov 192   ;;  %s6261_s16 = smov 12  }
  0x77   :  { %96 = dma.hbm_to_vmem [thread:$0]  %s6592_s6, 18432, %s91_s24, [#allocation12], %s6260_s4, %s6260_s4, %s6261_s16  }
  0x78   :  { %s6262_s3 = smov [#allocation14]   ;;  %s6193_s21 = scalar_lea.hbm %s6593_s7, 48 }
  0x79   :  { %s103_s18 = sshll.u32 %s6262_s3, 4  ;;  %p6194_p0 = scmp.ne.s32.totalorder %s6593_s7, %s6193_s21  ;;  %s104_s18 = int_to_ptr.vmem [resolvable:$true] %s103_s18 }
  0x7a   :  { %p6197_p1 = scmp.lt.u32.totalorder %s6193_s21, %s6593_s7 }
  0x7c   :  { %p6199_p2 = pnand %p6197_p1, %p6194_p0 }
  0x7e   :  { %6202 = shalt.err (!%p6199_p2)
}
  0x7f   :  { %s6203_s30 = scalar_lea.vmem %s104_s18, 48  ;;  %s6207_s6 = scalar_lea.vmem %s104_s18, 64 }
  0x80   :  { %p6204_p3 = scmp.ne.s32.totalorder %s104_s18, %s6203_s30  ;;  %p6208_p4 = scmp.lt.s32.totalorder %s104_s18, %s104_s18 }
  0x81   :  { %p6209_p5 = scmp.lt.s32.totalorder %s6207_s6, %s6203_s30 }
  0x83   :  { %p6210_p6 = por %p6209_p5, %p6208_p4 }
  0x85   :  { %p6211_p7 = pnand %p6210_p6, %p6204_p3 }
  0x87   :  { %6214 = shalt.err (!%p6211_p7)
}
  0x88   :  { %106 = dma.hbm_to_vmem [thread:$0]  %s6593_s7, 48, %s104_s18, [#allocation15]  }
  0x89   :  { %6237 = dma.done.wait [#allocation3], 128  }
  0x8a   :  { %6238 = vsyncadd [#allocation3], 4294967168 }
  0x8b   :  { %6239 = dma.done.wait [#allocation6], 14336  }
  0x8c   :  { %6240 = vsyncadd [#allocation6], 4294952960 }
  0x8d   :  { %6241 = dma.done.wait [#allocation9], 36960  }
  0x8e   :  { %6242 = vsyncadd [#allocation9], 4294930336 }
  0x8f   :  { %6243 = dma.done.wait [#allocation12], 18528  }
  0x90   :  { %6244 = vsyncadd [#allocation12], 4294948768 }
  0x91   :  { %6245 = dma.done.wait [#allocation15], 48  }
  0x92   :  { %6246 = vsyncadd [#allocation15], 4294967248  ;;  %v149_v0 = vlaneseq  ;;  %v6413_v4 = vld [vmem:[#allocation2] sm:$0xff]  ;;  %v5274_v10 = vld [vmem:[#allocation7 + $0xc] ss:$24 sps:$4 sm:$0xff]   ;;  %vm589_vm0 = vcmask 1041409  }
  0x93   :  { %v5271_v7 = vld [vmem:[#allocation7 + $0x4] ss:$24 sps:$4 sm:$0xff]   ;;  %v5273_v8 = vld [vmem:[#allocation7] ss:$24 sps:$4 sm:$0xff]   ;;  %v5277_v12 = vld [vmem:[#allocation7 + $0x34] ss:$24 sps:$4 sm:$0xff]   ;;  %1135 = vmatprep.subr.bf16.mxu1 %v5274_v10 }
  0x94   :  { %v6405_v1 = vshrl.u32 %v149_v0, 7  ;;  %v5276_v11 = vld [vmem:[#allocation7 + $0x8] ss:$24 sps:$4 sm:$0xff]   ;;  %1094 = vmatprep.subr.bf16.mxu0 %v5271_v7  ;;  %v5280_v14 = vld [vmem:[#allocation7 + $0x3c] ss:$24 sps:$4 sm:$0xff]   ;;  %vm591_vm1 = vcmask 1042434  }
  0x95   :  { %v5279_v13 = vld [vmem:[#allocation7 + $0x30] ss:$24 sps:$4 sm:$0xff]   ;;  %1095 = vmatpush1.bf16.msra.mxu0 %v5273_v8  ;;  %1136 = vmatpush1.bf16.msra.mxu1 %v5276_v11  ;;  %v5283_v17 = vld [vmem:[#allocation7 + $0x64] ss:$24 sps:$4 sm:$0xff]   ;;  %v5285_v20 = vld [vmem:[#allocation7 + $0x60] ss:$24 sps:$4 sm:$0xff]  }
  0x96   :  { %v6408_v2 = vsub.s32 1, %v6405_v1  ;;  %v6411_v3 = vsub.s32 0, %v6405_v1  ;;  %v6420_v9 = vsub.s32 2, %v6405_v1  ;;  %v5282_v15 = vld [vmem:[#allocation7 + $0x38] ss:$24 sps:$4 sm:$0xff]   ;;  %v6423_v16 = vsub.s32 3, %v6405_v1  ;;  %1096 = vmatprep.subr.bf16.mxu0 %v5277_v12  ;;  %1137 = vmatprep.subr.bf16.mxu1 %v5280_v14 }
  0x97   :  { %v5286_v19 = vld [vmem:[#allocation7 + $0x6c] ss:$24 sps:$4 sm:$0xff]   ;;  %v5288_v21 = vld [vmem:[#allocation7 + $0x68] ss:$24 sps:$4 sm:$0xff]   ;;  %v6430_v24 = vsub.s32 4, %v6405_v1  ;;  %v6435_v31 = vsub.s32 5, %v6405_v1 }
  0x98   :  { %v163_v5 = vrot.slane %v6413_v4, %v6408_v2  ;;  %v152_v6 = vrot.slane %v6413_v4, %v6411_v3  ;;  %v174_v18 = vrot.slane %v6413_v4, %v6420_v9  ;;  %v5289_v22 = vld [vmem:[#allocation7 + $0x94] ss:$24 sps:$4 sm:$0xff]   ;;  %v185_v23 = vrot.slane %v6413_v4, %v6423_v16  ;;  %v5291_v26 = vld [vmem:[#allocation7 + $0x90] ss:$24 sps:$4 sm:$0xff]   ;;  %v5295_v28 = vld [vmem:[#allocation7 + $0xc4] ss:$24 sps:$4 sm:$0xff]  }
  0x99   :  { %1097 = vmatpush1.bf16.msra.mxu0 %v5279_v13  ;;  %1138 = vmatpush1.bf16.msra.mxu1 %v5282_v15  ;;  %v5292_v25 = vld [vmem:[#allocation7 + $0x9c] ss:$24 sps:$4 sm:$0xff]   ;;  %v5294_v27 = vld [vmem:[#allocation7 + $0x98] ss:$24 sps:$4 sm:$0xff]   ;;  %v5298_v29 = vld [vmem:[#allocation7 + $0xcc] ss:$24 sps:$4 sm:$0xff]   ;;  %v196_v30 = vrot.slane %v6413_v4, %v6430_v24  ;;  %v207_v36 = vrot.slane %v6413_v4, %v6435_v31 }
  0x9a   :  { %165 = vbcast.lane.b32.xlu1 %v163_v5, 256  ;;  %154 = vbcast.lane.b32.xlu0 %v152_v6, 256  ;;  %v5297_v32 = vld [vmem:[#allocation7 + $0xc0] ss:$24 sps:$4 sm:$0xff]   ;;  %v5301_v34 = vld [vmem:[#allocation7 + $0xf4] ss:$24 sps:$4 sm:$0xff]  }
  0x9b   :  { %1098 = vmatprep.subr.bf16.mxu0 %v5283_v17  ;;  %1139 = vmatprep.subr.bf16.mxu1 %v5286_v19  ;;  %v5300_v33 = vld [vmem:[#allocation7 + $0xc8] ss:$24 sps:$4 sm:$0xff]   ;;  %v5304_v35 = vld [vmem:[#allocation7 + $0xfc] ss:$24 sps:$4 sm:$0xff]   ;;  %v217_v37 = vsub.s32 6, %v6405_v1  ;;  %v228_v43 = vsub.s32 7, %v6405_v1 }
  0x9c   :  { %v5303_v38 = vld [vmem:[#allocation7 + $0xf0] ss:$24 sps:$4 sm:$0xff]   ;;  %v5307_v40 = vld [vmem:[#allocation7 + $0x124] ss:$24 sps:$4 sm:$0xff]   ;;  %v5309_v44 = vld [vmem:[#allocation7 + $0x120] ss:$24 sps:$4 sm:$0xff]  }
  0x9d   :  { %1099 = vmatpush1.bf16.msra.mxu0 %v5285_v20  ;;  %1140 = vmatpush1.bf16.msra.mxu1 %v5288_v21  ;;  %v5306_v39 = vld [vmem:[#allocation7 + $0xf8] ss:$24 sps:$4 sm:$0xff]   ;;  %v5310_v41 = vld [vmem:[#allocation7 + $0x12c] ss:$24 sps:$4 sm:$0xff]   ;;  %v218_v42 = vrot.slane %v6413_v4, %v217_v37  ;;  %v5312_v45 = vld [vmem:[#allocation7 + $0x128] ss:$24 sps:$4 sm:$0xff]   ;;  %v229_v48 = vrot.slane %v6413_v4, %v228_v43 }
  0x9e   :  { %169 = vbcast.lane.b32.xlu1 %v163_v5, 264  ;;  %158 = vbcast.lane.b32.xlu0 %v152_v6, 264  ;;  %v5313_v46 = vld [vmem:[#allocation7 + $0x154] ss:$24 sps:$4 sm:$0xff]   ;;  %v5315_v49 = vld [vmem:[#allocation7 + $0x150] ss:$24 sps:$4 sm:$0xff]  }
  0x9f   :  { %1100 = vmatprep.subr.bf16.mxu0 %v5289_v22  ;;  %1141 = vmatprep.subr.bf16.mxu1 %v5292_v25  ;;  %v5316_v47 = vld [vmem:[#allocation7 + $0x15c] ss:$24 sps:$4 sm:$0xff]   ;;  %v5318_v50 = vld [vmem:[#allocation7 + $0x158] ss:$24 sps:$4 sm:$0xff]   ;;  %v5322_v52 = vld [vmem:[#allocation7 + $0x18c] ss:$24 sps:$4 sm:$0xff]  }
  0xa0   :  { %v5319_v51 = vld [vmem:[#allocation7 + $0x184] ss:$24 sps:$4 sm:$0xff]   ;;  %v5321_v53 = vld [vmem:[#allocation7 + $0x180] ss:$24 sps:$4 sm:$0xff]   ;;  %v5325_v55 = vld [vmem:[#allocation7 + $0x1b4] ss:$24 sps:$4 sm:$0xff]  }
  0xa1   :  { %1101 = vmatpush1.bf16.msra.mxu0 %v5291_v26  ;;  %1142 = vmatpush1.bf16.msra.mxu1 %v5294_v27  ;;  %v5324_v54 = vld [vmem:[#allocation7 + $0x188] ss:$24 sps:$4 sm:$0xff]   ;;  %v5328_v56 = vld [vmem:[#allocation7 + $0x1bc] ss:$24 sps:$4 sm:$0xff]   ;;  %v5330_v58 = vld [vmem:[#allocation7 + $0x1b8] ss:$24 sps:$4 sm:$0xff]  }
  0xa2   :  { %180 = vbcast.lane.b32.xlu1 %v174_v18, 264  ;;  %176 = vbcast.lane.b32.xlu0 %v174_v18, 256  ;;  %v5327_v57 = vld [vmem:[#allocation7 + $0x1b0] ss:$24 sps:$4 sm:$0xff]   ;;  %v5331_v59 = vld [vmem:[#allocation7 + $0x1e4] ss:$24 sps:$4 sm:$0xff]  }
  0xa3   :  { %1102 = vmatprep.subr.bf16.mxu0 %v5295_v28  ;;  %1143 = vmatprep.subr.bf16.mxu1 %v5298_v29  ;;  %v5334_v60 = vld [vmem:[#allocation7 + $0x1ec] ss:$24 sps:$4 sm:$0xff]   ;;  %v5333_v61 = vld [vmem:[#allocation7 + $0x1e0] ss:$24 sps:$4 sm:$0xff]   ;;  %v5340_v0 = vld [vmem:[#allocation7 + $0x21c] ss:$24 sps:$4 sm:$0xff]  }
  0xa4   :  { %v5336_v62 = vld [vmem:[#allocation7 + $0x1e8] ss:$24 sps:$4 sm:$0xff]   ;;  %v5337_v63 = vld [vmem:[#allocation7 + $0x214] ss:$24 sps:$4 sm:$0xff]   ;;  %v5342_v4 = vld [vmem:[#allocation7 + $0x218] ss:$24 sps:$4 sm:$0xff]  }
  0xa5   :  { %1103 = vmatpush1.bf16.msra.mxu0 %v5297_v32  ;;  %1144 = vmatpush1.bf16.msra.mxu1 %v5300_v33  ;;  %v5339_v1 = vld [vmem:[#allocation7 + $0x210] ss:$24 sps:$4 sm:$0xff]   ;;  %v5343_v5 = vld [vmem:[#allocation7 + $0x244] ss:$24 sps:$4 sm:$0xff]   ;;  %v5345_v7 = vld [vmem:[#allocation7 + $0x240] ss:$24 sps:$4 sm:$0xff]  }
  0xa6   :  { %191 = vbcast.lane.b32.xlu1 %v185_v23, 264  ;;  %187 = vbcast.lane.b32.xlu0 %v185_v23, 256  ;;  %v5346_v6 = vld [vmem:[#allocation7 + $0x24c] ss:$24 sps:$4 sm:$0xff]   ;;  %v5348_v8 = vld [vmem:[#allocation7 + $0x248] ss:$24 sps:$4 sm:$0xff]  }
  0xa7   :  { %1104 = vmatprep.subr.bf16.mxu0 %v5301_v34  ;;  %1145 = vmatprep.subr.bf16.mxu1 %v5304_v35  ;;  %v5349_v10 = vld [vmem:[#allocation7 + $0x274] ss:$24 sps:$4 sm:$0xff]   ;;  %v5351_v12 = vld [vmem:[#allocation7 + $0x270] ss:$24 sps:$4 sm:$0xff]   ;;  %v5355_v14 = vld [vmem:[#allocation7 + $0x2a4] ss:$24 sps:$4 sm:$0xff]  }
  0xa8   :  { %v5352_v11 = vld [vmem:[#allocation7 + $0x27c] ss:$24 sps:$4 sm:$0xff]   ;;  %v5354_v13 = vld [vmem:[#allocation7 + $0x278] ss:$24 sps:$4 sm:$0xff]   ;;  %v5358_v15 = vld [vmem:[#allocation7 + $0x2ac] ss:$24 sps:$4 sm:$0xff]  }
  0xa9   :  { %1105 = vmatpush1.bf16.msra.mxu0 %v5303_v38  ;;  %1146 = vmatpush1.bf16.msra.mxu1 %v5306_v39  ;;  %v5357_v17 = vld [vmem:[#allocation7 + $0x2a0] ss:$24 sps:$4 sm:$0xff]   ;;  %v5361_v19 = vld [vmem:[#allocation7 + $0x2d4] ss:$24 sps:$4 sm:$0xff]   ;;  %v5363_v21 = vld [vmem:[#allocation7 + $0x2d0] ss:$24 sps:$4 sm:$0xff]  }
  0xaa   :  { %202 = vbcast.lane.b32.xlu1 %v196_v30, 264  ;;  %198 = vbcast.lane.b32.xlu0 %v196_v30, 256  ;;  %v5360_v18 = vld [vmem:[#allocation7 + $0x2a8] ss:$24 sps:$4 sm:$0xff]   ;;  %v5364_v20 = vld [vmem:[#allocation7 + $0x2dc] ss:$24 sps:$4 sm:$0xff]  }
  0xab   :  { %1106 = vmatprep.subr.bf16.mxu0 %v5307_v40  ;;  %1147 = vmatprep.subr.bf16.mxu1 %v5310_v41  ;;  %v5366_v22 = vld [vmem:[#allocation7 + $0x2d8] ss:$24 sps:$4 sm:$0xff]   ;;  %v5369_v23 = vld [vmem:[#allocation7 + $0x14] ss:$24 sps:$4 sm:$0xff]   ;;  %v133_v26 = vld [vmem:[#allocation5] sm:$0xff]  ;;  %vm593_vm2 = vcmask 1043459  }
  0xac   :  { %v135_v25 = vld [vmem:[#allocation5 + $0x10] sm:$0xff]  ;;  %v136_v27 = vld [vmem:[#allocation5 + $0x18] sm:$0xff]  ;;  %v134_v28 = vld [vmem:[#allocation5 + $0x8] sm:$0xff]  ;;  %v237_v34 = vunpack.c.l.bf16 %v133_v26  ;;  %v238_v35 = vunpack.c.h.bf16 %v133_v26  ;;  %vm595_vm3 = vcmask 1044484   ;;  %vm597_vm4 = vcmask 1045509   ;;  %s6263_s7 = smov [#allocation16]  }
  0xad   :  { %1107 = vmatpush1.bf16.msra.mxu0 %v5309_v44  ;;  %1148 = vmatpush1.bf16.msra.mxu1 %v5312_v45  ;;  %v5417_v29 = vld [vmem:[#allocation10 + $0x4] ss:$24 sps:$4 sm:$0xff]   ;;  %v241_v30 = vunpack.c.l.bf16 %v135_v25  ;;  %v242_v32 = vunpack.c.h.bf16 %v135_v25  ;;  %v243_v37 = vunpack.c.l.bf16 %v136_v27  ;;  %v244_v38 = vunpack.c.h.bf16 %v136_v27  ;;  %v140_v43 = vld [vmem:[#allocation5 + $0x38] sm:$0xff]  ;;  %s4605_s5 = sshll.u32 %s6263_s7, 4  ;;  %s4606_s5 = int_to_ptr.vmem [resolvable:$true] %s4605_s5 }
  0xae   :  { %213 = vbcast.lane.b32.xlu1 %v207_v36, 264  ;;  %209 = vbcast.lane.b32.xlu0 %v207_v36, 256  ;;  %v239_v39 = vunpack.c.l.bf16 %v134_v28  ;;  %v240_v40 = vunpack.c.h.bf16 %v134_v28  ;;  %v138_v41 = vld [vmem:[#allocation5 + $0x28] sm:$0xff]  ;;  %vm599_vm5 = vcmask 1046534   ;;  %vm601_vm6 = vcmask 1047559   ;;  %s6215_s2 = scalar_lea.vmem %s4606_s5, 192  ;;  %p6220_p9 = scmp.lt.s32.totalorder %s4606_s5, %s4606_s5 }
  0xaf   :  { %1108 = vmatprep.subr.bf16.mxu0 %v5313_v46  ;;  %1149 = vmatprep.subr.bf16.mxu1 %v5316_v47  ;;  %p6216_p8 = scmp.ne.s32.totalorder %s4606_s5, %s6215_s2  ;;  %p6221_p10 = scmp.lt.s32.totalorder %s6215_s2, %s6215_s2 }
  0xb1   :  { %1109 = vmatpush1.bf16.msra.mxu0 %v5315_v49  ;;  %1150 = vmatpush1.bf16.msra.mxu1 %v5318_v50  ;;  %v139_v50 = vld [vmem:[#allocation5 + $0x30] sm:$0xff]  ;;  %p6222_p11 = por %p6221_p10, %p6220_p9 }
  0xb2   :  { %224 = vbcast.lane.b32.xlu1 %v218_v42, 264  ;;  %220 = vbcast.lane.b32.xlu0 %v218_v42, 256  ;;  %v137_v42 = vld [vmem:[#allocation5 + $0x20] sm:$0xff] }
  0xb3   :  { %1110 = vmatprep.subr.bf16.mxu0 %v5319_v51  ;;  %1151 = vmatprep.subr.bf16.mxu1 %v5322_v52  ;;  %p6223_p12 = pnand %p6222_p11, %p6216_p8 }
  0xb5   :  { %1111 = vmatpush1.bf16.msra.mxu0 %v5321_v53  ;;  %1152 = vmatpush1.bf16.msra.mxu1 %v5324_v54 }
  0xb6   :  { %235 = vbcast.lane.b32.xlu1 %v229_v48, 264  ;;  %231 = vbcast.lane.b32.xlu0 %v229_v48, 256 }
  0xb7   :  { %1112 = vmatprep.subr.bf16.mxu0 %v5325_v55  ;;  %1153 = vmatprep.subr.bf16.mxu1 %v5328_v56  ;;  %v247_v55 = vunpack.c.l.bf16 %v138_v41  ;;  %v248_v56 = vunpack.c.h.bf16 %v138_v41 }
  0xb9   :  { %1113 = vmatpush1.bf16.msra.mxu0 %v5327_v57  ;;  %1154 = vmatpush1.bf16.msra.mxu1 %v5330_v58  ;;  %v245_v57 = vunpack.c.l.bf16 %v137_v42  ;;  %v246_v58 = vunpack.c.h.bf16 %v137_v42 }
  0xba   :  { %1114 = vmatprep.subr.bf16.mxu0 %v5331_v59  ;;  %1155 = vmatprep.subr.bf16.mxu1 %v5334_v60 }
  0xbd   :  { %1115 = vmatpush1.bf16.msra.mxu0 %v5333_v61  ;;  %1156 = vmatpush1.bf16.msra.mxu1 %v5336_v62 }
  0xbe   :  { %1116 = vmatprep.subr.bf16.mxu0 %v5337_v63  ;;  %1157 = vmatprep.subr.bf16.mxu1 %v5340_v0 }
  0xc1   :  { %1117 = vmatpush1.bf16.msra.mxu0 %v5339_v1  ;;  %1158 = vmatpush1.bf16.msra.mxu1 %v5342_v4  ;;  %v251_v1 = vunpack.c.l.bf16 %v140_v43  ;;  %v252_v4 = vunpack.c.h.bf16 %v140_v43  ;;  %v144_v43 = vld [vmem:[#allocation5 + $0x58] sm:$0xff] }
  0xc2   :  { %1118 = vmatprep.subr.bf16.mxu0 %v5343_v5  ;;  %1159 = vmatprep.subr.bf16.mxu1 %v5346_v6  ;;  %v249_v5 = vunpack.c.l.bf16 %v139_v50  ;;  %v250_v6 = vunpack.c.h.bf16 %v139_v50 }
  0xc5   :  { %1119 = vmatpush1.bf16.msra.mxu0 %v5345_v7  ;;  %1160 = vmatpush1.bf16.msra.mxu1 %v5348_v8  ;;  %v6443_v7 = vld [vmem:[#allocation5 + $0x48] sm:$0xff] }
  0xc6   :  { %1120 = vmatprep.subr.bf16.mxu0 %v5349_v10  ;;  %1161 = vmatprep.subr.bf16.mxu1 %v5352_v11  ;;  %v255_v27 = vunpack.c.l.bf16 %v6443_v7  ;;  %v256_v28 = vunpack.c.h.bf16 %v6443_v7 }
  0xc9   :  { %1121 = vmatpush1.bf16.msra.mxu0 %v5351_v12  ;;  %1162 = vmatpush1.bf16.msra.mxu1 %v5354_v13 }
  0xca   :  { %1122 = vmatprep.subr.bf16.mxu0 %v5355_v14  ;;  %1163 = vmatprep.subr.bf16.mxu1 %v5358_v15 }
  0xcd   :  { %1123 = vmatpush1.bf16.msra.mxu0 %v5357_v17  ;;  %1164 = vmatpush1.bf16.msra.mxu1 %v5360_v18 }
  0xce   :  { %1124 = vmatprep.subr.bf16.mxu0 %v5361_v19  ;;  %1165 = vmatprep.subr.bf16.mxu1 %v5364_v20 }
  0xd1   :  { %1125 = vmatpush1.bf16.msra.mxu0 %v5363_v21  ;;  %1166 = vmatpush1.bf16.msra.mxu1 %v5366_v22 }
  0xd2   :  { %1176 = vmatprep.subr.bf16.mxu0 %v5369_v23  ;;  %2983 = vmatprep.subr.bf16.mxu1 %v5417_v29  ;;  %v6447_v29 = vld [vmem:[#allocation5 + $0x40] sm:$0xff] }
 0x10c   :  { %v166_v33 = vpop.permute.xlu1 %165  ;;  %v155_v36 = vpop.permute.xlu0 %154 }
 0x10d   :  { %v273_v44 = vmul.f32 %v241_v30, %v166_v33  ;;  %v274_v45 = vmul.f32 %v242_v32, %v166_v33  ;;  %v269_v46 = vmul.f32 %v237_v34, %v155_v36  ;;  %v270_v47 = vmul.f32 %v238_v35, %v155_v36 }
 0x110   :  { %v170_v48 = vpop.permute.xlu1 %169  ;;  %v159_v49 = vpop.permute.xlu0 %158 }
 0x111   :  { %v275_v51 = vmul.f32 %v243_v37, %v170_v48  ;;  %v276_v52 = vmul.f32 %v244_v38, %v170_v48  ;;  %v271_v53 = vmul.f32 %v239_v39, %v159_v49  ;;  %v272_v54 = vmul.f32 %v240_v40, %v159_v49  ;;  %v143_v49 = vld [vmem:[#allocation5 + $0x50] sm:$0xff] }
 0x113   :  { %v315_v59 = vadd.f32 %v275_v51, %v273_v44  ;;  %v322_v60 = vadd.f32 %v276_v52, %v274_v45  ;;  %v301_v61 = vadd.f32 %v271_v53, %v269_v46  ;;  %v308_v62 = vadd.f32 %v272_v54, %v270_v47 }
 0x114   :  { %v181_v63 = vpop.permute.xlu1 %180  ;;  %v177_v0 = vpop.permute.xlu0 %176  ;;  %v253_v52 = vunpack.c.l.bf16 %v6447_v29  ;;  %v254_v53 = vunpack.c.h.bf16 %v6447_v29 }
 0x115   :  { %v316_v8 = vrot.slane %v315_v59, 4  ;;  %v323_v10 = vrot.slane %v322_v60, 4  ;;  %v302_v11 = vrot.slane %v301_v61, 4  ;;  %v309_v12 = vrot.slane %v308_v62, 4 }
 0x116   :  { %v279_v13 = vmul.f32 %v247_v55, %v181_v63  ;;  %v280_v14 = vmul.f32 %v248_v56, %v181_v63  ;;  %v277_v15 = vmul.f32 %v245_v57, %v177_v0  ;;  %v278_v17 = vmul.f32 %v246_v58, %v177_v0  ;;  %v6451_v55 = vld [vmem:[#allocation5 + $0x68] sm:$0xff]  ;;  %v6453_v0 = vld [vmem:[#allocation5 + $0x60] sm:$0xff] }
 0x117   :  { %v317_v18 = vadd.f32 %v316_v8, %v315_v59  ;;  %v324_v19 = vadd.f32 %v323_v10, %v322_v60  ;;  %v303_v20 = vadd.f32 %v302_v11, %v301_v61  ;;  %v310_v21 = vadd.f32 %v309_v12, %v308_v62  ;;  %v6457_v8 = vld [vmem:[#allocation5 + $0x70] sm:$0xff] }
 0x118   :  { %v329_v22 = vadd.f32 %v279_v13, %v277_v15  ;;  %v336_v23 = vadd.f32 %v280_v14, %v278_v17  ;;  %v192_v25 = vpop.permute.xlu1 %191  ;;  %v188_v26 = vpop.permute.xlu0 %187  ;;  %v259_v62 = vunpack.c.l.bf16 %v144_v43  ;;  %v260_v63 = vunpack.c.h.bf16 %v144_v43 }
 0x119   :  { %v318_v30 = vrot.slane %v317_v18, 2  ;;  %v325_v32 = vrot.slane %v324_v19, 2  ;;  %v304_v33 = vrot.slane %v303_v20, 2  ;;  %v311_v34 = vrot.slane %v310_v21, 2 }
 0x11a   :  { %v330_v35 = vrot.slane %v329_v22, 4  ;;  %v337_v36 = vrot.slane %v336_v23, 4  ;;  %v283_v37 = vmul.f32 %v251_v1, %v192_v25  ;;  %v284_v38 = vmul.f32 %v252_v4, %v192_v25  ;;  %v6455_v1 = vld [vmem:[#allocation5 + $0x78] sm:$0xff] }
 0x11b   :  { %v319_v39 = vadd.f32 %v318_v30, %v317_v18  ;;  %v326_v40 = vadd.f32 %v325_v32, %v324_v19  ;;  %v305_v41 = vadd.f32 %v304_v33, %v303_v20  ;;  %v312_v42 = vadd.f32 %v311_v34, %v310_v21 }
 0x11c   :  { %v331_v44 = vadd.f32 %v330_v35, %v329_v22  ;;  %v338_v45 = vadd.f32 %v337_v36, %v336_v23  ;;  %v281_v46 = vmul.f32 %v249_v5, %v188_v26  ;;  %v282_v47 = vmul.f32 %v250_v6, %v188_v26  ;;  %v203_v48 = vpop.permute.xlu1 %202  ;;  %v199_v54 = vpop.permute.xlu0 %198 }
 0x11d   :  { %v320_v50 = vrot.slane %v319_v39, 1  ;;  %v327_v51 = vrot.slane %v326_v40, 1  ;;  %v306_v56 = vrot.slane %v305_v41, 1  ;;  %v313_v57 = vrot.slane %v312_v42, 1 }
 0x11e   :  { %v343_v58 = vadd.f32 %v283_v37, %v281_v46  ;;  %v350_v59 = vadd.f32 %v284_v38, %v282_v47  ;;  %v332_v60 = vrot.slane %v331_v44, 2  ;;  %v339_v61 = vrot.slane %v338_v45, 2 }
 0x11f   :  { %v321_v4 = vadd.f32 %v320_v50, %v319_v39  ;;  %v328_v5 = vadd.f32 %v327_v51, %v326_v40  ;;  %v257_v11 = vunpack.c.l.bf16 %v143_v49  ;;  %v258_v12 = vunpack.c.h.bf16 %v143_v49 }
 0x120   :  { %v344_v6 = vrot.slane %v343_v58, 4  ;;  %v351_v7 = vrot.slane %v350_v59, 4  ;;  %v214_v10 = vpop.permute.xlu1 %213  ;;  %v263_v13 = vunpack.c.l.bf16 %v6451_v55  ;;  %v264_v14 = vunpack.c.h.bf16 %v6451_v55  ;;  %v210_v20 = vpop.permute.xlu0 %209 }
 0x121   :  { %v307_v15 = vadd.f32 %v306_v56, %v305_v41  ;;  %v314_v17 = vadd.f32 %v313_v57, %v312_v42  ;;  %v261_v21 = vunpack.c.l.bf16 %v6453_v0  ;;  %v262_v22 = vunpack.c.h.bf16 %v6453_v0 }
 0x122   :  { %v345_v18 = vadd.f32 %v344_v6, %v343_v58  ;;  %v352_v19 = vadd.f32 %v351_v7, %v350_v59  ;;  %v267_v23 = vunpack.c.l.bf16 %v6455_v1  ;;  %v268_v25 = vunpack.c.h.bf16 %v6455_v1 }
 0x123   :  { %v415_v26 = vpack.c.bf16 %v321_v4, %v321_v4  ;;  %v416_v29 = vpack.c.bf16 %v328_v5, %v328_v5  ;;  %v333_v30 = vadd.f32 %v332_v60, %v331_v44  ;;  %v340_v32 = vadd.f32 %v339_v61, %v338_v45 }
 0x124   :  { %v287_v33 = vmul.f32 %v255_v27, %v203_v48  ;;  %v288_v34 = vmul.f32 %v256_v28, %v203_v48  ;;  %v265_v35 = vunpack.c.l.bf16 %v6457_v8  ;;  %v266_v36 = vunpack.c.h.bf16 %v6457_v8  ;;  %v225_v47 = vpop.permute.xlu1 %224  ;;  %v221_v55 = vpop.permute.xlu0 %220 }
 0x125   :  { %v413_v37 = vpack.c.bf16 %v307_v15, %v307_v15  ;;  %v414_v38 = vpack.c.bf16 %v314_v17, %v314_v17  ;;  %v346_v39 = vrot.slane %v345_v18, 2  ;;  %v353_v40 = vrot.slane %v352_v19, 2 }
 0x126   :  { %v285_v41 = vmul.f32 %v253_v52, %v199_v54  ;;  %v286_v42 = vmul.f32 %v254_v53, %v199_v54  ;;  %v291_v43 = vmul.f32 %v259_v62, %v214_v10  ;;  %v292_v46 = vmul.f32 %v260_v63, %v214_v10 }
 0x127   :  { %v6467_v49 = vunpack.c.l.b16 %v415_v26  ;;  %v6469_v50 = vunpack.c.l.b16 %v416_v29  ;;  %v334_v44 = vrot.slane %v333_v30, 1  ;;  %v341_v27 = vrot.slane %v340_v32, 1 }
 0x128   :  { %v357_v28 = vadd.f32 %v287_v33, %v285_v41  ;;  %v364_v45 = vadd.f32 %v288_v34, %v286_v42  ;;  %v289_v48 = vmul.f32 %v257_v11, %v210_v20  ;;  %v290_v51 = vmul.f32 %v258_v12, %v210_v20  ;;  %v236_v7 = vpop.permute.xlu1 %235  ;;  %v232_v20 = vpop.permute.xlu0 %231 }
 0x129   :  { %v6471_v56 = vunpack.c.l.b16 %v413_v37  ;;  %v6473_v57 = vunpack.c.l.b16 %v414_v38  ;;  %v347_v52 = vadd.f32 %v346_v39, %v345_v18  ;;  %v354_v53 = vadd.f32 %v353_v40, %v352_v19 }
 0x12a   :  { %v358_v54 = vrot.slane %v357_v28, 4  ;;  %v365_v58 = vrot.slane %v364_v45, 4  ;;  %v371_v59 = vadd.f32 %v291_v43, %v289_v48  ;;  %v378_v60 = vadd.f32 %v292_v46, %v290_v51 }
 0x12b   :  { %v6475_v61 = vadd.f32 %v334_v44, %v333_v30  ;;  %v6477_v62 = vadd.f32 %v341_v27, %v340_v32  ;;  %v295_v63 = vmul.f32 %v263_v13, %v225_v47  ;;  %v296_v0 = vmul.f32 %v264_v14, %v225_v47 }
 0x12c   :  { %v359_v1 = vadd.f32 %v358_v54, %v357_v28  ;;  %v366_v4 = vadd.f32 %v365_v58, %v364_v45  ;;  %v372_v5 = vrot.slane %v371_v59, 4  ;;  %v379_v6 = vrot.slane %v378_v60, 4 }
 0x12d   :  { %v348_v8 = vrot.slane %v347_v52, 1  ;;  %v355_v10 = vrot.slane %v354_v53, 1  ;;  %v293_v11 = vmul.f32 %v261_v21, %v221_v55  ;;  %v294_v12 = vmul.f32 %v262_v22, %v221_v55 }
 0x12e   :  { %v360_v15 = vrot.slane %v359_v1, 2  ;;  %v367_v17 = vrot.slane %v366_v4, 2  ;;  %v373_v18 = vadd.f32 %v372_v5, %v371_v59  ;;  %v380_v19 = vadd.f32 %v379_v6, %v378_v60 }
 0x12f   :  { %v385_v26 = vadd.f32 %v295_v63, %v293_v11  ;;  %v392_v29 = vadd.f32 %v296_v0, %v294_v12  ;;  %v299_v30 = vmul.f32 %v267_v23, %v236_v7  ;;  %v300_v32 = vmul.f32 %v268_v25, %v236_v7 }
 0x130   :  { %v361_v13 = vadd.f32 %v360_v15, %v359_v1  ;;  %v368_v14 = vadd.f32 %v367_v17, %v366_v4  ;;  %v374_v33 = vrot.slane %v373_v18, 2  ;;  %v381_v34 = vrot.slane %v380_v19, 2 }
 0x131   :  { %v386_v37 = vrot.slane %v385_v26, 4  ;;  %v393_v38 = vrot.slane %v392_v29, 4  ;;  %v297_v39 = vmul.f32 %v265_v35, %v232_v20  ;;  %v298_v40 = vmul.f32 %v266_v36, %v232_v20 }
 0x132   :  { %v362_v41 = vrot.slane %v361_v13, 1  ;;  %v369_v21 = vrot.slane %v368_v14, 1  ;;  %v375_v22 = vadd.f32 %v374_v33, %v373_v18  ;;  %v382_v42 = vadd.f32 %v381_v34, %v380_v19 }
 0x133   :  { %v387_v43 = vadd.f32 %v386_v37, %v385_v26  ;;  %v394_v46 = vadd.f32 %v393_v38, %v392_v29  ;;  %v399_v47 = vadd.f32 %v299_v30, %v297_v39  ;;  %v406_v44 = vadd.f32 %v300_v32, %v298_v40 }
 0x134   :  { %v349_v27 = vadd.f32 %v348_v8, %v347_v52  ;;  %v356_v23 = vadd.f32 %v355_v10, %v354_v53  ;;  %v376_v25 = vrot.slane %v375_v22, 1  ;;  %v383_v28 = vrot.slane %v382_v42, 1 }
 0x135   :  { %v388_v45 = vrot.slane %v387_v43, 2  ;;  %v395_v48 = vrot.slane %v394_v46, 2  ;;  %v400_v51 = vrot.slane %v399_v47, 4  ;;  %v407_v55 = vrot.slane %v406_v44, 4 }
 0x136   :  { %v363_v35 = vadd.f32 %v362_v41, %v361_v13  ;;  %v370_v36 = vadd.f32 %v369_v21, %v368_v14  ;;  %v377_v54 = vadd.f32 %v376_v25, %v375_v22  ;;  %v384_v58 = vadd.f32 %v383_v28, %v382_v42 }
 0x137   :  { %v389_v59 = vadd.f32 %v388_v45, %v387_v43  ;;  %v396_v60 = vadd.f32 %v395_v48, %v394_v46  ;;  %v401_v63 = vadd.f32 %v400_v51, %v399_v47  ;;  %v408_v0 = vadd.f32 %v407_v55, %v406_v44  ;;  %v5367_v48 = vld [vmem:[#allocation7 + $0x10] ss:$24 sps:$4 sm:$0xff]  }
 0x138   :  { %v417_v52 = vpack.c.bf16 %v6475_v61, %v6475_v61  ;;  %v418_v53 = vpack.c.bf16 %v6477_v62, %v6477_v62  ;;  %v419_v1 = vpack.c.bf16 %v349_v27, %v349_v27  ;;  %v420_v4 = vpack.c.bf16 %v356_v23, %v356_v23 }
 0x139   :  { %v390_v5 = vrot.slane %v389_v59, 1  ;;  %v397_v6 = vrot.slane %v396_v60, 1  ;;  %v402_v7 = vrot.slane %v401_v63, 2  ;;  %v409_v8 = vrot.slane %v408_v0, 2 }
 0x13a   :  { %v421_v10 = vpack.c.bf16 %v363_v35, %v363_v35  ;;  %v422_v11 = vpack.c.bf16 %v370_v36, %v370_v36  ;;  %v423_v12 = vpack.c.bf16 %v377_v54, %v377_v54  ;;  %v424_v15 = vpack.c.bf16 %v384_v58, %v384_v58  ;;  %v5372_v36 = vld [vmem:[#allocation7 + $0x44] ss:$24 sps:$4 sm:$0xff]  }
 0x13b   :  { %v391_v17 = vadd.f32 %v390_v5, %v389_v59  ;;  %v398_v18 = vadd.f32 %v397_v6, %v396_v60  ;;  %v403_v19 = vadd.f32 %v402_v7, %v401_v63  ;;  %v410_v20 = vadd.f32 %v409_v8, %v408_v0  ;;  %v5415_v54 = vld [vmem:[#allocation10] ss:$24 sps:$4 sm:$0xff]   ;;  %v5423_v60 = vld [vmem:[#allocation10 + $0x34] ss:$24 sps:$4 sm:$0xff]  }
 0x13c   :  { %v577_v61 = vunpack.c.l.b16 %v417_v52  ;;  %v578_v26 = vunpack.c.l.b16 %v418_v53  ;;  %v579_v29 = vunpack.c.l.b16 %v419_v1  ;;  %v580_v62 = vunpack.c.l.b16 %v420_v4  ;;  %v5370_v63 = vld [vmem:[#allocation7 + $0x40] ss:$24 sps:$4 sm:$0xff]   ;;  %v5375_v0 = vld [vmem:[#allocation7 + $0x74] ss:$24 sps:$4 sm:$0xff]   ;;  %v5373_v1 = vld [vmem:[#allocation7 + $0x70] ss:$24 sps:$4 sm:$0xff]  }
 0x13d   :  { %v425_v30 = vpack.c.bf16 %v391_v17, %v391_v17  ;;  %v426_v32 = vpack.c.bf16 %v398_v18, %v398_v18  ;;  %v404_v13 = vrot.slane %v403_v19, 1  ;;  %v411_v14 = vrot.slane %v410_v20, 1  ;;  %v5421_v52 = vld [vmem:[#allocation10 + $0x30] ss:$24 sps:$4 sm:$0xff]   ;;  %v5429_v53 = vld [vmem:[#allocation10 + $0x64] ss:$24 sps:$4 sm:$0xff]  }
 0x13e   :  { %v590_v33 = vsel %vm589_vm0, %v6467_v49, %v6471_v56  ;;  %v603_v34 = vsel %vm589_vm0, %v6469_v50, %v6473_v57  ;;  %v581_v37 = vunpack.c.l.b16 %v421_v10  ;;  %v582_v38 = vunpack.c.l.b16 %v422_v11  ;;  %v5378_v4 = vld [vmem:[#allocation7 + $0xa4] ss:$24 sps:$4 sm:$0xff]   ;;  %v5376_v7 = vld [vmem:[#allocation7 + $0xa0] ss:$24 sps:$4 sm:$0xff]   ;;  %v5381_v8 = vld [vmem:[#allocation7 + $0xd4] ss:$24 sps:$4 sm:$0xff]  }
 0x13f   :  { %v583_v39 = vunpack.c.l.b16 %v423_v12  ;;  %v584_v40 = vunpack.c.l.b16 %v424_v15  ;;  %v405_v41 = vadd.f32 %v404_v13, %v403_v19  ;;  %v412_v21 = vadd.f32 %v411_v14, %v410_v20  ;;  %v5427_v5 = vld [vmem:[#allocation10 + $0x60] ss:$24 sps:$4 sm:$0xff]   ;;  %v5435_v6 = vld [vmem:[#allocation10 + $0x94] ss:$24 sps:$4 sm:$0xff]   ;;  %v5433_v10 = vld [vmem:[#allocation10 + $0x90] ss:$24 sps:$4 sm:$0xff]  }
 0x140   :  { %v592_v22 = vsel %vm591_vm1, %v577_v61, %v590_v33  ;;  %v604_v42 = vsel %vm591_vm1, %v578_v26, %v603_v34  ;;  %v585_v43 = vunpack.c.l.b16 %v425_v30  ;;  %v586_v46 = vunpack.c.l.b16 %v426_v32  ;;  %v5441_v11 = vld [vmem:[#allocation10 + $0xc4] ss:$24 sps:$4 sm:$0xff]   ;;  %v5439_v17 = vld [vmem:[#allocation10 + $0xc0] ss:$24 sps:$4 sm:$0xff]   ;;  %v5447_v18 = vld [vmem:[#allocation10 + $0xf4] ss:$24 sps:$4 sm:$0xff]  }
 0x141   :  { %v427_v47 = vpack.c.bf16 %v405_v41, %v405_v41  ;;  %v428_v44 = vpack.c.bf16 %v412_v21, %v412_v21  ;;  %v605_v49 = vsel %vm593_vm2, %v580_v62, %v604_v42  ;;  %v594_v56 = vsel %vm593_vm2, %v579_v29, %v592_v22  ;;  %v5379_v12 = vld [vmem:[#allocation7 + $0xd0] ss:$24 sps:$4 sm:$0xff]   ;;  %v5384_v15 = vld [vmem:[#allocation7 + $0x104] ss:$24 sps:$4 sm:$0xff]   ;;  %v5382_v19 = vld [vmem:[#allocation7 + $0x100] ss:$24 sps:$4 sm:$0xff]  }
 0x142   :  { %v606_v50 = vsel %vm595_vm3, %v582_v38, %v605_v49  ;;  %v596_v57 = vsel %vm595_vm3, %v581_v37, %v594_v56  ;;  %v5387_v20 = vld [vmem:[#allocation7 + $0x134] ss:$24 sps:$4 sm:$0xff]   ;;  %v5385_v29 = vld [vmem:[#allocation7 + $0x130] ss:$24 sps:$4 sm:$0xff]   ;;  %v5390_v62 = vld [vmem:[#allocation7 + $0x164] ss:$24 sps:$4 sm:$0xff]  }
 0x143   :  { %v588_v27 = vunpack.c.l.b16 %v428_v44  ;;  %v607_v23 = vsel %vm597_vm4, %v584_v40, %v606_v50  ;;  %v587_v25 = vunpack.c.l.b16 %v427_v47  ;;  %v598_v28 = vsel %vm597_vm4, %v583_v39, %v596_v57  ;;  %v5445_v61 = vld [vmem:[#allocation10 + $0xf0] ss:$24 sps:$4 sm:$0xff]   ;;  %v5453_v26 = vld [vmem:[#allocation10 + $0x124] ss:$24 sps:$4 sm:$0xff]   ;;  %v5451_v30 = vld [vmem:[#allocation10 + $0x120] ss:$24 sps:$4 sm:$0xff]  }
 0x144   :  { %v608_v45 = vsel %vm599_vm5, %v586_v46, %v607_v23  ;;  %v600_v51 = vsel %vm599_vm5, %v585_v43, %v598_v28  ;;  %v5459_v32 = vld [vmem:[#allocation10 + $0x154] ss:$24 sps:$4 sm:$0xff]   ;;  %v5457_v33 = vld [vmem:[#allocation10 + $0x150] ss:$24 sps:$4 sm:$0xff]   ;;  %v5465_v34 = vld [vmem:[#allocation10 + $0x184] ss:$24 sps:$4 sm:$0xff]  }
 0x145   :  { %v609_v55 = vsel %vm601_vm6, %v588_v27, %v608_v45  ;;  %v602_v35 = vsel %vm601_vm6, %v587_v25, %v600_v51  ;;  %v5388_v13 = vld [vmem:[#allocation7 + $0x160] ss:$24 sps:$4 sm:$0xff]   ;;  %v5393_v14 = vld [vmem:[#allocation7 + $0x194] ss:$24 sps:$4 sm:$0xff]   ;;  %v5391_v37 = vld [vmem:[#allocation7 + $0x190] ss:$24 sps:$4 sm:$0xff]  }
 0x146   :  { %v611_v58 = vpack.c.b16 %v609_v55, %v609_v55  ;;  %v6499_v59 = vpack.c.b16 %v602_v35, %v602_v35  ;;  %v5396_v38 = vld [vmem:[#allocation7 + $0x1c4] ss:$24 sps:$4 sm:$0xff]   ;;  %v5394_v41 = vld [vmem:[#allocation7 + $0x1c0] ss:$24 sps:$4 sm:$0xff]   ;;  %v5399_v21 = vld [vmem:[#allocation7 + $0x1f4] ss:$24 sps:$4 sm:$0xff]  }
 0x147   :  { %v5463_v39 = vld [vmem:[#allocation10 + $0x180] ss:$24 sps:$4 sm:$0xff]   ;;  %v5471_v40 = vld [vmem:[#allocation10 + $0x1b4] ss:$24 sps:$4 sm:$0xff]   ;;  %v5469_v22 = vld [vmem:[#allocation10 + $0x1b0] ss:$24 sps:$4 sm:$0xff]  }
 0x148   :  { %1126 = vmatprep.mubr.bf16.mxu0 %v611_v58  ;;  %1167 = vmatprep.mubr.bf16.mxu1 %v611_v58  ;;  %v5477_v42 = vld [vmem:[#allocation10 + $0x1e4] ss:$24 sps:$4 sm:$0xff]   ;;  %v5475_v47 = vld [vmem:[#allocation10 + $0x1e0] ss:$24 sps:$4 sm:$0xff]   ;;  %v5483_v44 = vld [vmem:[#allocation10 + $0x214] ss:$24 sps:$4 sm:$0xff]  }
 0x149   :  { %1127 = vmatmul.mubr.bf16.vlgmr.msra.gmra.mrb[0].mxu0 %v6499_v59  ;;  %1168 = vmatmul.mubr.bf16.vlgmr.msra.gmra.mrb[0].mxu1 %v6499_v59  ;;  %v5397_v43 = vld [vmem:[#allocation7 + $0x1f0] ss:$24 sps:$4 sm:$0xff]   ;;  %v5402_v46 = vld [vmem:[#allocation7 + $0x224] ss:$24 sps:$4 sm:$0xff]   ;;  %v5400_v49 = vld [vmem:[#allocation7 + $0x220] ss:$24 sps:$4 sm:$0xff]  }
 0x14a   :  { %1177 = vmatpush1.bf16.msra.mxu0 %v5367_v48  ;;  %1208 = vmatprep.mubr.bf16.mxu0 %v611_v58  ;;  %v5405_v56 = vld [vmem:[#allocation7 + $0x254] ss:$24 sps:$4 sm:$0xff]   ;;  %v5403_v27 = vld [vmem:[#allocation7 + $0x250] ss:$24 sps:$4 sm:$0xff]   ;;  %v5408_v23 = vld [vmem:[#allocation7 + $0x284] ss:$24 sps:$4 sm:$0xff]  }
 0x14b   :  { %1178 = vmatprep.subr.bf16.mxu0 %v5372_v36  ;;  %2984 = vmatpush1.bf16.msra.mxu1 %v5415_v54  ;;  %v5481_v50 = vld [vmem:[#allocation10 + $0x210] ss:$24 sps:$4 sm:$0xff]   ;;  %v5489_v57 = vld [vmem:[#allocation10 + $0x244] ss:$24 sps:$4 sm:$0xff]   ;;  %v5487_v25 = vld [vmem:[#allocation10 + $0x240] ss:$24 sps:$4 sm:$0xff]  }
 0x14c   :  { %2985 = vmatprep.subr.bf16.mxu1 %v5423_v60  ;;  %v5495_v28 = vld [vmem:[#allocation10 + $0x274] ss:$24 sps:$4 sm:$0xff]   ;;  %v5493_v51 = vld [vmem:[#allocation10 + $0x270] ss:$24 sps:$4 sm:$0xff]   ;;  %v5501_v55 = vld [vmem:[#allocation10 + $0x2a4] ss:$24 sps:$4 sm:$0xff]  }
 0x14d   :  { %v5406_v45 = vld [vmem:[#allocation7 + $0x280] ss:$24 sps:$4 sm:$0xff]   ;;  %v5411_v48 = vld [vmem:[#allocation7 + $0x2b4] ss:$24 sps:$4 sm:$0xff]   ;;  %v5409_v35 = vld [vmem:[#allocation7 + $0x2b0] ss:$24 sps:$4 sm:$0xff]  }
 0x14e   :  { %1179 = vmatpush1.bf16.msra.mxu0 %v5370_v63  ;;  %v5414_v36 = vld [vmem:[#allocation7 + $0x2e4] ss:$24 sps:$4 sm:$0xff]   ;;  %v5412_v58 = vld [vmem:[#allocation7 + $0x2e0] ss:$24 sps:$4 sm:$0xff]   ;;  %v5420_v60 = vld [vmem:[#allocation10 + $0xc] ss:$24 sps:$4 sm:$0xff]  }
 0x14f   :  { %1180 = vmatprep.subr.bf16.mxu0 %v5375_v0  ;;  %2986 = vmatpush1.bf16.msra.mxu1 %v5421_v52  ;;  %v5499_v54 = vld [vmem:[#allocation10 + $0x2a0] ss:$24 sps:$4 sm:$0xff]   ;;  %v5426_v0 = vld [vmem:[#allocation10 + $0x3c] ss:$24 sps:$4 sm:$0xff]  }
 0x150   :  { %2987 = vmatprep.subr.bf16.mxu1 %v5429_v53  ;;  %v5418_v63 = vld [vmem:[#allocation10 + $0x8] ss:$24 sps:$4 sm:$0xff]   ;;  %v5424_v52 = vld [vmem:[#allocation10 + $0x38] ss:$24 sps:$4 sm:$0xff]   ;;  %v5432_v53 = vld [vmem:[#allocation10 + $0x6c] ss:$24 sps:$4 sm:$0xff]  }
 0x152   :  { %1181 = vmatpush1.bf16.msra.mxu0 %v5373_v1  ;;  %v5430_v1 = vld [vmem:[#allocation10 + $0x68] ss:$24 sps:$4 sm:$0xff]  }
 0x153   :  { %1182 = vmatprep.subr.bf16.mxu0 %v5378_v4  ;;  %2988 = vmatpush1.bf16.msra.mxu1 %v5427_v5  ;;  %v5438_v4 = vld [vmem:[#allocation10 + $0x9c] ss:$24 sps:$4 sm:$0xff]   ;;  %v5436_v5 = vld [vmem:[#allocation10 + $0x98] ss:$24 sps:$4 sm:$0xff]  }
 0x154   :  { %2989 = vmatprep.subr.bf16.mxu1 %v5435_v6  ;;  %v5444_v6 = vld [vmem:[#allocation10 + $0xcc] ss:$24 sps:$4 sm:$0xff]  }
 0x156   :  { %1183 = vmatpush1.bf16.msra.mxu0 %v5376_v7  ;;  %v5442_v7 = vld [vmem:[#allocation10 + $0xc8] ss:$24 sps:$4 sm:$0xff]  }
 0x157   :  { %1184 = vmatprep.subr.bf16.mxu0 %v5381_v8  ;;  %2990 = vmatpush1.bf16.msra.mxu1 %v5433_v10  ;;  %v5450_v8 = vld [vmem:[#allocation10 + $0xfc] ss:$24 sps:$4 sm:$0xff]   ;;  %v5448_v10 = vld [vmem:[#allocation10 + $0xf8] ss:$24 sps:$4 sm:$0xff]  }
 0x158   :  { %2991 = vmatprep.subr.bf16.mxu1 %v5441_v11  ;;  %v5456_v11 = vld [vmem:[#allocation10 + $0x12c] ss:$24 sps:$4 sm:$0xff]  }
 0x15a   :  { %1185 = vmatpush1.bf16.msra.mxu0 %v5379_v12  ;;  %v5462_v12 = vld [vmem:[#allocation10 + $0x15c] ss:$24 sps:$4 sm:$0xff]  }
 0x15b   :  { %1186 = vmatprep.subr.bf16.mxu0 %v5384_v15  ;;  %2992 = vmatpush1.bf16.msra.mxu1 %v5439_v17  ;;  %v5505_v15 = vld [vmem:[#allocation10 + $0x2d0] ss:$24 sps:$4 sm:$0xff]   ;;  %v5507_v17 = vld [vmem:[#allocation10 + $0x2d4] ss:$24 sps:$4 sm:$0xff]  }
 0x15c   :  { %2993 = vmatprep.subr.bf16.mxu1 %v5447_v18  ;;  %v5460_v18 = vld [vmem:[#allocation10 + $0x158] ss:$24 sps:$4 sm:$0xff]  }
 0x15e   :  { %1187 = vmatpush1.bf16.msra.mxu0 %v5382_v19  ;;  %v5513_v19 = vld [vmem:[#allocation10 + $0x304] ss:$24 sps:$4 sm:$0xff]  }
 0x15f   :  { %1188 = vmatprep.subr.bf16.mxu0 %v5387_v20  ;;  %2994 = vmatpush1.bf16.msra.mxu1 %v5445_v61  ;;  %v5468_v20 = vld [vmem:[#allocation10 + $0x18c] ss:$24 sps:$4 sm:$0xff]   ;;  %v5466_v61 = vld [vmem:[#allocation10 + $0x188] ss:$24 sps:$4 sm:$0xff]  }
 0x160   :  { %2995 = vmatprep.subr.bf16.mxu1 %v5453_v26  ;;  %v5474_v26 = vld [vmem:[#allocation10 + $0x1bc] ss:$24 sps:$4 sm:$0xff]  }
 0x162   :  { %1189 = vmatpush1.bf16.msra.mxu0 %v5385_v29  ;;  %v5472_v29 = vld [vmem:[#allocation10 + $0x1b8] ss:$24 sps:$4 sm:$0xff]  }
 0x163   :  { %1190 = vmatprep.subr.bf16.mxu0 %v5390_v62  ;;  %2996 = vmatpush1.bf16.msra.mxu1 %v5451_v30  ;;  %v5480_v62 = vld [vmem:[#allocation10 + $0x1ec] ss:$24 sps:$4 sm:$0xff]   ;;  %v5478_v30 = vld [vmem:[#allocation10 + $0x1e8] ss:$24 sps:$4 sm:$0xff]  }
 0x164   :  { %2997 = vmatprep.subr.bf16.mxu1 %v5459_v32  ;;  %v5486_v32 = vld [vmem:[#allocation10 + $0x21c] ss:$24 sps:$4 sm:$0xff]  }
 0x166   :  { %1191 = vmatpush1.bf16.msra.mxu0 %v5388_v13  ;;  %v5484_v13 = vld [vmem:[#allocation10 + $0x218] ss:$24 sps:$4 sm:$0xff]  }
 0x167   :  { %1192 = vmatprep.subr.bf16.mxu0 %v5393_v14  ;;  %2998 = vmatpush1.bf16.msra.mxu1 %v5457_v33  ;;  %v5492_v14 = vld [vmem:[#allocation10 + $0x24c] ss:$24 sps:$4 sm:$0xff]   ;;  %v5490_v33 = vld [vmem:[#allocation10 + $0x248] ss:$24 sps:$4 sm:$0xff]  }
 0x168   :  { %2999 = vmatprep.subr.bf16.mxu1 %v5465_v34  ;;  %v5498_v34 = vld [vmem:[#allocation10 + $0x27c] ss:$24 sps:$4 sm:$0xff]  }
 0x16a   :  { %1193 = vmatpush1.bf16.msra.mxu0 %v5391_v37  ;;  %v5496_v37 = vld [vmem:[#allocation10 + $0x278] ss:$24 sps:$4 sm:$0xff]  }
 0x16b   :  { %1194 = vmatprep.subr.bf16.mxu0 %v5396_v38  ;;  %3000 = vmatpush1.bf16.msra.mxu1 %v5463_v39  ;;  %v5504_v38 = vld [vmem:[#allocation10 + $0x2ac] ss:$24 sps:$4 sm:$0xff]   ;;  %v5502_v39 = vld [vmem:[#allocation10 + $0x2a8] ss:$24 sps:$4 sm:$0xff]  }
 0x16c   :  { %3001 = vmatprep.subr.bf16.mxu1 %v5471_v40  ;;  %v5510_v40 = vld [vmem:[#allocation10 + $0x2dc] ss:$24 sps:$4 sm:$0xff]  }
 0x16e   :  { %1195 = vmatpush1.bf16.msra.mxu0 %v5394_v41  ;;  %v5508_v41 = vld [vmem:[#allocation10 + $0x2d8] ss:$24 sps:$4 sm:$0xff]  }
 0x16f   :  { %1196 = vmatprep.subr.bf16.mxu0 %v5399_v21  ;;  %3002 = vmatpush1.bf16.msra.mxu1 %v5469_v22  ;;  %v5516_v21 = vld [vmem:[#allocation10 + $0x30c] ss:$24 sps:$4 sm:$0xff]   ;;  %v6504_v22 = vld [vmem:[#allocation8] sm:$0x3f] }
 0x170   :  { %3003 = vmatprep.subr.bf16.mxu1 %v5477_v42  ;;  %v530_v42 = vrot.slane %v6504_v22, %v6411_v3 }
 0x172   :  { %1197 = vmatpush1.bf16.msra.mxu0 %v5397_v43  ;;  %v534_v43 = vrot.slane %v6504_v22, %v6408_v2 }
 0x173   :  { %1198 = vmatprep.subr.bf16.mxu0 %v5402_v46  ;;  %3004 = vmatpush1.bf16.msra.mxu1 %v5475_v47  ;;  %v542_v46 = vrot.slane %v6504_v22, %v6423_v16 }
 0x174   :  { %3005 = vmatprep.subr.bf16.mxu1 %v5483_v44 }
 0x176   :  { %1199 = vmatpush1.bf16.msra.mxu0 %v5400_v49 }
 0x177   :  { %1200 = vmatprep.subr.bf16.mxu0 %v5405_v56  ;;  %3006 = vmatpush1.bf16.msra.mxu1 %v5481_v50 }
 0x178   :  { %3007 = vmatprep.subr.bf16.mxu1 %v5489_v57 }
 0x17a   :  { %1201 = vmatpush1.bf16.msra.mxu0 %v5403_v27 }
 0x17b   :  { %1202 = vmatprep.subr.bf16.mxu0 %v5408_v23  ;;  %3008 = vmatpush1.bf16.msra.mxu1 %v5487_v25 }
 0x17c   :  { %3009 = vmatprep.subr.bf16.mxu1 %v5495_v28 }
 0x17e   :  { %1203 = vmatpush1.bf16.msra.mxu0 %v5406_v45 }
 0x17f   :  { %1204 = vmatprep.subr.bf16.mxu0 %v5411_v48  ;;  %3010 = vmatpush1.bf16.msra.mxu1 %v5493_v51  ;;  %v5511_v51 = vld [vmem:[#allocation10 + $0x300] ss:$24 sps:$4 sm:$0xff]  }
 0x180   :  { %3011 = vmatprep.subr.bf16.mxu1 %v5501_v55  ;;  %v5514_v55 = vld [vmem:[#allocation10 + $0x308] ss:$24 sps:$4 sm:$0xff]  }
 0x182   :  { %1205 = vmatpush1.bf16.msra.mxu0 %v5409_v35 }
 0x183   :  { %1206 = vmatprep.subr.bf16.mxu0 %v5414_v36  ;;  %3012 = vmatpush1.bf16.msra.mxu1 %v5499_v54  ;;  %v5519_v36 = vld [vmem:[#allocation10 + $0x334] ss:$24 sps:$4 sm:$0xff]  }
 0x184   :  { %3013 = vmatprep.subr.bf16.mxu1 %v5507_v17  ;;  %v5522_v54 = vld [vmem:[#allocation10 + $0x33c] ss:$24 sps:$4 sm:$0xff]   ;;  %v5541_v17 = vld [vmem:[#allocation10 + $0x3f0] ss:$24 sps:$4 sm:$0xff]  }
 0x186   :  { %1207 = vmatpush1.bf16.msra.mxu0 %v5412_v58 }
 0x187   :  { %3106 = vmatprep.subr.bf16.mxu0 %v5420_v60  ;;  %3014 = vmatpush1.bf16.msra.mxu1 %v5505_v15  ;;  %v5517_v60 = vld [vmem:[#allocation10 + $0x330] ss:$24 sps:$4 sm:$0xff]   ;;  %v5546_v15 = vld [vmem:[#allocation10 + $0x3fc] ss:$24 sps:$4 sm:$0xff]  }
 0x188   :  { %3024 = vmatprep.subr.bf16.mxu1 %v5513_v19  ;;  %v5549_v19 = vld [vmem:[#allocation10 + $0x424] ss:$24 sps:$4 sm:$0xff]  }
 0x189   :  { %1209 = vmatmul.mubr.bf16.vlgmr.msra.gmra.mrb[4].mxu0 %v6499_v59  ;;  %v5454_v59 = vld [vmem:[#allocation10 + $0x128] ss:$24 sps:$4 sm:$0xff]  }
 0x18a   :  { %3107 = vmatpush1.bf16.msra.mxu0 %v5418_v63  ;;  %v5520_v63 = vld [vmem:[#allocation10 + $0x338] ss:$24 sps:$4 sm:$0xff]  }
 0x18b   :  { %3108 = vmatprep.subr.bf16.mxu0 %v5426_v0  ;;  %v5525_v0 = vld [vmem:[#allocation10 + $0x364] ss:$24 sps:$4 sm:$0xff]  }
 0x18e   :  { %3109 = vmatpush1.bf16.msra.mxu0 %v5424_v52  ;;  %v5528_v52 = vld [vmem:[#allocation10 + $0x36c] ss:$24 sps:$4 sm:$0xff]  }
 0x18f   :  { %3110 = vmatprep.subr.bf16.mxu0 %v5432_v53  ;;  %v5523_v53 = vld [vmem:[#allocation10 + $0x360] ss:$24 sps:$4 sm:$0xff]  }
 0x192   :  { %3111 = vmatpush1.bf16.msra.mxu0 %v5430_v1  ;;  %v5526_v1 = vld [vmem:[#allocation10 + $0x368] ss:$24 sps:$4 sm:$0xff]  }
 0x193   :  { %3112 = vmatprep.subr.bf16.mxu0 %v5438_v4  ;;  %v5531_v4 = vld [vmem:[#allocation10 + $0x394] ss:$24 sps:$4 sm:$0xff]  }
 0x196   :  { %3113 = vmatpush1.bf16.msra.mxu0 %v5436_v5  ;;  %v5534_v5 = vld [vmem:[#allocation10 + $0x39c] ss:$24 sps:$4 sm:$0xff]  }
 0x197   :  { %3114 = vmatprep.subr.bf16.mxu0 %v5444_v6  ;;  %v5529_v6 = vld [vmem:[#allocation10 + $0x390] ss:$24 sps:$4 sm:$0xff]  }
 0x19a   :  { %3115 = vmatpush1.bf16.msra.mxu0 %v5442_v7  ;;  %v5532_v7 = vld [vmem:[#allocation10 + $0x398] ss:$24 sps:$4 sm:$0xff]  }
 0x19b   :  { %3116 = vmatprep.subr.bf16.mxu0 %v5450_v8  ;;  %v5537_v8 = vld [vmem:[#allocation10 + $0x3c4] ss:$24 sps:$4 sm:$0xff]  }
 0x19e   :  { %3117 = vmatpush1.bf16.msra.mxu0 %v5448_v10  ;;  %v5540_v10 = vld [vmem:[#allocation10 + $0x3cc] ss:$24 sps:$4 sm:$0xff]  }
 0x19f   :  { %3118 = vmatprep.subr.bf16.mxu0 %v5456_v11  ;;  %v5535_v11 = vld [vmem:[#allocation10 + $0x3c0] ss:$24 sps:$4 sm:$0xff]  }
 0x1a2   :  { %3119 = vmatpush1.bf16.msra.mxu0 %v5454_v59  ;;  %v5538_v59 = vld [vmem:[#allocation10 + $0x3c8] ss:$24 sps:$4 sm:$0xff]  }
 0x1a3   :  { %3120 = vmatprep.subr.bf16.mxu0 %v5462_v12  ;;  %v5543_v12 = vld [vmem:[#allocation10 + $0x3f4] ss:$24 sps:$4 sm:$0xff]  }
 0x1a6   :  { %3121 = vmatpush1.bf16.msra.mxu0 %v5460_v18  ;;  %v5544_v18 = vld [vmem:[#allocation10 + $0x3f8] ss:$24 sps:$4 sm:$0xff]  }
 0x1a7   :  { %3122 = vmatprep.subr.bf16.mxu0 %v5468_v20  ;;  %v5552_v20 = vld [vmem:[#allocation10 + $0x42c] ss:$24 sps:$4 sm:$0xff]  }
 0x1aa   :  { %3123 = vmatpush1.bf16.msra.mxu0 %v5466_v61  ;;  %v5547_v61 = vld [vmem:[#allocation10 + $0x420] ss:$24 sps:$4 sm:$0xff]  }
 0x1ab   :  { %3124 = vmatprep.subr.bf16.mxu0 %v5474_v26  ;;  %v5550_v26 = vld [vmem:[#allocation10 + $0x428] ss:$24 sps:$4 sm:$0xff]  }
 0x1ae   :  { %3125 = vmatpush1.bf16.msra.mxu0 %v5472_v29  ;;  %v5555_v29 = vld [vmem:[#allocation10 + $0x454] ss:$24 sps:$4 sm:$0xff]  }
 0x1af   :  { %3126 = vmatprep.subr.bf16.mxu0 %v5480_v62  ;;  %v5558_v62 = vld [vmem:[#allocation10 + $0x45c] ss:$24 sps:$4 sm:$0xff]  }
 0x1b2   :  { %3127 = vmatpush1.bf16.msra.mxu0 %v5478_v30  ;;  %v5553_v30 = vld [vmem:[#allocation10 + $0x450] ss:$24 sps:$4 sm:$0xff]  }
 0x1b3   :  { %3128 = vmatprep.subr.bf16.mxu0 %v5486_v32  ;;  %v5556_v32 = vld [vmem:[#allocation10 + $0x458] ss:$24 sps:$4 sm:$0xff]  }
 0x1b6   :  { %3129 = vmatpush1.bf16.msra.mxu0 %v5484_v13  ;;  %v5561_v13 = vld [vmem:[#allocation10 + $0x484] ss:$24 sps:$4 sm:$0xff]  }
 0x1b7   :  { %3130 = vmatprep.subr.bf16.mxu0 %v5492_v14  ;;  %v5564_v14 = vld [vmem:[#allocation10 + $0x48c] ss:$24 sps:$4 sm:$0xff]  }
 0x1ba   :  { %3131 = vmatpush1.bf16.msra.mxu0 %v5490_v33  ;;  %v5559_v33 = vld [vmem:[#allocation10 + $0x480] ss:$24 sps:$4 sm:$0xff]  }
 0x1bb   :  { %3132 = vmatprep.subr.bf16.mxu0 %v5498_v34  ;;  %v5562_v34 = vld [vmem:[#allocation10 + $0x488] ss:$24 sps:$4 sm:$0xff]  }
 0x1be   :  { %3133 = vmatpush1.bf16.msra.mxu0 %v5496_v37  ;;  %v5567_v37 = vld [vmem:[#allocation10 + $0x4b4] ss:$24 sps:$4 sm:$0xff]  }
 0x1bf   :  { %3134 = vmatprep.subr.bf16.mxu0 %v5504_v38  ;;  %v5570_v38 = vld [vmem:[#allocation10 + $0x4bc] ss:$24 sps:$4 sm:$0xff]  }
 0x1c2   :  { %3135 = vmatpush1.bf16.msra.mxu0 %v5502_v39  ;;  %v5565_v39 = vld [vmem:[#allocation10 + $0x4b0] ss:$24 sps:$4 sm:$0xff]  }
 0x1c3   :  { %3136 = vmatprep.subr.bf16.mxu0 %v5510_v40  ;;  %v5568_v40 = vld [vmem:[#allocation10 + $0x4b8] ss:$24 sps:$4 sm:$0xff]  }
 0x1c6   :  { %3137 = vmatpush1.bf16.msra.mxu0 %v5508_v41  ;;  %v5573_v41 = vld [vmem:[#allocation10 + $0x4e4] ss:$24 sps:$4 sm:$0xff]  }
 0x1c7   :  { %3147 = vmatprep.subr.bf16.mxu0 %v5516_v21  ;;  %v5576_v21 = vld [vmem:[#allocation10 + $0x4ec] ss:$24 sps:$4 sm:$0xff]  }
 0x21c   :  { %v1128_v47 = vpop.f32.mrb[0].mxu0  ;;  %v6512_v44 = vpop.f32.mrb[0].mxu1 }
 0x21d   :  { %v1129_v49 = vadd.f32 %v1128_v47, %v530_v42  ;;  %v1130_v56 = vpop.f32.mrb[1].mxu0  ;;  %v1171_v50 = vpop.f32.mrb[1].mxu1  ;;  %v5571_v42 = vld [vmem:[#allocation10 + $0x4e0] ss:$24 sps:$4 sm:$0xff]   ;;  %v5582_v47 = vld [vmem:[#allocation10 + $0x51c] ss:$24 sps:$4 sm:$0xff]  }
 0x21e   :  { %v1131_v57 = vadd.f32 %v1130_v56, %v534_v43  ;;  %v1132_v27 = vpop.f32.mrb[2].mxu0  ;;  %v1173_v23 = vpop.f32.mrb[2].mxu1  ;;  %v1172_v25 = vadd.f32 %v1171_v50, %v542_v46  ;;  %v5574_v43 = vld [vmem:[#allocation10 + $0x4e8] ss:$24 sps:$4 sm:$0xff]   ;;  %v5579_v46 = vld [vmem:[#allocation10 + $0x514] ss:$24 sps:$4 sm:$0xff]  }
 0x21f   :  { %v1133_v28 = vpop.f32.mrb[3].mxu0  ;;  %v1174_v45 = vpop.f32.mrb[3].mxu1  ;;  %v6516_v35 = vpack.c.bf16 %v1129_v49, %v1129_v49  ;;  %v5577_v49 = vld [vmem:[#allocation10 + $0x510] ss:$24 sps:$4 sm:$0xff]   ;;  %v5585_v50 = vld [vmem:[#allocation10 + $0x544] ss:$24 sps:$4 sm:$0xff]  }
 0x220   :  { %v6514_v48 = vpack.c.bf16 %v1131_v57, %v1131_v57  ;;  %v6520_v58 = vpack.c.bf16 %v1172_v25, %v1172_v25  ;;  %v5580_v56 = vld [vmem:[#allocation10 + $0x518] ss:$24 sps:$4 sm:$0xff]   ;;  %v5588_v57 = vld [vmem:[#allocation10 + $0x54c] ss:$24 sps:$4 sm:$0xff]   ;;  %v5586_v23 = vld [vmem:[#allocation10 + $0x548] ss:$24 sps:$4 sm:$0xff]  }
 0x221   :  { %v5583_v27 = vld [vmem:[#allocation10 + $0x540] ss:$24 sps:$4 sm:$0xff]   ;;  %v5591_v25 = vld [vmem:[#allocation10 + $0x574] ss:$24 sps:$4 sm:$0xff]   ;;  %v5589_v45 = vld [vmem:[#allocation10 + $0x570] ss:$24 sps:$4 sm:$0xff]  }
 0x222   :  { %3015 = vmatprep.mubr.bf16.mxu1 %v6514_v48  ;;  %3138 = vmatprep.mubr.bf16.mxu0 %v6514_v48  ;;  %v5594_v28 = vld [vmem:[#allocation10 + $0x57c] ss:$24 sps:$4 sm:$0xff]  }
 0x223   :  { %3016 = vmatmul.mubr.bf16.vlgmr.msra.gmra.mrb[4].mxu1 %v6516_v35  ;;  %3139 = vmatmul.mubr.bf16.vlgmr.msra.gmra.mrb[8].mxu0 %v6516_v35 }
 0x224   :  { %3025 = vmatpush1.bf16.msra.mxu1 %v5511_v51  ;;  %3148 = vmatpush1.bf16.msra.mxu0 %v5514_v55  ;;  %v5592_v51 = vld [vmem:[#allocation10 + $0x578] ss:$24 sps:$4 sm:$0xff]   ;;  %v5597_v55 = vld [vmem:[#allocation10 + $0x5a4] ss:$24 sps:$4 sm:$0xff]  }
 0x225   :  { %3056 = vmatprep.mubr.bf16.mxu1 %v6520_v58  ;;  %3179 = vmatprep.mubr.bf16.mxu0 %v6520_v58 }
 0x226   :  { %3026 = vmatprep.subr.bf16.mxu1 %v5519_v36  ;;  %3149 = vmatprep.subr.bf16.mxu0 %v5522_v54  ;;  %v5600_v36 = vld [vmem:[#allocation10 + $0x5ac] ss:$24 sps:$4 sm:$0xff]   ;;  %v5595_v54 = vld [vmem:[#allocation10 + $0x5a0] ss:$24 sps:$4 sm:$0xff]  }
 0x228   :  { %3027 = vmatpush1.bf16.msra.mxu1 %v5517_v60  ;;  %3150 = vmatpush1.bf16.msra.mxu0 %v5520_v63  ;;  %v5598_v60 = vld [vmem:[#allocation10 + $0x5a8] ss:$24 sps:$4 sm:$0xff]   ;;  %v538_v63 = vrot.slane %v6504_v22, %v6420_v9 }
 0x229   :  { %3028 = vmatprep.subr.bf16.mxu1 %v5525_v0  ;;  %3151 = vmatprep.subr.bf16.mxu0 %v5528_v52  ;;  %v5603_v0 = vld [vmem:[#allocation10 + $0x5d4] ss:$24 sps:$4 sm:$0xff]  }
 0x22a   :  { %v5606_v52 = vld [vmem:[#allocation10 + $0x5dc] ss:$24 sps:$4 sm:$0xff]  }
 0x22c   :  { %3029 = vmatpush1.bf16.msra.mxu1 %v5523_v53  ;;  %3152 = vmatpush1.bf16.msra.mxu0 %v5526_v1  ;;  %v550_v53 = vrot.slane %v6504_v22, %v6435_v31 }
 0x22d   :  { %3030 = vmatprep.subr.bf16.mxu1 %v5531_v4  ;;  %3153 = vmatprep.subr.bf16.mxu0 %v5534_v5  ;;  %v5601_v4 = vld [vmem:[#allocation10 + $0x5d0] ss:$24 sps:$4 sm:$0xff]  }
 0x22e   :  { %v5604_v5 = vld [vmem:[#allocation10 + $0x5d8] ss:$24 sps:$4 sm:$0xff]  }
 0x230   :  { %3031 = vmatpush1.bf16.msra.mxu1 %v5529_v6  ;;  %3154 = vmatpush1.bf16.msra.mxu0 %v5532_v7  ;;  %v1170_v6 = vadd.f32 %v6512_v44, %v538_v63  ;;  %v5618_v44 = vld [vmem:[#allocation10 + $0x63c] ss:$24 sps:$4 sm:$0xff]  }
 0x231   :  { %3032 = vmatprep.subr.bf16.mxu1 %v5537_v8  ;;  %3155 = vmatprep.subr.bf16.mxu0 %v5540_v10  ;;  %v5609_v8 = vld [vmem:[#allocation10 + $0x604] ss:$24 sps:$4 sm:$0xff]  }
 0x232   :  { %v5612_v10 = vld [vmem:[#allocation10 + $0x60c] ss:$24 sps:$4 sm:$0xff]  }
 0x233   :  { %v5669_v63 = vld [vmem:[#allocation10 + $0x7e4] ss:$24 sps:$4 sm:$0xff]  }
 0x234   :  { %3033 = vmatpush1.bf16.msra.mxu1 %v5535_v11  ;;  %3156 = vmatpush1.bf16.msra.mxu0 %v5538_v59 }
 0x235   :  { %3034 = vmatprep.subr.bf16.mxu1 %v5543_v12  ;;  %3157 = vmatprep.subr.bf16.mxu0 %v5546_v15  ;;  %v5607_v15 = vld [vmem:[#allocation10 + $0x600] ss:$24 sps:$4 sm:$0xff]  }
 0x238   :  { %3035 = vmatpush1.bf16.msra.mxu1 %v5541_v17  ;;  %3158 = vmatpush1.bf16.msra.mxu0 %v5544_v18  ;;  %v6533_v17 = vpack.c.bf16 %v1170_v6, %v1170_v6  ;;  %v5610_v18 = vld [vmem:[#allocation10 + $0x608] ss:$24 sps:$4 sm:$0xff]  }
 0x239   :  { %3036 = vmatprep.subr.bf16.mxu1 %v5549_v19  ;;  %3159 = vmatprep.subr.bf16.mxu0 %v5552_v20  ;;  %v5615_v20 = vld [vmem:[#allocation10 + $0x634] ss:$24 sps:$4 sm:$0xff]   ;;  %v5673_v6 = vld [vmem:[#allocation10 + $0x810] ss:$24 sps:$4 sm:$0xff]  }
 0x23c   :  { %3037 = vmatpush1.bf16.msra.mxu1 %v5547_v61  ;;  %3160 = vmatpush1.bf16.msra.mxu0 %v5550_v26  ;;  %v5613_v61 = vld [vmem:[#allocation10 + $0x630] ss:$24 sps:$4 sm:$0xff]  }
 0x23d   :  { %3038 = vmatprep.subr.bf16.mxu1 %v5555_v29  ;;  %3161 = vmatprep.subr.bf16.mxu0 %v5558_v62  ;;  %v5616_v26 = vld [vmem:[#allocation10 + $0x638] ss:$24 sps:$4 sm:$0xff]   ;;  %v5621_v29 = vld [vmem:[#allocation10 + $0x664] ss:$24 sps:$4 sm:$0xff]  }
 0x23e   :  { %v5624_v62 = vld [vmem:[#allocation10 + $0x66c] ss:$24 sps:$4 sm:$0xff]  }
 0x240   :  { %3039 = vmatpush1.bf16.msra.mxu1 %v5553_v30  ;;  %3162 = vmatpush1.bf16.msra.mxu0 %v5556_v32  ;;  %v5619_v30 = vld [vmem:[#allocation10 + $0x660] ss:$24 sps:$4 sm:$0xff]  }
 0x241   :  { %3040 = vmatprep.subr.bf16.mxu1 %v5561_v13  ;;  %3163 = vmatprep.subr.bf16.mxu0 %v5564_v14  ;;  %v5622_v32 = vld [vmem:[#allocation10 + $0x668] ss:$24 sps:$4 sm:$0xff]   ;;  %v5627_v13 = vld [vmem:[#allocation10 + $0x694] ss:$24 sps:$4 sm:$0xff]  }
 0x242   :  { %v5630_v14 = vld [vmem:[#allocation10 + $0x69c] ss:$24 sps:$4 sm:$0xff]  }
 0x244   :  { %3041 = vmatpush1.bf16.msra.mxu1 %v5559_v33  ;;  %3164 = vmatpush1.bf16.msra.mxu0 %v5562_v34  ;;  %v5625_v33 = vld [vmem:[#allocation10 + $0x690] ss:$24 sps:$4 sm:$0xff]  }
 0x245   :  { %3042 = vmatprep.subr.bf16.mxu1 %v5567_v37  ;;  %3165 = vmatprep.subr.bf16.mxu0 %v5570_v38  ;;  %v5628_v34 = vld [vmem:[#allocation10 + $0x698] ss:$24 sps:$4 sm:$0xff]   ;;  %v5633_v37 = vld [vmem:[#allocation10 + $0x6c4] ss:$24 sps:$4 sm:$0xff]  }
 0x246   :  { %v5636_v38 = vld [vmem:[#allocation10 + $0x6cc] ss:$24 sps:$4 sm:$0xff]  }
 0x248   :  { %3043 = vmatpush1.bf16.msra.mxu1 %v5565_v39  ;;  %3166 = vmatpush1.bf16.msra.mxu0 %v5568_v40  ;;  %v5631_v39 = vld [vmem:[#allocation10 + $0x6c0] ss:$24 sps:$4 sm:$0xff]  }
 0x249   :  { %3044 = vmatprep.subr.bf16.mxu1 %v5573_v41  ;;  %3167 = vmatprep.subr.bf16.mxu0 %v5576_v21  ;;  %v5634_v40 = vld [vmem:[#allocation10 + $0x6c8] ss:$24 sps:$4 sm:$0xff]   ;;  %v5639_v41 = vld [vmem:[#allocation10 + $0x6f4] ss:$24 sps:$4 sm:$0xff]  }
 0x24a   :  { %v5642_v21 = vld [vmem:[#allocation10 + $0x6fc] ss:$24 sps:$4 sm:$0xff]  }
 0x24c   :  { %3045 = vmatpush1.bf16.msra.mxu1 %v5571_v42  ;;  %3168 = vmatpush1.bf16.msra.mxu0 %v5574_v43  ;;  %v5637_v42 = vld [vmem:[#allocation10 + $0x6f0] ss:$24 sps:$4 sm:$0xff]  }
 0x24d   :  { %3046 = vmatprep.subr.bf16.mxu1 %v5579_v46  ;;  %3169 = vmatprep.subr.bf16.mxu0 %v5582_v47  ;;  %v5640_v43 = vld [vmem:[#allocation10 + $0x6f8] ss:$24 sps:$4 sm:$0xff]   ;;  %v5645_v46 = vld [vmem:[#allocation10 + $0x724] ss:$24 sps:$4 sm:$0xff]  }
 0x24e   :  { %v5648_v47 = vld [vmem:[#allocation10 + $0x72c] ss:$24 sps:$4 sm:$0xff]  }
 0x250   :  { %3047 = vmatpush1.bf16.msra.mxu1 %v5577_v49  ;;  %3170 = vmatpush1.bf16.msra.mxu0 %v5580_v56  ;;  %v5643_v49 = vld [vmem:[#allocation10 + $0x720] ss:$24 sps:$4 sm:$0xff]  }
 0x251   :  { %3048 = vmatprep.subr.bf16.mxu1 %v5585_v50  ;;  %3171 = vmatprep.subr.bf16.mxu0 %v5588_v57  ;;  %v5646_v56 = vld [vmem:[#allocation10 + $0x728] ss:$24 sps:$4 sm:$0xff]   ;;  %v5651_v50 = vld [vmem:[#allocation10 + $0x754] ss:$24 sps:$4 sm:$0xff]  }
 0x252   :  { %v5654_v57 = vld [vmem:[#allocation10 + $0x75c] ss:$24 sps:$4 sm:$0xff]  }
 0x254   :  { %3049 = vmatpush1.bf16.msra.mxu1 %v5583_v27  ;;  %3172 = vmatpush1.bf16.msra.mxu0 %v5586_v23  ;;  %v5649_v27 = vld [vmem:[#allocation10 + $0x750] ss:$24 sps:$4 sm:$0xff]  }
 0x255   :  { %3050 = vmatprep.subr.bf16.mxu1 %v5591_v25  ;;  %3173 = vmatprep.subr.bf16.mxu0 %v5594_v28  ;;  %v5652_v23 = vld [vmem:[#allocation10 + $0x758] ss:$24 sps:$4 sm:$0xff]   ;;  %v5657_v25 = vld [vmem:[#allocation10 + $0x784] ss:$24 sps:$4 sm:$0xff]  }
 0x256   :  { %v5660_v28 = vld [vmem:[#allocation10 + $0x78c] ss:$24 sps:$4 sm:$0xff]  }
 0x258   :  { %3051 = vmatpush1.bf16.msra.mxu1 %v5589_v45  ;;  %3174 = vmatpush1.bf16.msra.mxu0 %v5592_v51  ;;  %v5655_v45 = vld [vmem:[#allocation10 + $0x780] ss:$24 sps:$4 sm:$0xff]  }
 0x259   :  { %3052 = vmatprep.subr.bf16.mxu1 %v5597_v55  ;;  %3175 = vmatprep.subr.bf16.mxu0 %v5600_v36  ;;  %v5658_v51 = vld [vmem:[#allocation10 + $0x788] ss:$24 sps:$4 sm:$0xff]   ;;  %v5663_v55 = vld [vmem:[#allocation10 + $0x7b4] ss:$24 sps:$4 sm:$0xff]  }
 0x25a   :  { %v5666_v36 = vld [vmem:[#allocation10 + $0x7bc] ss:$24 sps:$4 sm:$0xff]  }
 0x25c   :  { %v6530_v1 = vpop.f32.mrb[4].mxu0  ;;  %3053 = vmatpush1.bf16.msra.mxu1 %v5595_v54  ;;  %3176 = vmatpush1.bf16.msra.mxu0 %v5598_v60  ;;  %v5661_v54 = vld [vmem:[#allocation10 + $0x7b0] ss:$24 sps:$4 sm:$0xff]  }
 0x25d   :  { %v1212_v7 = vpop.f32.mrb[5].mxu0  ;;  %3054 = vmatprep.subr.bf16.mxu1 %v5603_v0  ;;  %3177 = vmatprep.subr.bf16.mxu0 %v5606_v52  ;;  %v5664_v60 = vld [vmem:[#allocation10 + $0x7b8] ss:$24 sps:$4 sm:$0xff]   ;;  %v5672_v0 = vld [vmem:[#allocation10 + $0x7ec] ss:$24 sps:$4 sm:$0xff]  }
 0x25e   :  { %v1213_v11 = vadd.f32 %v1212_v7, %v550_v53  ;;  %v1214_v59 = vpop.f32.mrb[6].mxu0  ;;  %v5667_v52 = vld [vmem:[#allocation10 + $0x7e0] ss:$24 sps:$4 sm:$0xff]  }
 0x25f   :  { %v1215_v12 = vpop.f32.mrb[7].mxu0  ;;  %v5670_v53 = vld [vmem:[#allocation10 + $0x7e8] ss:$24 sps:$4 sm:$0xff]   ;;  %v5676_v7 = vld [vmem:[#allocation10 + $0x818] ss:$24 sps:$4 sm:$0xff]  }
 0x260   :  { %3055 = vmatpush1.bf16.msra.mxu1 %v5601_v4  ;;  %3178 = vmatpush1.bf16.msra.mxu0 %v5604_v5  ;;  %v6535_v19 = vpack.c.bf16 %v1213_v11, %v1213_v11  ;;  %v5675_v4 = vld [vmem:[#allocation10 + $0x814] ss:$24 sps:$4 sm:$0xff]   ;;  %v5679_v11 = vld [vmem:[#allocation10 + $0x840] ss:$24 sps:$4 sm:$0xff]  }
 0x261   :  { %3065 = vmatprep.subr.bf16.mxu1 %v5609_v8  ;;  %3188 = vmatprep.subr.bf16.mxu0 %v5612_v10  ;;  %v5678_v5 = vld [vmem:[#allocation10 + $0x81c] ss:$24 sps:$4 sm:$0xff]   ;;  %v5684_v10 = vld [vmem:[#allocation10 + $0x84c] ss:$24 sps:$4 sm:$0xff]   ;;  %v5682_v59 = vld [vmem:[#allocation10 + $0x848] ss:$24 sps:$4 sm:$0xff]  }
 0x262   :  { %v5681_v8 = vld [vmem:[#allocation10 + $0x844] ss:$24 sps:$4 sm:$0xff]   ;;  %v5687_v12 = vld [vmem:[#allocation10 + $0x874] ss:$24 sps:$4 sm:$0xff]  }
 0x263   :  { %3057 = vmatmul.mubr.bf16.vlgmr.msra.gmra.mrb[4].mxu1 %v6533_v17  ;;  %3180 = vmatmul.mubr.bf16.vlgmr.msra.gmra.mrb[8].mxu0 %v6533_v17 }
 0x264   :  { %3066 = vmatpush1.bf16.msra.mxu1 %v5607_v15  ;;  %3097 = vmatprep.mubr.bf16.mxu1 %v6535_v19  ;;  %v5690_v15 = vld [vmem:[#allocation10 + $0x87c] ss:$24 sps:$4 sm:$0xff]  }
 0x265   :  { %3189 = vmatpush1.bf16.msra.mxu0 %v5610_v18  ;;  %3220 = vmatprep.mubr.bf16.mxu0 %v6535_v19  ;;  %v5685_v18 = vld [vmem:[#allocation10 + $0x870] ss:$24 sps:$4 sm:$0xff]  }
 0x266   :  { %3067 = vmatprep.subr.bf16.mxu1 %v5615_v20  ;;  %3190 = vmatprep.subr.bf16.mxu0 %v5618_v44  ;;  %v5688_v20 = vld [vmem:[#allocation10 + $0x878] ss:$24 sps:$4 sm:$0xff]   ;;  %v5693_v44 = vld [vmem:[#allocation10 + $0x8a4] ss:$24 sps:$4 sm:$0xff]  }
 0x268   :  { %3068 = vmatpush1.bf16.msra.mxu1 %v5613_v61  ;;  %v5696_v61 = vld [vmem:[#allocation10 + $0x8ac] ss:$24 sps:$4 sm:$0xff]  }
 0x269   :  { %3191 = vmatpush1.bf16.msra.mxu0 %v5616_v26  ;;  %3069 = vmatprep.subr.bf16.mxu1 %v5621_v29  ;;  %v5691_v26 = vld [vmem:[#allocation10 + $0x8a0] ss:$24 sps:$4 sm:$0xff]   ;;  %v546_v29 = vrot.slane %v6504_v22, %v6430_v24  ;;  %v5708_v22 = vld [vmem:[#allocation10 + $0x44] ss:$24 sps:$4 sm:$0xff]  }
 0x26a   :  { %3192 = vmatprep.subr.bf16.mxu0 %v5624_v62  ;;  %v5694_v62 = vld [vmem:[#allocation10 + $0x8a8] ss:$24 sps:$4 sm:$0xff]  }
 0x26c   :  { %3070 = vmatpush1.bf16.msra.mxu1 %v5619_v30  ;;  %v5699_v30 = vld [vmem:[#allocation10 + $0x8d4] ss:$24 sps:$4 sm:$0xff]  }
 0x26d   :  { %3193 = vmatpush1.bf16.msra.mxu0 %v5622_v32  ;;  %3071 = vmatprep.subr.bf16.mxu1 %v5627_v13  ;;  %v5702_v32 = vld [vmem:[#allocation10 + $0x8dc] ss:$24 sps:$4 sm:$0xff]   ;;  %v5697_v13 = vld [vmem:[#allocation10 + $0x8d0] ss:$24 sps:$4 sm:$0xff]  }
 0x26e   :  { %3194 = vmatprep.subr.bf16.mxu0 %v5630_v14  ;;  %v1211_v14 = vadd.f32 %v6530_v1, %v546_v29  ;;  %v5711_v1 = vld [vmem:[#allocation10 + $0x74] ss:$24 sps:$4 sm:$0xff]   ;;  %v5750_v29 = vld [vmem:[#allocation10 + $0x2e4] ss:$24 sps:$4 sm:$0xff]  }
 0x270   :  { %3072 = vmatpush1.bf16.msra.mxu1 %v5625_v33  ;;  %v5700_v33 = vld [vmem:[#allocation10 + $0x8d8] ss:$24 sps:$4 sm:$0xff]  }
 0x271   :  { %3195 = vmatpush1.bf16.msra.mxu0 %v5628_v34  ;;  %3073 = vmatprep.subr.bf16.mxu1 %v5633_v37  ;;  %v5705_v34 = vld [vmem:[#allocation10 + $0x14] ss:$24 sps:$4 sm:$0xff]   ;;  %v5703_v37 = vld [vmem:[#allocation10 + $0x10] ss:$24 sps:$4 sm:$0xff]  }
 0x272   :  { %3196 = vmatprep.subr.bf16.mxu0 %v5636_v38  ;;  %v6544_v38 = vpack.c.bf16 %v1211_v14, %v1211_v14  ;;  %v5751_v14 = vld [vmem:[#allocation10 + $0x310] ss:$24 sps:$4 sm:$0xff]  }
 0x274   :  { %3074 = vmatpush1.bf16.msra.mxu1 %v5631_v39  ;;  %v5706_v39 = vld [vmem:[#allocation10 + $0x40] ss:$24 sps:$4 sm:$0xff]  }
 0x275   :  { %3197 = vmatpush1.bf16.msra.mxu0 %v5634_v40  ;;  %3075 = vmatprep.subr.bf16.mxu1 %v5639_v41  ;;  %v5709_v40 = vld [vmem:[#allocation10 + $0x70] ss:$24 sps:$4 sm:$0xff]   ;;  %v5714_v41 = vld [vmem:[#allocation10 + $0xa4] ss:$24 sps:$4 sm:$0xff]  }
 0x276   :  { %3198 = vmatprep.subr.bf16.mxu0 %v5642_v21  ;;  %v5712_v21 = vld [vmem:[#allocation10 + $0xa0] ss:$24 sps:$4 sm:$0xff]  }
 0x278   :  { %3076 = vmatpush1.bf16.msra.mxu1 %v5637_v42  ;;  %v5717_v42 = vld [vmem:[#allocation10 + $0xd4] ss:$24 sps:$4 sm:$0xff]  }
 0x279   :  { %3199 = vmatpush1.bf16.msra.mxu0 %v5640_v43  ;;  %3077 = vmatprep.subr.bf16.mxu1 %v5645_v46  ;;  %v5715_v43 = vld [vmem:[#allocation10 + $0xd0] ss:$24 sps:$4 sm:$0xff]   ;;  %v5720_v46 = vld [vmem:[#allocation10 + $0x104] ss:$24 sps:$4 sm:$0xff]  }
 0x27a   :  { %3200 = vmatprep.subr.bf16.mxu0 %v5648_v47  ;;  %v5718_v47 = vld [vmem:[#allocation10 + $0x100] ss:$24 sps:$4 sm:$0xff]  }
 0x27c   :  { %3078 = vmatpush1.bf16.msra.mxu1 %v5643_v49  ;;  %v5723_v49 = vld [vmem:[#allocation10 + $0x134] ss:$24 sps:$4 sm:$0xff]  }
 0x27d   :  { %3201 = vmatpush1.bf16.msra.mxu0 %v5646_v56  ;;  %3079 = vmatprep.subr.bf16.mxu1 %v5651_v50  ;;  %v5726_v56 = vld [vmem:[#allocation10 + $0x164] ss:$24 sps:$4 sm:$0xff]   ;;  %v5724_v50 = vld [vmem:[#allocation10 + $0x160] ss:$24 sps:$4 sm:$0xff]  }
 0x27e   :  { %3202 = vmatprep.subr.bf16.mxu0 %v5654_v57  ;;  %v5820_v57 = vld [vmem:[#allocation13] ss:$12 sps:$4 sm:$0xff]  }
 0x280   :  { %3080 = vmatpush1.bf16.msra.mxu1 %v5649_v27  ;;  %v5822_v27 = vld [vmem:[#allocation13 + $0x4] ss:$12 sps:$4 sm:$0xff]  }
 0x281   :  { %3203 = vmatpush1.bf16.msra.mxu0 %v5652_v23  ;;  %3081 = vmatprep.subr.bf16.mxu1 %v5657_v25  ;;  %v5729_v23 = vld [vmem:[#allocation10 + $0x194] ss:$24 sps:$4 sm:$0xff]   ;;  %v5727_v25 = vld [vmem:[#allocation10 + $0x190] ss:$24 sps:$4 sm:$0xff]  }
 0x282   :  { %3204 = vmatprep.subr.bf16.mxu0 %v5660_v28  ;;  %v5826_v28 = vld [vmem:[#allocation13 + $0x18] ss:$12 sps:$4 sm:$0xff]  }
 0x284   :  { %3082 = vmatpush1.bf16.msra.mxu1 %v5655_v45  ;;  %v5828_v45 = vld [vmem:[#allocation13 + $0x1c] ss:$12 sps:$4 sm:$0xff]  }
 0x285   :  { %3205 = vmatpush1.bf16.msra.mxu0 %v5658_v51  ;;  %3083 = vmatprep.subr.bf16.mxu1 %v5663_v55  ;;  %v5732_v51 = vld [vmem:[#allocation10 + $0x1c4] ss:$24 sps:$4 sm:$0xff]   ;;  %v5730_v55 = vld [vmem:[#allocation10 + $0x1c0] ss:$24 sps:$4 sm:$0xff]  }
 0x286   :  { %3206 = vmatprep.subr.bf16.mxu0 %v5666_v36  ;;  %v5832_v36 = vld [vmem:[#allocation13 + $0x30] ss:$12 sps:$4 sm:$0xff]  }
 0x288   :  { %3084 = vmatpush1.bf16.msra.mxu1 %v5661_v54  ;;  %v5834_v54 = vld [vmem:[#allocation13 + $0x34] ss:$12 sps:$4 sm:$0xff]  }
 0x289   :  { %3207 = vmatpush1.bf16.msra.mxu0 %v5664_v60  ;;  %3085 = vmatprep.subr.bf16.mxu1 %v5669_v63  ;;  %v5735_v60 = vld [vmem:[#allocation10 + $0x1f4] ss:$24 sps:$4 sm:$0xff]   ;;  %v5733_v63 = vld [vmem:[#allocation10 + $0x1f0] ss:$24 sps:$4 sm:$0xff]  }
 0x28a   :  { %3208 = vmatprep.subr.bf16.mxu0 %v5672_v0  ;;  %v5838_v0 = vld [vmem:[#allocation13 + $0x48] ss:$12 sps:$4 sm:$0xff]  }
 0x28c   :  { %3086 = vmatpush1.bf16.msra.mxu1 %v5667_v52  ;;  %v5840_v52 = vld [vmem:[#allocation13 + $0x4c] ss:$12 sps:$4 sm:$0xff]  }
 0x28d   :  { %3209 = vmatpush1.bf16.msra.mxu0 %v5670_v53  ;;  %3087 = vmatprep.subr.bf16.mxu1 %v5675_v4  ;;  %v5738_v53 = vld [vmem:[#allocation10 + $0x224] ss:$24 sps:$4 sm:$0xff]   ;;  %v5736_v4 = vld [vmem:[#allocation10 + $0x220] ss:$24 sps:$4 sm:$0xff]  }
 0x28e   :  { %3210 = vmatprep.subr.bf16.mxu0 %v5678_v5  ;;  %v5844_v5 = vld [vmem:[#allocation13 + $0x60] ss:$12 sps:$4 sm:$0xff]  }
 0x290   :  { %3088 = vmatpush1.bf16.msra.mxu1 %v5673_v6  ;;  %v5846_v6 = vld [vmem:[#allocation13 + $0x64] ss:$12 sps:$4 sm:$0xff]  }
 0x291   :  { %3211 = vmatpush1.bf16.msra.mxu0 %v5676_v7  ;;  %3089 = vmatprep.subr.bf16.mxu1 %v5681_v8  ;;  %v5741_v7 = vld [vmem:[#allocation10 + $0x254] ss:$24 sps:$4 sm:$0xff]   ;;  %v5739_v8 = vld [vmem:[#allocation10 + $0x250] ss:$24 sps:$4 sm:$0xff]  }
 0x292   :  { %3212 = vmatprep.subr.bf16.mxu0 %v5684_v10  ;;  %v5850_v10 = vld [vmem:[#allocation13 + $0x78] ss:$12 sps:$4 sm:$0xff]  }
 0x294   :  { %3090 = vmatpush1.bf16.msra.mxu1 %v5679_v11  ;;  %v5852_v11 = vld [vmem:[#allocation13 + $0x7c] ss:$12 sps:$4 sm:$0xff]  }
 0x295   :  { %3213 = vmatpush1.bf16.msra.mxu0 %v5682_v59  ;;  %3091 = vmatprep.subr.bf16.mxu1 %v5687_v12  ;;  %v5744_v59 = vld [vmem:[#allocation10 + $0x284] ss:$24 sps:$4 sm:$0xff]   ;;  %v5742_v12 = vld [vmem:[#allocation10 + $0x280] ss:$24 sps:$4 sm:$0xff]  }
 0x296   :  { %3214 = vmatprep.subr.bf16.mxu0 %v5690_v15  ;;  %v5856_v15 = vld [vmem:[#allocation13 + $0x90] ss:$12 sps:$4 sm:$0xff]  }
 0x298   :  { %3092 = vmatpush1.bf16.msra.mxu1 %v5685_v18  ;;  %v5858_v18 = vld [vmem:[#allocation13 + $0x94] ss:$12 sps:$4 sm:$0xff]  }
 0x299   :  { %3215 = vmatpush1.bf16.msra.mxu0 %v5688_v20  ;;  %3093 = vmatprep.subr.bf16.mxu1 %v5693_v44  ;;  %v5747_v20 = vld [vmem:[#allocation10 + $0x2b4] ss:$24 sps:$4 sm:$0xff]   ;;  %v5745_v44 = vld [vmem:[#allocation10 + $0x2b0] ss:$24 sps:$4 sm:$0xff]  }
 0x29a   :  { %3216 = vmatprep.subr.bf16.mxu0 %v5696_v61  ;;  %v5862_v61 = vld [vmem:[#allocation13 + $0xa8] ss:$12 sps:$4 sm:$0xff]  }
 0x29c   :  { %3094 = vmatpush1.bf16.msra.mxu1 %v5691_v26  ;;  %v5864_v26 = vld [vmem:[#allocation13 + $0xac] ss:$12 sps:$4 sm:$0xff]  }
 0x29d   :  { %3217 = vmatpush1.bf16.msra.mxu0 %v5694_v62  ;;  %3095 = vmatprep.subr.bf16.mxu1 %v5699_v30  ;;  %v5748_v62 = vld [vmem:[#allocation10 + $0x2e0] ss:$24 sps:$4 sm:$0xff]   ;;  %v5868_v30 = vld [vmem:[#allocation13 + $0xc0] ss:$12 sps:$4 sm:$0xff]  }
 0x29e   :  { %3218 = vmatprep.subr.bf16.mxu0 %v5702_v32  ;;  %v5870_v32 = vld [vmem:[#allocation13 + $0xc4] ss:$12 sps:$4 sm:$0xff]  }
 0x2a0   :  { %3096 = vmatpush1.bf16.msra.mxu1 %v5697_v13  ;;  %v5753_v13 = vld [vmem:[#allocation10 + $0x314] ss:$24 sps:$4 sm:$0xff]  }
 0x2a1   :  { %3219 = vmatpush1.bf16.msra.mxu0 %v5700_v33  ;;  %3229 = vmatprep.subr.bf16.mxu1 %v5705_v34  ;;  %v5874_v33 = vld [vmem:[#allocation13 + $0xd8] ss:$12 sps:$4 sm:$0xff]   ;;  %v5876_v34 = vld [vmem:[#allocation13 + $0xdc] ss:$12 sps:$4 sm:$0xff]  }
 0x2a2   :  { %4341 = vmatprep.subr.bf16.mxu0 %v5822_v27  ;;  %v5771_v27 = vld [vmem:[#allocation10 + $0x434] ss:$24 sps:$4 sm:$0xff]  }
 0x2a3   :  { %3098 = vmatmul.mubr.bf16.vlgmr.msra.gmra.mrb[4].mxu1 %v6544_v38 }
 0x2a4   :  { %3221 = vmatmul.mubr.bf16.vlgmr.msra.gmra.mrb[8].mxu0 %v6544_v38  ;;  %3230 = vmatpush1.bf16.msra.mxu1 %v5703_v37  ;;  %v5756_v37 = vld [vmem:[#allocation10 + $0x344] ss:$24 sps:$4 sm:$0xff]  }
 0x2a5   :  { %3261 = vmatprep.mubr.bf16.mxu1 %v6514_v48  ;;  %3231 = vmatprep.subr.bf16.mxu1 %v5708_v22  ;;  %v5721_v48 = vld [vmem:[#allocation10 + $0x130] ss:$24 sps:$4 sm:$0xff]   ;;  %v5754_v22 = vld [vmem:[#allocation10 + $0x340] ss:$24 sps:$4 sm:$0xff]  }
 0x2a6   :  { %4342 = vmatpush1.bf16.msra.mxu0 %v5820_v57  ;;  %v5766_v57 = vld [vmem:[#allocation10 + $0x400] ss:$24 sps:$4 sm:$0xff]  }
 0x2a7   :  { %4343 = vmatprep.subr.bf16.mxu0 %v5828_v45  ;;  %v5899_v45 = vld [vmem:[#allocation13 + $0x150] ss:$12 sps:$4 sm:$0xff]  }
 0x2a8   :  { %3232 = vmatpush1.bf16.msra.mxu1 %v5706_v39  ;;  %v5879_v39 = vld [vmem:[#allocation13 + $0xf0] ss:$12 sps:$4 sm:$0xff]  }
 0x2a9   :  { %3233 = vmatprep.subr.bf16.mxu1 %v5711_v1  ;;  %v5881_v1 = vld [vmem:[#allocation13 + $0xf4] ss:$12 sps:$4 sm:$0xff]  }
 0x2aa   :  { %4344 = vmatpush1.bf16.msra.mxu0 %v5826_v28  ;;  %v5774_v28 = vld [vmem:[#allocation10 + $0x464] ss:$24 sps:$4 sm:$0xff]  }
 0x2ab   :  { %4345 = vmatprep.subr.bf16.mxu0 %v5834_v54  ;;  %v5904_v54 = vld [vmem:[#allocation13 + $0x168] ss:$12 sps:$4 sm:$0xff]  }
 0x2ac   :  { %3234 = vmatpush1.bf16.msra.mxu1 %v5709_v40  ;;  %v5759_v40 = vld [vmem:[#allocation10 + $0x374] ss:$24 sps:$4 sm:$0xff]  }
 0x2ad   :  { %3235 = vmatprep.subr.bf16.mxu1 %v5714_v41  ;;  %v5757_v41 = vld [vmem:[#allocation10 + $0x370] ss:$24 sps:$4 sm:$0xff]  }
 0x2ae   :  { %4346 = vmatpush1.bf16.msra.mxu0 %v5832_v36  ;;  %v5777_v36 = vld [vmem:[#allocation10 + $0x494] ss:$24 sps:$4 sm:$0xff]  }
 0x2af   :  { %4347 = vmatprep.subr.bf16.mxu0 %v5840_v52  ;;  %v5778_v52 = vld [vmem:[#allocation10 + $0x4c0] ss:$24 sps:$4 sm:$0xff]  }
 0x2b0   :  { %3236 = vmatpush1.bf16.msra.mxu1 %v5712_v21  ;;  %v5884_v21 = vld [vmem:[#allocation13 + $0x108] ss:$12 sps:$4 sm:$0xff]  }
 0x2b1   :  { %3237 = vmatprep.subr.bf16.mxu1 %v5717_v42  ;;  %v5886_v42 = vld [vmem:[#allocation13 + $0x10c] ss:$12 sps:$4 sm:$0xff]  }
 0x2b2   :  { %4348 = vmatpush1.bf16.msra.mxu0 %v5838_v0  ;;  %v5780_v0 = vld [vmem:[#allocation10 + $0x4c4] ss:$24 sps:$4 sm:$0xff]  }
 0x2b3   :  { %4349 = vmatprep.subr.bf16.mxu0 %v5846_v6  ;;  %v5784_v6 = vld [vmem:[#allocation10 + $0x520] ss:$24 sps:$4 sm:$0xff]  }
 0x2b4   :  { %3238 = vmatpush1.bf16.msra.mxu1 %v5715_v43  ;;  %v5762_v43 = vld [vmem:[#allocation10 + $0x3a4] ss:$24 sps:$4 sm:$0xff]  }
 0x2b5   :  { %3239 = vmatprep.subr.bf16.mxu1 %v5720_v46  ;;  %v5889_v46 = vld [vmem:[#allocation13 + $0x120] ss:$12 sps:$4 sm:$0xff]  }
 0x2b6   :  { %4350 = vmatpush1.bf16.msra.mxu0 %v5844_v5  ;;  %v5786_v5 = vld [vmem:[#allocation10 + $0x524] ss:$24 sps:$4 sm:$0xff]  }
 0x2b7   :  { %4351 = vmatprep.subr.bf16.mxu0 %v5852_v11  ;;  %v5790_v11 = vld [vmem:[#allocation10 + $0x580] ss:$24 sps:$4 sm:$0xff]  }
 0x2b8   :  { %3240 = vmatpush1.bf16.msra.mxu1 %v5718_v47  ;;  %v5891_v47 = vld [vmem:[#allocation13 + $0x124] ss:$12 sps:$4 sm:$0xff]  }
 0x2b9   :  { %3241 = vmatprep.subr.bf16.mxu1 %v5723_v49  ;;  %v5763_v49 = vld [vmem:[#allocation10 + $0x3d0] ss:$24 sps:$4 sm:$0xff]  }
 0x2ba   :  { %4352 = vmatpush1.bf16.msra.mxu0 %v5850_v10  ;;  %v5792_v10 = vld [vmem:[#allocation10 + $0x584] ss:$24 sps:$4 sm:$0xff]  }
 0x2bb   :  { %4353 = vmatprep.subr.bf16.mxu0 %v5858_v18  ;;  %v5796_v18 = vld [vmem:[#allocation10 + $0x5e0] ss:$24 sps:$4 sm:$0xff]  }
 0x2bc   :  { %3242 = vmatpush1.bf16.msra.mxu1 %v5721_v48  ;;  %v5894_v48 = vld [vmem:[#allocation13 + $0x138] ss:$12 sps:$4 sm:$0xff]  }
 0x2bd   :  { %3243 = vmatprep.subr.bf16.mxu1 %v5726_v56  ;;  %v5896_v56 = vld [vmem:[#allocation13 + $0x13c] ss:$12 sps:$4 sm:$0xff]  }
 0x2be   :  { %4354 = vmatpush1.bf16.msra.mxu0 %v5856_v15  ;;  %v5798_v15 = vld [vmem:[#allocation10 + $0x5e4] ss:$24 sps:$4 sm:$0xff]  }
 0x2bf   :  { %4355 = vmatprep.subr.bf16.mxu0 %v5864_v26  ;;  %v5802_v26 = vld [vmem:[#allocation10 + $0x640] ss:$24 sps:$4 sm:$0xff]  }
 0x2c0   :  { %3244 = vmatpush1.bf16.msra.mxu1 %v5724_v50  ;;  %v5768_v50 = vld [vmem:[#allocation10 + $0x404] ss:$24 sps:$4 sm:$0xff]  }
 0x2c1   :  { %3245 = vmatprep.subr.bf16.mxu1 %v5729_v23  ;;  %v5769_v23 = vld [vmem:[#allocation10 + $0x430] ss:$24 sps:$4 sm:$0xff]  }
 0x2c2   :  { %4356 = vmatpush1.bf16.msra.mxu0 %v5862_v61  ;;  %v5804_v61 = vld [vmem:[#allocation10 + $0x644] ss:$24 sps:$4 sm:$0xff]  }
 0x2c3   :  { %4357 = vmatprep.subr.bf16.mxu0 %v5870_v32  ;;  %v5808_v32 = vld [vmem:[#allocation10 + $0x6a0] ss:$24 sps:$4 sm:$0xff]  }
 0x2c4   :  { %3246 = vmatpush1.bf16.msra.mxu1 %v5727_v25  ;;  %v5901_v25 = vld [vmem:[#allocation13 + $0x154] ss:$12 sps:$4 sm:$0xff]  }
 0x2c5   :  { %3247 = vmatprep.subr.bf16.mxu1 %v5732_v51  ;;  %v5772_v51 = vld [vmem:[#allocation10 + $0x460] ss:$24 sps:$4 sm:$0xff]  }
 0x2c6   :  { %4358 = vmatpush1.bf16.msra.mxu0 %v5868_v30  ;;  %v5810_v30 = vld [vmem:[#allocation10 + $0x6a4] ss:$24 sps:$4 sm:$0xff]  }
 0x2c7   :  { %4359 = vmatprep.subr.bf16.mxu0 %v5876_v34  ;;  %v5819_v34 = vld [vmem:[#allocation10 + $0x734] ss:$24 sps:$4 sm:$0xff]  }
 0x2c8   :  { %3248 = vmatpush1.bf16.msra.mxu1 %v5730_v55  ;;  %v5906_v55 = vld [vmem:[#allocation13 + $0x16c] ss:$12 sps:$4 sm:$0xff]  }
 0x2c9   :  { %3249 = vmatprep.subr.bf16.mxu1 %v5735_v60  ;;  %v5911_v60 = vld [vmem:[#allocation13 + $0x184] ss:$12 sps:$4 sm:$0xff]  }
 0x2ca   :  { %4360 = vmatpush1.bf16.msra.mxu0 %v5874_v33  ;;  %v5816_v33 = vld [vmem:[#allocation10 + $0x704] ss:$24 sps:$4 sm:$0xff]  }
 0x2cb   :  { %4361 = vmatprep.subr.bf16.mxu0 %v5881_v1  ;;  %v5829_v1 = vld [vmem:[#allocation10 + $0x790] ss:$24 sps:$4 sm:$0xff]  }
 0x2cc   :  { %3250 = vmatpush1.bf16.msra.mxu1 %v5733_v63  ;;  %v5775_v63 = vld [vmem:[#allocation10 + $0x490] ss:$24 sps:$4 sm:$0xff]  }
 0x2cd   :  { %3251 = vmatprep.subr.bf16.mxu1 %v5738_v53  ;;  %v5783_v53 = vld [vmem:[#allocation10 + $0x4f4] ss:$24 sps:$4 sm:$0xff]  }
 0x2ce   :  { %4362 = vmatpush1.bf16.msra.mxu0 %v5879_v39  ;;  %v5831_v39 = vld [vmem:[#allocation10 + $0x794] ss:$24 sps:$4 sm:$0xff]  }
 0x2cf   :  { %4363 = vmatprep.subr.bf16.mxu0 %v5886_v42  ;;  %v5841_v42 = vld [vmem:[#allocation10 + $0x7f0] ss:$24 sps:$4 sm:$0xff]  }
 0x2d0   :  { %3252 = vmatpush1.bf16.msra.mxu1 %v5736_v4  ;;  %v5781_v4 = vld [vmem:[#allocation10 + $0x4f0] ss:$24 sps:$4 sm:$0xff]  }
 0x2d1   :  { %3253 = vmatprep.subr.bf16.mxu1 %v5741_v7  ;;  %v5789_v7 = vld [vmem:[#allocation10 + $0x554] ss:$24 sps:$4 sm:$0xff]  }
 0x2d2   :  { %4364 = vmatpush1.bf16.msra.mxu0 %v5884_v21  ;;  %v5843_v21 = vld [vmem:[#allocation10 + $0x7f4] ss:$24 sps:$4 sm:$0xff]  }
 0x2d3   :  { %4365 = vmatprep.subr.bf16.mxu0 %v5891_v47  ;;  %v5853_v47 = vld [vmem:[#allocation10 + $0x850] ss:$24 sps:$4 sm:$0xff]  }
 0x2d4   :  { %3254 = vmatpush1.bf16.msra.mxu1 %v5739_v8  ;;  %v5787_v8 = vld [vmem:[#allocation10 + $0x550] ss:$24 sps:$4 sm:$0xff]  }
 0x2d5   :  { %3255 = vmatprep.subr.bf16.mxu1 %v5744_v59  ;;  %v5795_v59 = vld [vmem:[#allocation10 + $0x5b4] ss:$24 sps:$4 sm:$0xff]  }
 0x2d6   :  { %4366 = vmatpush1.bf16.msra.mxu0 %v5889_v46  ;;  %v5855_v46 = vld [vmem:[#allocation10 + $0x854] ss:$24 sps:$4 sm:$0xff]  }
 0x2d7   :  { %4367 = vmatprep.subr.bf16.mxu0 %v5896_v56  ;;  %v5865_v56 = vld [vmem:[#allocation10 + $0x8b0] ss:$24 sps:$4 sm:$0xff]  }
 0x2d8   :  { %3256 = vmatpush1.bf16.msra.mxu1 %v5742_v12  ;;  %v5793_v12 = vld [vmem:[#allocation10 + $0x5b0] ss:$24 sps:$4 sm:$0xff]  }
 0x2d9   :  { %3257 = vmatprep.subr.bf16.mxu1 %v5747_v20  ;;  %v5801_v20 = vld [vmem:[#allocation10 + $0x614] ss:$24 sps:$4 sm:$0xff]  }
 0x2da   :  { %4368 = vmatpush1.bf16.msra.mxu0 %v5894_v48  ;;  %v5867_v48 = vld [vmem:[#allocation10 + $0x8b4] ss:$24 sps:$4 sm:$0xff]  }
 0x2db   :  { %4369 = vmatprep.subr.bf16.mxu0 %v5901_v25  ;;  %v5882_v25 = vld [vmem:[#allocation13 + $0xe0] ss:$12 sps:$4 sm:$0xff]  }
 0x2dc   :  { %3258 = vmatpush1.bf16.msra.mxu1 %v5745_v44  ;;  %v5799_v44 = vld [vmem:[#allocation10 + $0x610] ss:$24 sps:$4 sm:$0xff]  }
 0x2dd   :  { %3259 = vmatprep.subr.bf16.mxu1 %v5750_v29  ;;  %v5807_v29 = vld [vmem:[#allocation10 + $0x674] ss:$24 sps:$4 sm:$0xff]  }
 0x2de   :  { %4370 = vmatpush1.bf16.msra.mxu0 %v5899_v45  ;;  %v5887_v45 = vld [vmem:[#allocation13 + $0xf8] ss:$12 sps:$4 sm:$0xff]  }
 0x2df   :  { %4371 = vmatprep.subr.bf16.mxu0 %v5906_v55  ;;  %v5892_v55 = vld [vmem:[#allocation13 + $0x110] ss:$12 sps:$4 sm:$0xff]  }
 0x2e0   :  { %3260 = vmatpush1.bf16.msra.mxu1 %v5748_v62  ;;  %v5805_v62 = vld [vmem:[#allocation10 + $0x670] ss:$24 sps:$4 sm:$0xff]  }
 0x2e1   :  { %3270 = vmatprep.subr.bf16.mxu1 %v5753_v13  ;;  %v5813_v13 = vld [vmem:[#allocation10 + $0x6d4] ss:$24 sps:$4 sm:$0xff]  }
 0x2e2   :  { %4372 = vmatpush1.bf16.msra.mxu0 %v5904_v54  ;;  %v5897_v54 = vld [vmem:[#allocation13 + $0x128] ss:$12 sps:$4 sm:$0xff]  }
 0x2e3   :  { %3262 = vmatmul.mubr.bf16.vlgmr.msra.gmra.mrb[8].mxu1 %v6516_v35  ;;  %v5760_v35 = vld [vmem:[#allocation10 + $0x3a0] ss:$24 sps:$4 sm:$0xff]   ;;  %4382 = vmatprep.subr.bf16.mxu0 %v5911_v60 }
 0x2e4   :  { %3271 = vmatpush1.bf16.msra.mxu1 %v5751_v14  ;;  %3302 = vmatprep.mubr.bf16.mxu1 %v6520_v58  ;;  %v5765_v58 = vld [vmem:[#allocation10 + $0x3d4] ss:$24 sps:$4 sm:$0xff]   ;;  %v5811_v14 = vld [vmem:[#allocation10 + $0x6d0] ss:$24 sps:$4 sm:$0xff]  }
 0x2e5   :  { %3272 = vmatprep.subr.bf16.mxu1 %v5756_v37  ;;  %v5825_v37 = vld [vmem:[#allocation10 + $0x764] ss:$24 sps:$4 sm:$0xff]  }
 0x2e6   :  { %v5898_v60 = vld [vmem:[#allocation13 + $0x68] ss:$12 sps:$4 sm:$0xff]  }
 0x2e8   :  { %3273 = vmatpush1.bf16.msra.mxu1 %v5754_v22  ;;  %v5823_v22 = vld [vmem:[#allocation10 + $0x760] ss:$24 sps:$4 sm:$0xff]  }
 0x2e9   :  { %3274 = vmatprep.subr.bf16.mxu1 %v5759_v40  ;;  %v5837_v40 = vld [vmem:[#allocation10 + $0x7c4] ss:$24 sps:$4 sm:$0xff]  }
 0x2ec   :  { %3275 = vmatpush1.bf16.msra.mxu1 %v5757_v41  ;;  %v5835_v41 = vld [vmem:[#allocation10 + $0x7c0] ss:$24 sps:$4 sm:$0xff]  }
 0x2ed   :  { %3276 = vmatprep.subr.bf16.mxu1 %v5762_v43  ;;  %v5849_v43 = vld [vmem:[#allocation10 + $0x824] ss:$24 sps:$4 sm:$0xff]  }
 0x2f0   :  { %3277 = vmatpush1.bf16.msra.mxu1 %v5760_v35  ;;  %v5847_v35 = vld [vmem:[#allocation10 + $0x820] ss:$24 sps:$4 sm:$0xff]  }
 0x2f1   :  { %3278 = vmatprep.subr.bf16.mxu1 %v5765_v58  ;;  %v5861_v58 = vld [vmem:[#allocation10 + $0x884] ss:$24 sps:$4 sm:$0xff]  }
 0x2f4   :  { %3279 = vmatpush1.bf16.msra.mxu1 %v5763_v49  ;;  %v5859_v49 = vld [vmem:[#allocation10 + $0x880] ss:$24 sps:$4 sm:$0xff]  }
 0x2f5   :  { %3280 = vmatprep.subr.bf16.mxu1 %v5768_v50  ;;  %v5873_v50 = vld [vmem:[#allocation10 + $0x8e4] ss:$24 sps:$4 sm:$0xff]  }
 0x2f8   :  { %3281 = vmatpush1.bf16.msra.mxu1 %v5766_v57  ;;  %v5871_v57 = vld [vmem:[#allocation10 + $0x8e0] ss:$24 sps:$4 sm:$0xff]  }
 0x2f9   :  { %3282 = vmatprep.subr.bf16.mxu1 %v5771_v27  ;;  %v5877_v27 = vld [vmem:[#allocation13 + $0xc8] ss:$12 sps:$4 sm:$0xff]  }
 0x2fc   :  { %3283 = vmatpush1.bf16.msra.mxu1 %v5769_v23  ;;  %v5878_v23 = vld [vmem:[#allocation13 + $0x8] ss:$12 sps:$4 sm:$0xff]  }
 0x2fd   :  { %3284 = vmatprep.subr.bf16.mxu1 %v5774_v28  ;;  %v5883_v28 = vld [vmem:[#allocation13 + $0x20] ss:$12 sps:$4 sm:$0xff]  }
 0x300   :  { %3285 = vmatpush1.bf16.msra.mxu1 %v5772_v51  ;;  %v5888_v51 = vld [vmem:[#allocation13 + $0x38] ss:$12 sps:$4 sm:$0xff]  }
 0x301   :  { %3286 = vmatprep.subr.bf16.mxu1 %v5777_v36  ;;  %v5893_v36 = vld [vmem:[#allocation13 + $0x50] ss:$12 sps:$4 sm:$0xff]  }
 0x304   :  { %3287 = vmatpush1.bf16.msra.mxu1 %v5775_v63  ;;  %v6554_v63 = vld [vmem:[#allocation11] sm:$0x3f] }
 0x305   :  { %3288 = vmatprep.subr.bf16.mxu1 %v5780_v0  ;;  %v5902_v0 = vld [vmem:[#allocation13 + $0x140] ss:$12 sps:$4 sm:$0xff]  }
 0x308   :  { %3289 = vmatpush1.bf16.msra.mxu1 %v5778_v52  ;;  %v1520_v52 = vrot.slane %v6554_v63, %v6408_v2 }
 0x309   :  { %3290 = vmatprep.subr.bf16.mxu1 %v5783_v53  ;;  %v5903_v53 = vld [vmem:[#allocation13 + $0x80] ss:$12 sps:$4 sm:$0xff]  }
 0x30c   :  { %3291 = vmatpush1.bf16.msra.mxu1 %v5781_v4  ;;  %v1528_v4 = vrot.slane %v6554_v63, %v6423_v16 }
 0x30d   :  { %3292 = vmatprep.subr.bf16.mxu1 %v5786_v5  ;;  %v5907_v5 = vld [vmem:[#allocation13 + $0x158] ss:$12 sps:$4 sm:$0xff]  }
 0x310   :  { %3293 = vmatpush1.bf16.msra.mxu1 %v5784_v6 }
 0x311   :  { %3294 = vmatprep.subr.bf16.mxu1 %v5789_v7 }
 0x314   :  { %3295 = vmatpush1.bf16.msra.mxu1 %v5787_v8 }
 0x315   :  { %3296 = vmatprep.subr.bf16.mxu1 %v5792_v10 }
 0x318   :  { %3297 = vmatpush1.bf16.msra.mxu1 %v5790_v11 }
 0x319   :  { %3298 = vmatprep.subr.bf16.mxu1 %v5795_v59 }
 0x31c   :  { %3299 = vmatpush1.bf16.msra.mxu1 %v5793_v12 }
 0x31d   :  { %3300 = vmatprep.subr.bf16.mxu1 %v5798_v15  ;;  %v5908_v15 = vld [vmem:[#allocation13 + $0x98] ss:$12 sps:$4 sm:$0xff]  }
 0x320   :  { %3301 = vmatpush1.bf16.msra.mxu1 %v5796_v18 }
 0x321   :  { %3311 = vmatprep.subr.bf16.mxu1 %v5801_v20 }
 0x323   :  { %3303 = vmatmul.mubr.bf16.vlgmr.msra.gmra.mrb[8].mxu1 %v6533_v17  ;;  %v5814_v17 = vld [vmem:[#allocation10 + $0x700] ss:$24 sps:$4 sm:$0xff]  }
 0x324   :  { %3312 = vmatpush1.bf16.msra.mxu1 %v5799_v44  ;;  %3343 = vmatprep.mubr.bf16.mxu1 %v6535_v19  ;;  %v5817_v19 = vld [vmem:[#allocation10 + $0x730] ss:$24 sps:$4 sm:$0xff]  }
 0x325   :  { %3313 = vmatprep.subr.bf16.mxu1 %v5804_v61 }
 0x328   :  { %3314 = vmatpush1.bf16.msra.mxu1 %v5802_v26  ;;  %v5912_v26 = vld [vmem:[#allocation13 + $0x170] ss:$12 sps:$4 sm:$0xff]  }
 0x329   :  { %3315 = vmatprep.subr.bf16.mxu1 %v5807_v29 }
 0x32c   :  { %3316 = vmatpush1.bf16.msra.mxu1 %v5805_v62 }
 0x32d   :  { %3317 = vmatprep.subr.bf16.mxu1 %v5810_v30 }
 0x330   :  { %3318 = vmatpush1.bf16.msra.mxu1 %v5808_v32  ;;  %v5909_v32 = vld [vmem:[#allocation13 + $0x180] ss:$12 sps:$4 sm:$0xff]  }
 0x331   :  { %3319 = vmatprep.subr.bf16.mxu1 %v5813_v13 }
 0x334   :  { %3320 = vmatpush1.bf16.msra.mxu1 %v5811_v14  ;;  %v5913_v14 = vld [vmem:[#allocation13 + $0xb0] ss:$12 sps:$4 sm:$0xff]  }
 0x335   :  { %3321 = vmatprep.subr.bf16.mxu1 %v5816_v33  ;;  %v5916_v33 = vld [vmem:[#allocation13 + $0x19c] ss:$12 sps:$4 sm:$0xff]  }
 0x338   :  { %3322 = vmatpush1.bf16.msra.mxu1 %v5814_v17 }
 0x339   :  { %3323 = vmatprep.subr.bf16.mxu1 %v5819_v34  ;;  %v5917_v34 = vld [vmem:[#allocation13 + $0x248] ss:$12 sps:$4 sm:$0xff]  }
 0x33c   :  { %3324 = vmatpush1.bf16.msra.mxu1 %v5817_v19  ;;  %v5914_v19 = vld [vmem:[#allocation13 + $0x198] ss:$12 sps:$4 sm:$0xff]  }
 0x33d   :  { %3325 = vmatprep.subr.bf16.mxu1 %v5825_v37  ;;  %v5918_v37 = vld [vmem:[#allocation13 + $0x188] ss:$12 sps:$4 sm:$0xff]  }
 0x340   :  { %3326 = vmatpush1.bf16.msra.mxu1 %v5823_v22  ;;  %v5921_v22 = vld [vmem:[#allocation13 + $0x1b4] ss:$12 sps:$4 sm:$0xff]  }
 0x341   :  { %3327 = vmatprep.subr.bf16.mxu1 %v5831_v39  ;;  %v5922_v39 = vld [vmem:[#allocation13 + $0x260] ss:$12 sps:$4 sm:$0xff]  }
 0x344   :  { %3328 = vmatpush1.bf16.msra.mxu1 %v5829_v1  ;;  %v5919_v1 = vld [vmem:[#allocation13 + $0x1b0] ss:$12 sps:$4 sm:$0xff]  }
 0x345   :  { %3329 = vmatprep.subr.bf16.mxu1 %v5837_v40  ;;  %v5923_v40 = vld [vmem:[#allocation13 + $0x1a0] ss:$12 sps:$4 sm:$0xff]  }
 0x348   :  { %3330 = vmatpush1.bf16.msra.mxu1 %v5835_v41  ;;  %v5926_v41 = vld [vmem:[#allocation13 + $0x1cc] ss:$12 sps:$4 sm:$0xff]  }
 0x349   :  { %3331 = vmatprep.subr.bf16.mxu1 %v5843_v21  ;;  %v5927_v21 = vld [vmem:[#allocation13 + $0x278] ss:$12 sps:$4 sm:$0xff]  }
 0x34c   :  { %3332 = vmatpush1.bf16.msra.mxu1 %v5841_v42  ;;  %v5924_v42 = vld [vmem:[#allocation13 + $0x1c8] ss:$12 sps:$4 sm:$0xff]  }
 0x34d   :  { %3333 = vmatprep.subr.bf16.mxu1 %v5849_v43  ;;  %v5928_v43 = vld [vmem:[#allocation13 + $0x1b8] ss:$12 sps:$4 sm:$0xff]  }
 0x350   :  { %3334 = vmatpush1.bf16.msra.mxu1 %v5847_v35  ;;  %v5931_v35 = vld [vmem:[#allocation13 + $0x1e4] ss:$12 sps:$4 sm:$0xff]  }
 0x351   :  { %3335 = vmatprep.subr.bf16.mxu1 %v5855_v46  ;;  %v5932_v46 = vld [vmem:[#allocation13 + $0x290] ss:$12 sps:$4 sm:$0xff]  }
 0x354   :  { %3336 = vmatpush1.bf16.msra.mxu1 %v5853_v47  ;;  %v5929_v47 = vld [vmem:[#allocation13 + $0x1e0] ss:$12 sps:$4 sm:$0xff]  }
 0x355   :  { %3337 = vmatprep.subr.bf16.mxu1 %v5861_v58  ;;  %v5933_v58 = vld [vmem:[#allocation13 + $0x1d0] ss:$12 sps:$4 sm:$0xff]  }
 0x358   :  { %3338 = vmatpush1.bf16.msra.mxu1 %v5859_v49  ;;  %v5936_v49 = vld [vmem:[#allocation13 + $0x1fc] ss:$12 sps:$4 sm:$0xff]  }
 0x359   :  { %3339 = vmatprep.subr.bf16.mxu1 %v5867_v48  ;;  %v5937_v48 = vld [vmem:[#allocation13 + $0x2a8] ss:$12 sps:$4 sm:$0xff]  }
 0x35c   :  { %3340 = vmatpush1.bf16.msra.mxu1 %v5865_v56  ;;  %v5934_v56 = vld [vmem:[#allocation13 + $0x1f8] ss:$12 sps:$4 sm:$0xff]  }
 0x35d   :  { %3341 = vmatprep.subr.bf16.mxu1 %v5873_v50  ;;  %v5938_v50 = vld [vmem:[#allocation13 + $0x1e8] ss:$12 sps:$4 sm:$0xff]  }
 0x360   :  { %3342 = vmatpush1.bf16.msra.mxu1 %v5871_v57  ;;  %v5941_v57 = vld [vmem:[#allocation13 + $0x214] ss:$12 sps:$4 sm:$0xff]  }
 0x361   :  { %5150 = vmatprep.subr.bf16.mxu1 %v5877_v27  ;;  %v5942_v27 = vld [vmem:[#allocation13 + $0x2c0] ss:$12 sps:$4 sm:$0xff]  }
 0x363   :  { %3344 = vmatmul.mubr.bf16.vlgmr.msra.gmra.mrb[8].mxu1 %v6544_v38  ;;  %v1516_v38 = vrot.slane %v6554_v63, %v6411_v3 }
 0x364   :  { %5151 = vmatpush3.bf16.msra.mxu1 %v5878_v23  ;;  %v5939_v23 = vld [vmem:[#allocation13 + $0x210] ss:$12 sps:$4 sm:$0xff]  }
 0x365   :  { %5152 = vmatprep.subr.bf16.mxu1 %v5882_v25  ;;  %v5943_v25 = vld [vmem:[#allocation13 + $0x200] ss:$12 sps:$4 sm:$0xff]  }
 0x368   :  { %5153 = vmatpush3.bf16.msra.mxu1 %v5883_v28  ;;  %v5946_v28 = vld [vmem:[#allocation13 + $0x22c] ss:$12 sps:$4 sm:$0xff]  }
 0x369   :  { %5154 = vmatprep.subr.bf16.mxu1 %v5887_v45  ;;  %v1524_v45 = vrot.slane %v6554_v63, %v6420_v9 }
 0x36c   :  { %5155 = vmatpush3.bf16.msra.mxu1 %v5888_v51  ;;  %v5947_v51 = vld [vmem:[#allocation13 + $0x2d8] ss:$12 sps:$4 sm:$0xff]  }
 0x36d   :  { %5156 = vmatprep.subr.bf16.mxu1 %v5892_v55  ;;  %v5944_v55 = vld [vmem:[#allocation13 + $0x228] ss:$12 sps:$4 sm:$0xff]  }
 0x370   :  { %5157 = vmatpush3.bf16.msra.mxu1 %v5893_v36  ;;  %v5948_v36 = vld [vmem:[#allocation13 + $0x218] ss:$12 sps:$4 sm:$0xff]  }
 0x371   :  { %5158 = vmatprep.subr.bf16.mxu1 %v5897_v54  ;;  %v5951_v54 = vld [vmem:[#allocation13 + $0x244] ss:$12 sps:$4 sm:$0xff]  }
 0x374   :  { %5159 = vmatpush3.bf16.msra.mxu1 %v5898_v60 }
 0x375   :  { %5160 = vmatprep.subr.bf16.mxu1 %v5902_v0  ;;  %v5952_v0 = vld [vmem:[#allocation13 + $0x2f0] ss:$12 sps:$4 sm:$0xff]  }
 0x376   :  { %v3099_v6 = vpop.f32.mrb[4].mxu1 }
 0x377   :  { %v5216_v7 = vadd.f32 %v3099_v6, %v1516_v38  ;;  %v6562_v8 = vpop.f32.mrb[8].mxu0  ;;  %v3101_v10 = vpop.f32.mrb[5].mxu1  ;;  %v5949_v38 = vld [vmem:[#allocation13 + $0x240] ss:$12 sps:$4 sm:$0xff]  }
 0x378   :  { %v5217_v11 = vadd.f32 %v3101_v10, %v1520_v52  ;;  %v3224_v59 = vpop.f32.mrb[9].mxu0  ;;  %v3103_v12 = vpop.f32.mrb[6].mxu1  ;;  %5161 = vmatpush3.bf16.msra.mxu1 %v5903_v53  ;;  %v5218_v60 = vadd.f32 %v6562_v8, %v1524_v45  ;;  %v5953_v52 = vld [vmem:[#allocation13 + $0x230] ss:$12 sps:$4 sm:$0xff]   ;;  %v5959_v6 = vld [vmem:[#allocation13 + $0x274] ss:$12 sps:$4 sm:$0xff]   ;;  %v1532_v45 = vrot.slane %v6554_v63, %v6430_v24 }
 0x379   :  { %v3352_v18 = vmax.f32 %v5216_v7, 0.0  ;;  %v5219_v20 = vadd.f32 %v3224_v59, %v1528_v4  ;;  %v3226_v44 = vpop.f32.mrb[10].mxu0  ;;  %v3104_v61 = vpop.f32.mrb[7].mxu1  ;;  %5162 = vmatprep.subr.bf16.mxu1 %v5907_v5  ;;  %v5956_v53 = vld [vmem:[#allocation13 + $0x25c] ss:$12 sps:$4 sm:$0xff]  }
 0x37a   :  { %v3353_v29 = vmax.f32 %v5217_v11, 0.0  ;;  %v3227_v16 = vpop.f32.mrb[11].mxu0  ;;  %v3354_v4 = vmax.f32 %v5218_v60, 0.0  ;;  %v5954_v5 = vld [vmem:[#allocation13 + $0x258] ss:$12 sps:$4 sm:$0xff]  }
 0x37b   :  { %v3355_v62 = vmax.f32 %v5219_v20, 0.0  ;;  %v3358_v13 = vpack.c.bf16 %v3352_v18, %v3352_v18  ;;  %v5957_v10 = vld [vmem:[#allocation13 + $0x270] ss:$12 sps:$4 sm:$0xff]   ;;  %v5962_v8 = vld [vmem:[#allocation13 + $0x28c] ss:$12 sps:$4 sm:$0xff]  }
 0x37c   :  { %v3359_v30 = vpack.c.bf16 %v3353_v29, %v3353_v29  ;;  %5163 = vmatpush3.bf16.msra.mxu1 %v5908_v15  ;;  %v3360_v7 = vpack.c.bf16 %v3354_v4, %v3354_v4  ;;  %v5960_v11 = vld [vmem:[#allocation13 + $0x288] ss:$12 sps:$4 sm:$0xff]   ;;  %v5965_v59 = vld [vmem:[#allocation13 + $0x2a4] ss:$12 sps:$4 sm:$0xff]   ;;  %v5963_v12 = vld [vmem:[#allocation13 + $0x2a0] ss:$12 sps:$4 sm:$0xff]  }
 0x37d   :  { %5164 = vmatprep.subr.bf16.mxu1 %v5912_v26  ;;  %v3361_v17 = vpack.c.bf16 %v3355_v62, %v3355_v62  ;;  %v5968_v15 = vld [vmem:[#allocation13 + $0x2bc] ss:$12 sps:$4 sm:$0xff]   ;;  %v5966_v18 = vld [vmem:[#allocation13 + $0x2b8] ss:$12 sps:$4 sm:$0xff]   ;;  %v5971_v20 = vld [vmem:[#allocation13 + $0x2d4] ss:$12 sps:$4 sm:$0xff]  }
 0x37e   :  { %4373 = vmatprep.mubr.bf16.mxu0 %v3359_v30  ;;  %4496 = vmatprep.mubr.bf16.mxu1 %v3359_v30  ;;  %v5969_v44 = vld [vmem:[#allocation13 + $0x2d0] ss:$12 sps:$4 sm:$0xff]   ;;  %v5974_v61 = vld [vmem:[#allocation13 + $0x2ec] ss:$12 sps:$4 sm:$0xff]   ;;  %v5972_v26 = vld [vmem:[#allocation13 + $0x2e8] ss:$12 sps:$4 sm:$0xff]  }
 0x37f   :  { %4374 = vmatmul.mubr.bf16.vlgmr.msra.gmra.mrb[12].mxu0 %v3358_v13  ;;  %v5977_v29 = vld [vmem:[#allocation13 + $0x304] ss:$12 sps:$4 sm:$0xff]   ;;  %v5975_v16 = vld [vmem:[#allocation13 + $0x300] ss:$12 sps:$4 sm:$0xff]   ;;  %v5980_v62 = vld [vmem:[#allocation13 + $0x31c] ss:$12 sps:$4 sm:$0xff]  }
 0x380   :  { %4383 = vmatpush1.bf16.msra.mxu0 %v5909_v32  ;;  %4414 = vmatprep.mubr.bf16.mxu0 %v3361_v17  ;;  %v5978_v30 = vld [vmem:[#allocation13 + $0x318] ss:$12 sps:$4 sm:$0xff]   ;;  %v5983_v32 = vld [vmem:[#allocation13 + $0x334] ss:$12 sps:$4 sm:$0xff]  }
 0x381   :  { %5165 = vmatpush3.bf16.msra.mxu1 %v5913_v14  ;;  %4384 = vmatprep.subr.bf16.mxu0 %v5916_v33  ;;  %v5986_v14 = vld [vmem:[#allocation13 + $0x34c] ss:$12 sps:$4 sm:$0xff]   ;;  %v5984_v33 = vld [vmem:[#allocation13 + $0x348] ss:$12 sps:$4 sm:$0xff]  }
 0x382   :  { %5172 = vmatprep.subr.bf16.mxu1 %v5917_v34  ;;  %v5987_v34 = vld [vmem:[#allocation13 + $0x360] ss:$12 sps:$4 sm:$0xff]  }
 0x383   :  { %v6026_v24 = vld [vmem:[#allocation13 + $0x320] ss:$12 sps:$4 sm:$0xff]  }
 0x384   :  { %4385 = vmatpush1.bf16.msra.mxu0 %v5914_v19  ;;  %4497 = vmatmul.mubr.bf16.vlgmr.msra.gmra.mrb[12].mxu1 %v3358_v13  ;;  %v5981_v13 = vld [vmem:[#allocation13 + $0x330] ss:$12 sps:$4 sm:$0xff]  }
 0x385   :  { %5173 = vmatpush3.bf16.msra.mxu1 %v5918_v37  ;;  %4536 = vmatprep.mubr.bf16.mxu1 %v3361_v17  ;;  %v5989_v17 = vld [vmem:[#allocation13 + $0x364] ss:$12 sps:$4 sm:$0xff]   ;;  %v5992_v19 = vld [vmem:[#allocation13 + $0x37c] ss:$12 sps:$4 sm:$0xff]  }
 0x386   :  { %4386 = vmatprep.subr.bf16.mxu0 %v5921_v22  ;;  %5174 = vmatprep.subr.bf16.mxu1 %v5922_v39  ;;  %v5990_v37 = vld [vmem:[#allocation13 + $0x378] ss:$12 sps:$4 sm:$0xff]   ;;  %v5995_v22 = vld [vmem:[#allocation13 + $0x394] ss:$12 sps:$4 sm:$0xff]   ;;  %v5993_v39 = vld [vmem:[#allocation13 + $0x390] ss:$12 sps:$4 sm:$0xff]  }
 0x388   :  { %4387 = vmatpush1.bf16.msra.mxu0 %v5919_v1  ;;  %v5998_v1 = vld [vmem:[#allocation13 + $0x3ac] ss:$12 sps:$4 sm:$0xff]  }
 0x389   :  { %5175 = vmatpush3.bf16.msra.mxu1 %v5923_v40  ;;  %4388 = vmatprep.subr.bf16.mxu0 %v5926_v41  ;;  %v5996_v40 = vld [vmem:[#allocation13 + $0x3a8] ss:$12 sps:$4 sm:$0xff]   ;;  %v6001_v41 = vld [vmem:[#allocation13 + $0x3c4] ss:$12 sps:$4 sm:$0xff]  }
 0x38a   :  { %5176 = vmatprep.subr.bf16.mxu1 %v5927_v21  ;;  %v5999_v21 = vld [vmem:[#allocation13 + $0x3c0] ss:$12 sps:$4 sm:$0xff]  }
 0x38c   :  { %4389 = vmatpush1.bf16.msra.mxu0 %v5924_v42  ;;  %v6004_v42 = vld [vmem:[#allocation13 + $0x3dc] ss:$12 sps:$4 sm:$0xff]  }
 0x38d   :  { %5177 = vmatpush3.bf16.msra.mxu1 %v5928_v43  ;;  %4390 = vmatprep.subr.bf16.mxu0 %v5931_v35  ;;  %v6002_v43 = vld [vmem:[#allocation13 + $0x3d8] ss:$12 sps:$4 sm:$0xff]   ;;  %v6007_v35 = vld [vmem:[#allocation13 + $0x3f4] ss:$12 sps:$4 sm:$0xff]  }
 0x38e   :  { %5178 = vmatprep.subr.bf16.mxu1 %v5932_v46  ;;  %v6005_v46 = vld [vmem:[#allocation13 + $0x3f0] ss:$12 sps:$4 sm:$0xff]  }
 0x390   :  { %4391 = vmatpush1.bf16.msra.mxu0 %v5929_v47  ;;  %v6010_v47 = vld [vmem:[#allocation13 + $0x40c] ss:$12 sps:$4 sm:$0xff]  }
 0x391   :  { %5179 = vmatpush3.bf16.msra.mxu1 %v5933_v58  ;;  %4392 = vmatprep.subr.bf16.mxu0 %v5936_v49  ;;  %v6008_v58 = vld [vmem:[#allocation13 + $0x408] ss:$12 sps:$4 sm:$0xff]   ;;  %v6013_v49 = vld [vmem:[#allocation13 + $0x424] ss:$12 sps:$4 sm:$0xff]  }
 0x392   :  { %5180 = vmatprep.subr.bf16.mxu1 %v5937_v48  ;;  %v6011_v48 = vld [vmem:[#allocation13 + $0x420] ss:$12 sps:$4 sm:$0xff]  }
 0x394   :  { %4393 = vmatpush1.bf16.msra.mxu0 %v5934_v56  ;;  %v6016_v56 = vld [vmem:[#allocation13 + $0x43c] ss:$12 sps:$4 sm:$0xff]  }
 0x395   :  { %5181 = vmatpush3.bf16.msra.mxu1 %v5938_v50  ;;  %4394 = vmatprep.subr.bf16.mxu0 %v5941_v57  ;;  %v6014_v50 = vld [vmem:[#allocation13 + $0x438] ss:$12 sps:$4 sm:$0xff]   ;;  %v6019_v57 = vld [vmem:[#allocation13 + $0x454] ss:$12 sps:$4 sm:$0xff]  }
 0x396   :  { %5182 = vmatprep.subr.bf16.mxu1 %v5942_v27  ;;  %v6017_v27 = vld [vmem:[#allocation13 + $0x450] ss:$12 sps:$4 sm:$0xff]  }
 0x398   :  { %4395 = vmatpush1.bf16.msra.mxu0 %v5939_v23  ;;  %v6022_v23 = vld [vmem:[#allocation13 + $0x46c] ss:$12 sps:$4 sm:$0xff]  }
 0x399   :  { %5183 = vmatpush3.bf16.msra.mxu1 %v5943_v25  ;;  %4396 = vmatprep.subr.bf16.mxu0 %v5946_v28  ;;  %v6020_v25 = vld [vmem:[#allocation13 + $0x468] ss:$12 sps:$4 sm:$0xff]  }
 0x39a   :  { %5184 = vmatprep.subr.bf16.mxu1 %v5947_v51  ;;  %v6023_v28 = vld [vmem:[#allocation13 + $0x3c8] ss:$12 sps:$4 sm:$0xff]   ;;  %v1536_v51 = vrot.slane %v6554_v63, %v6435_v31  ;;  %v6028_v31 = vld [vmem:[#allocation13 + $0x338] ss:$12 sps:$4 sm:$0xff]   ;;  %v6029_v63 = vld [vmem:[#allocation13 + $0x410] ss:$12 sps:$4 sm:$0xff]  }
 0x39c   :  { %4397 = vmatpush1.bf16.msra.mxu0 %v5944_v55 }
 0x39d   :  { %5185 = vmatpush3.bf16.msra.mxu1 %v5948_v36  ;;  %4398 = vmatprep.subr.bf16.mxu0 %v5951_v54 }
 0x39e   :  { %5186 = vmatprep.subr.bf16.mxu1 %v5952_v0 }
 0x3a0   :  { %4399 = vmatpush1.bf16.msra.mxu0 %v5949_v38 }
 0x3a1   :  { %5187 = vmatpush3.bf16.msra.mxu1 %v5953_v52  ;;  %4400 = vmatprep.subr.bf16.mxu0 %v5956_v53 }
 0x3a4   :  { %4401 = vmatpush1.bf16.msra.mxu0 %v5954_v5  ;;  %4537 = vmatmul.mubr.bf16.vlgmr.msra.gmra.mrb[16].mxu1 %v3360_v7  ;;  %v6024_v5 = vld [vmem:[#allocation13 + $0x308] ss:$12 sps:$4 sm:$0xff]  }
 0x3a5   :  { %4402 = vmatprep.subr.bf16.mxu0 %v5959_v6 }
 0x3a8   :  { %4403 = vmatpush1.bf16.msra.mxu0 %v5957_v10  ;;  %v6027_v10 = vld [vmem:[#allocation13 + $0x3f8] ss:$12 sps:$4 sm:$0xff]  }
 0x3a9   :  { %4404 = vmatprep.subr.bf16.mxu0 %v5962_v8  ;;  %v6030_v8 = vld [vmem:[#allocation13 + $0x350] ss:$12 sps:$4 sm:$0xff]  }
 0x3ac   :  { %4405 = vmatpush1.bf16.msra.mxu0 %v5960_v11  ;;  %v6031_v11 = vld [vmem:[#allocation13 + $0x428] ss:$12 sps:$4 sm:$0xff]  }
 0x3ad   :  { %4406 = vmatprep.subr.bf16.mxu0 %v5965_v59  ;;  %v6032_v59 = vld [vmem:[#allocation13 + $0x368] ss:$12 sps:$4 sm:$0xff]  }
 0x3b0   :  { %4407 = vmatpush1.bf16.msra.mxu0 %v5963_v12  ;;  %v6033_v12 = vld [vmem:[#allocation13 + $0x440] ss:$12 sps:$4 sm:$0xff]  }
 0x3b1   :  { %4408 = vmatprep.subr.bf16.mxu0 %v5968_v15  ;;  %v6034_v15 = vld [vmem:[#allocation13 + $0x380] ss:$12 sps:$4 sm:$0xff]  }
 0x3b4   :  { %4409 = vmatpush1.bf16.msra.mxu0 %v5966_v18  ;;  %v6035_v18 = vld [vmem:[#allocation13 + $0x458] ss:$12 sps:$4 sm:$0xff]  }
 0x3b5   :  { %4410 = vmatprep.subr.bf16.mxu0 %v5971_v20  ;;  %v6036_v20 = vld [vmem:[#allocation13 + $0x398] ss:$12 sps:$4 sm:$0xff]  }
 0x3b8   :  { %4411 = vmatpush1.bf16.msra.mxu0 %v5969_v44  ;;  %v6037_v44 = vld [vmem:[#allocation13 + $0x470] ss:$12 sps:$4 sm:$0xff]  }
 0x3b9   :  { %4412 = vmatprep.subr.bf16.mxu0 %v5974_v61 }
 0x3bc   :  { %4413 = vmatpush1.bf16.msra.mxu0 %v5972_v26 }
 0x3bd   :  { %4423 = vmatprep.subr.bf16.mxu0 %v5977_v29  ;;  %v6038_v29 = vld [vmem:[#allocation13 + $0x3b0] ss:$12 sps:$4 sm:$0xff]  }
 0x3bf   :  { %4415 = vmatmul.mubr.bf16.vlgmr.msra.gmra.mrb[12].mxu0 %v3360_v7  ;;  %v6025_v7 = vld [vmem:[#allocation13 + $0x3e0] ss:$12 sps:$4 sm:$0xff]  }
 0x3c0   :  { %4424 = vmatpush1.bf16.msra.mxu0 %v5975_v16 }
 0x3c1   :  { %4425 = vmatprep.subr.bf16.mxu0 %v5980_v62 }
 0x3c4   :  { %4426 = vmatpush1.bf16.msra.mxu0 %v5978_v30 }
 0x3c5   :  { %4427 = vmatprep.subr.bf16.mxu0 %v5983_v32  ;;  %v3556_v32 = vld [vmem:[#allocation14] sm:$0x7] }
 0x3c8   :  { %4428 = vmatpush1.bf16.msra.mxu0 %v5981_v13  ;;  %v3569_v13 = vrot.slane %v3556_v32, %v6420_v9 }
 0x3c9   :  { %4429 = vmatprep.subr.bf16.mxu0 %v5986_v14 }
 0x3cc   :  { %4430 = vmatpush1.bf16.msra.mxu0 %v5984_v33 }
 0x3cd   :  { %4431 = vmatprep.subr.bf16.mxu0 %v5989_v17 }
 0x3d0   :  { %4432 = vmatpush1.bf16.msra.mxu0 %v5987_v34 }
 0x3d1   :  { %4433 = vmatprep.subr.bf16.mxu0 %v5992_v19 }
 0x3d4   :  { %4434 = vmatpush1.bf16.msra.mxu0 %v5990_v37 }
 0x3d5   :  { %4435 = vmatprep.subr.bf16.mxu0 %v5995_v22 }
 0x3d8   :  { %4436 = vmatpush1.bf16.msra.mxu0 %v5993_v39  ;;  %v3561_v39 = vrot.slane %v3556_v32, %v6411_v3 }
 0x3d9   :  { %4437 = vmatprep.subr.bf16.mxu0 %v5998_v1  ;;  %v3565_v1 = vrot.slane %v3556_v32, %v6408_v2 }
 0x3dc   :  { %4438 = vmatpush1.bf16.msra.mxu0 %v5996_v40 }
 0x3dd   :  { %4439 = vmatprep.subr.bf16.mxu0 %v6001_v41 }
 0x3e0   :  { %4440 = vmatpush1.bf16.msra.mxu0 %v5999_v21 }
 0x3e1   :  { %4441 = vmatprep.subr.bf16.mxu0 %v6004_v42 }
 0x3e4   :  { %4442 = vmatpush1.bf16.msra.mxu0 %v6002_v43 }
 0x3e5   :  { %4443 = vmatprep.subr.bf16.mxu0 %v6007_v35 }
 0x3e8   :  { %4444 = vmatpush1.bf16.msra.mxu0 %v6005_v46 }
 0x3e9   :  { %4445 = vmatprep.subr.bf16.mxu0 %v6010_v47 }
 0x3ec   :  { %4446 = vmatpush1.bf16.msra.mxu0 %v6008_v58 }
 0x3ed   :  { %4447 = vmatprep.subr.bf16.mxu0 %v6013_v49 }
 0x3f0   :  { %4448 = vmatpush1.bf16.msra.mxu0 %v6011_v48 }
 0x3f1   :  { %4449 = vmatprep.subr.bf16.mxu0 %v6016_v56 }
 0x3f4   :  { %4450 = vmatpush1.bf16.msra.mxu0 %v6014_v50 }
 0x3f5   :  { %4451 = vmatprep.subr.bf16.mxu0 %v6019_v57 }
 0x3f8   :  { %4452 = vmatpush1.bf16.msra.mxu0 %v6017_v27 }
 0x3f9   :  { %4453 = vmatprep.subr.bf16.mxu0 %v6022_v23 }
 0x3fc   :  { %4454 = vmatpush1.bf16.msra.mxu0 %v6020_v25 }
 0x3fd   :  { %5194 = vmatprep.subr.bf16.mxu0 %v6023_v28 }
 0x436   :  { %v3345_v55 = vpop.f32.mrb[8].mxu1 }
 0x437   :  { %v5220_v36 = vadd.f32 %v3345_v55, %v1532_v45  ;;  %v3347_v54 = vpop.f32.mrb[9].mxu1 }
 0x438   :  { %v5221_v60 = vadd.f32 %v3347_v54, %v1536_v51  ;;  %v3349_v0 = vpop.f32.mrb[10].mxu1 }
 0x439   :  { %v3356_v38 = vmax.f32 %v5220_v36, 0.0  ;;  %v3350_v52 = vpop.f32.mrb[11].mxu1 }
 0x43a   :  { %v3357_v53 = vmax.f32 %v5221_v60, 0.0 }
 0x43b   :  { %v3362_v6 = vpack.c.bf16 %v3356_v38, %v3356_v38 }
 0x43c   :  { %v3363_v4 = vpack.c.bf16 %v3357_v53, %v3357_v53 }
 0x43e   :  { %4455 = vmatprep.mubr.bf16.mxu0 %v3363_v4 }
 0x43f   :  { %4456 = vmatmul.mubr.bf16.vlgmr.msra.gmra.mrb[12].mxu0 %v3362_v6 }
 0x440   :  { %5195 = vmatpush3.bf16.msra.mxu0 %v6024_v5  ;;  %4576 = vmatprep.mubr.bf16.mxu0 %v3363_v4 }
 0x441   :  { %5196 = vmatprep.subr.bf16.mxu0 %v6025_v7 }
 0x444   :  { %5197 = vmatpush3.bf16.msra.mxu0 %v6026_v24 }
 0x445   :  { %5198 = vmatprep.subr.bf16.mxu0 %v6027_v10 }
 0x448   :  { %5199 = vmatpush3.bf16.msra.mxu0 %v6028_v31 }
 0x449   :  { %5200 = vmatprep.subr.bf16.mxu0 %v6029_v63 }
 0x44c   :  { %5201 = vmatpush3.bf16.msra.mxu0 %v6030_v8 }
 0x44d   :  { %5202 = vmatprep.subr.bf16.mxu0 %v6031_v11 }
 0x450   :  { %5203 = vmatpush3.bf16.msra.mxu0 %v6032_v59 }
 0x451   :  { %5204 = vmatprep.subr.bf16.mxu0 %v6033_v12 }
 0x454   :  { %5205 = vmatpush3.bf16.msra.mxu0 %v6034_v15 }
 0x455   :  { %5206 = vmatprep.subr.bf16.mxu0 %v6035_v18 }
 0x457   :  { %v5166_v61 = vpop.f32.mrb[12].mxu1 }
 0x458   :  { %v5167_v26 = vpop.f32.mrb[13].mxu1  ;;  %5207 = vmatpush3.bf16.msra.mxu0 %v6036_v20 }
 0x459   :  { %v5168_v16 = vadd.f32 %v5167_v26, %v5166_v61  ;;  %v5169_v62 = vpop.f32.mrb[14].mxu1  ;;  %5208 = vmatprep.subr.bf16.mxu0 %v6037_v44 }
 0x45a   :  { %v5170_v30 = vpop.f32.mrb[15].mxu1 }
 0x45b   :  { %v4499_v17 = vadd.f32 %v5168_v16, %v3569_v13 }
 0x45c   :  { %5209 = vmatpush3.bf16.msra.mxu0 %v6038_v29 }
 0x45f   :  { %4577 = vmatmul.mubr.bf16.vlgmr.msra.gmra.mrb[16].mxu0 %v3362_v6 }
 0x477   :  { %v5188_v14 = vpop.f32.mrb[16].mxu1 }
 0x478   :  { %v5189_v33 = vpop.f32.mrb[17].mxu1 }
 0x479   :  { %v5190_v34 = vadd.f32 %v5189_v33, %v5188_v14  ;;  %v5191_v19 = vpop.f32.mrb[18].mxu1 }
 0x47a   :  { %v5192_v37 = vpop.f32.mrb[19].mxu1 }
 0x47b   :  { %v4539_v22 = vadd.f32 %v5190_v34, %v4499_v17 }
 0x512   :  { %v4457_v40 = vpop.f32.mrb[12].mxu0 }
 0x513   :  { %v5222_v41 = vadd.f32 %v4457_v40, %v3561_v39  ;;  %v4459_v21 = vpop.f32.mrb[13].mxu0 }
 0x514   :  { %v5223_v42 = vadd.f32 %v4459_v21, %v3565_v1  ;;  %v4461_v43 = vpop.f32.mrb[14].mxu0 }
 0x515   :  { %v4462_v35 = vpop.f32.mrb[15].mxu0 }
 0x516   :  { %v5148_v46 = vpack.c.bf16 %v5223_v42, %v5222_v41 }
 0x518   :  { %4597 = vst [vmem:[#allocation16] sm:$0xff] %v5148_v46 }
 0x532   :  { %v5210_v9 = vpop.f32.mrb[16].mxu0 }
 0x533   :  { %v5211_v47 = vpop.f32.mrb[17].mxu0 }
 0x534   :  { %v5212_v58 = vadd.f32 %v5211_v47, %v5210_v9  ;;  %v5213_v49 = vpop.f32.mrb[18].mxu0 }
 0x535   :  { %v5214_v48 = vpop.f32.mrb[19].mxu0 }
 0x536   :  { %v4579_v56 = vadd.f32 %v5212_v58, %v4539_v22 }
 0x538   :  { %v5149_v50 = vpack.c.bf16 %v4579_v56, %v4579_v56 }
 0x53a   :  { %4598 = vst [vmem:[#allocation16 + $0x8] sm:$0xf] %v5149_v50 }
 0x53b   :  { %6226 = shalt.err (!%p6223_p12)
}
 0x53c   :  { %s6227_s28 = scalar_lea.hbm %s6594_s8, 192 }
 0x53d   :  { %p6228_p13 = scmp.ne.s32.totalorder %s6594_s8, %s6227_s28  ;;  %p6231_p0 = scmp.lt.u32.totalorder %s6227_s28, %s6594_s8 }
 0x53f   :  { %p6233_p1 = pnand %p6231_p0, %p6228_p13 }
 0x541   :  { %6236 = shalt.err (!%p6233_p1)
}
 0x542   :  { %4608 = dma.vmem_to_hbm [thread:$0]  %s4606_s5, 192, %s6594_s8, [#allocation4]  }
 0x543   :  { %6247 = dma.done.wait [#allocation4], 192  }
 0x544   :  { %6248 = vsyncadd [#allocation4], 4294967104 }
 0x545   :  { %4612 = vsyncpa [#allocation3], 1 }
 0x546   :  { %4613 = vsyncpa [#allocation6], 1 }
 0x547   :  { %4614 = vsyncpa [#allocation9], 1 }
 0x548   :  { %4615 = vsyncpa [#allocation12], 1 }
 0x549   :  { %4616 = vsyncpa [#allocation15], 1 }
 0x54a   :  { %4617 = vsyncpa [#allocation4], 1 }

// kernel: tpu_custom_call.1
= control target key start
LH: loop header
LB: loop body
LE: loop exit
PB: predicated region body
PF: predicated region fallthrough
CT: control target
= control target key end

     0   :  { %13 = vsyncpa [#allocation3], 0  ;;  %s6586_s0 = inlined_call_operand.hbm [shape: f32[8,16], index: 0, kind: input, shape index: {}]   ;;  %s6587_s1 = inlined_call_operand.hbm [shape: bf16[8,16,256], index: 1, kind: input, shape index: {}]   ;;  %s6588_s2 = inlined_call_operand.hbm [shape: bf16[256,768], index: 2, kind: input, shape index: {}]   ;;  %s6589_s3 = inlined_call_operand.hbm [shape: f32[1,768], index: 3, kind: input, shape index: {}]   ;;  %s6590_s4 = inlined_call_operand.hbm [shape: bf16[768,768], index: 4, kind: input, shape index: {}]   ;;  %s6591_s5 = inlined_call_operand.hbm [shape: f32[1,768], index: 5, kind: input, shape index: {}]   ;;  %s6592_s6 = inlined_call_operand.hbm [shape: bf16[768,384], index: 6, kind: input, shape index: {}]   ;;  %s6593_s7 = inlined_call_operand.hbm [shape: f32[1,384], index: 7, kind: input, shape index: {}]   ;;  %s6594_s8 = inlined_call_operand.hbm [shape: bf16[8,384], index: 8, kind: output, shape index: {}]  }
   0x1   :  { %14 = vsyncpa [#allocation6], 0 }
   0x2   :  { %15 = vsyncpa [#allocation9], 0 }
   0x3   :  { %16 = vsyncpa [#allocation12], 0 }
   0x4   :  { %17 = vsyncpa [#allocation15], 0 }
   0x5   :  { %18 = vsyncpa [#allocation4], 0  ;;  %s6249_s27 = smov [#allocation5]   ;;  %s6039_s9 = scalar_lea.hbm %s6587_s1, 2048 }
   0x6   :  { %s34_s28 = sshll.u32 %s6249_s27, 4  ;;  %p6040_p0 = scmp.ne.s32.totalorder %s6587_s1, %s6039_s9  ;;  %s35_s28 = int_to_ptr.vmem [resolvable:$true] %s34_s28 }
   0x7   :  { %p6043_p1 = scmp.lt.u32.totalorder %s6039_s9, %s6587_s1 }
   0x9   :  { %p6045_p2 = pnand %p6043_p1, %p6040_p0 }
   0xb   :  { %6048 = shalt.err (!%p6045_p2)
}
   0xc   :  { %s6049_s14 = scalar_lea.vmem %s35_s28, 2048  ;;  %p6054_p4 = scmp.lt.s32.totalorder %s35_s28, %s35_s28 }
   0xd   :  { %p6050_p3 = scmp.ne.s32.totalorder %s35_s28, %s6049_s14  ;;  %p6055_p5 = scmp.lt.s32.totalorder %s6049_s14, %s6049_s14 }
   0xf   :  { %p6056_p6 = por %p6055_p5, %p6054_p4 }
  0x11   :  { %p6057_p7 = pnand %p6056_p6, %p6050_p3 }
  0x13   :  { %6060 = shalt.err (!%p6057_p7)
}
  0x14   :  { %s6250_s15 = smov 128   ;;  %s6251_s16 = smov 8  }
  0x15   :  { %40 = dma.hbm_to_vmem [thread:$0]  %s6587_s1, 2048, %s35_s28, [#allocation6], %s6250_s15, %s6250_s15, %s6251_s16  }
  0x16   :  { %s6252_s19 = smov [#allocation8]   ;;  %s6253_s21 = smov [#allocation11]  }
  0x17   :  { %s59_s20 = sshll.u32 %s6252_s19, 4  ;;  %s81_s22 = sshll.u32 %s6253_s21, 4  ;;  %s60_s20 = int_to_ptr.vmem [resolvable:$true] %s59_s20  ;;  %s82_s22 = int_to_ptr.vmem [resolvable:$true] %s81_s22 }
  0x18   :  { %s6061_s25 = scalar_lea.hbm %s6589_s3, 96 }
  0x19   :  { %p6062_p8 = scmp.ne.s32.totalorder %s6589_s3, %s6061_s25  ;;  %p6065_p9 = scmp.lt.u32.totalorder %s6061_s25, %s6589_s3 }
  0x1b   :  { %p6067_p10 = pnand %p6065_p9, %p6062_p8 }
  0x1d   :  { %6070 = shalt.err (!%p6067_p10)
}
  0x1e   :  { %s6071_s1 = scalar_lea.vmem %s60_s20, 96  ;;  %p6076_p12 = scmp.lt.s32.totalorder %s60_s20, %s60_s20 }
  0x1f   :  { %p6072_p11 = scmp.ne.s32.totalorder %s60_s20, %s6071_s1  ;;  %p6077_p13 = scmp.lt.s32.totalorder %s6071_s1, %s6071_s1 }
  0x21   :  { %p6078_p0 = por %p6077_p13, %p6076_p12 }
  0x23   :  { %p6079_p1 = pnand %p6078_p0, %p6072_p11 }
  0x25   :  { %6082 = shalt.err (!%p6079_p1)
}
  0x26   :  { %62 = dma.hbm_to_vmem [thread:$0]  %s6589_s3, 96, %s60_s20, [#allocation9]  }
  0x27   :  { %s6083_s12 = scalar_lea.hbm %s6591_s5, 96 }
  0x28   :  { %p6084_p2 = scmp.ne.s32.totalorder %s6591_s5, %s6083_s12  ;;  %p6087_p3 = scmp.lt.u32.totalorder %s6083_s12, %s6591_s5 }
  0x2a   :  { %p6089_p4 = pnand %p6087_p3, %p6084_p2 }
  0x2c   :  { %6092 = shalt.err (!%p6089_p4)
}
  0x2d   :  { %s6093_s17 = scalar_lea.vmem %s82_s22, 96  ;;  %p6098_p6 = scmp.lt.s32.totalorder %s82_s22, %s82_s22 }
  0x2e   :  { %p6094_p5 = scmp.ne.s32.totalorder %s82_s22, %s6093_s17  ;;  %p6099_p7 = scmp.lt.s32.totalorder %s6093_s17, %s6093_s17 }
  0x30   :  { %p6100_p8 = por %p6099_p7, %p6098_p6 }
  0x32   :  { %p6101_p9 = pnand %p6100_p8, %p6094_p5 }
  0x34   :  { %6104 = shalt.err (!%p6101_p9)
}
  0x35   :  { %84 = dma.hbm_to_vmem [thread:$0]  %s6591_s5, 96, %s82_s22, [#allocation12]  }
  0x36   :  { %s6254_s19 = smov [#allocation2]   ;;  %s6255_s21 = smov [#allocation7]  }
  0x37   :  { %s25_s20 = sshll.u32 %s6254_s19, 4  ;;  %s46_s23 = sshll.u32 %s6255_s21, 4  ;;  %s26_s20 = int_to_ptr.vmem [resolvable:$true] %s25_s20  ;;  %s47_s23 = int_to_ptr.vmem [resolvable:$true] %s46_s23 }
  0x38   :  { %s6105_s26 = scalar_lea.hbm %s6586_s0, 128 }
  0x39   :  { %p6106_p10 = scmp.ne.s32.totalorder %s6586_s0, %s6105_s26  ;;  %p6109_p11 = scmp.lt.u32.totalorder %s6105_s26, %s6586_s0 }
  0x3b   :  { %p6111_p12 = pnand %p6109_p11, %p6106_p10 }
  0x3d   :  { %6114 = shalt.err (!%p6111_p12)
}
  0x3e   :  { %s6115_s5 = scalar_lea.vmem %s26_s20, 128  ;;  %p6120_p0 = scmp.lt.s32.totalorder %s26_s20, %s26_s20 }
  0x3f   :  { %p6116_p13 = scmp.ne.s32.totalorder %s26_s20, %s6115_s5  ;;  %p6121_p1 = scmp.lt.s32.totalorder %s6115_s5, %s6115_s5 }
  0x41   :  { %p6122_p2 = por %p6121_p1, %p6120_p0 }
  0x43   :  { %p6123_p3 = pnand %p6122_p2, %p6116_p13 }
  0x45   :  { %6126 = shalt.err (!%p6123_p3)
}
  0x46   :  { %28 = dma.hbm_to_vmem [thread:$0]  %s6586_s0, 128, %s26_s20, [#allocation3]  }
  0x47   :  { %s6127_s11 = scalar_lea.hbm %s6588_s2, 12288 }
  0x48   :  { %p6128_p4 = scmp.ne.s32.totalorder %s6588_s2, %s6127_s11  ;;  %p6131_p5 = scmp.lt.u32.totalorder %s6127_s11, %s6588_s2 }
  0x4a   :  { %p6133_p6 = pnand %p6131_p5, %p6128_p4 }
  0x4c   :  { %6136 = shalt.err (!%p6133_p6)
}
  0x4d   :  { %s6137_s16 = scalar_lea.vmem %s47_s23, 12288  ;;  %p6142_p8 = scmp.lt.s32.totalorder %s47_s23, %s47_s23 }
  0x4e   :  { %p6138_p7 = scmp.ne.s32.totalorder %s47_s23, %s6137_s16  ;;  %p6143_p9 = scmp.lt.s32.totalorder %s6137_s16, %s6137_s16 }
  0x50   :  { %p6144_p10 = por %p6143_p9, %p6142_p8 }
  0x52   :  { %p6145_p11 = pnand %p6144_p10, %p6138_p7 }
  0x54   :  { %6148 = shalt.err (!%p6145_p11)
}
  0x55   :  { %s6256_s0 = smov 384   ;;  %s6257_s17 = smov 24  }
  0x56   :  { %52 = dma.hbm_to_vmem [thread:$0]  %s6588_s2, 12288, %s47_s23, [#allocation6], %s6256_s0, %s6256_s0, %s6257_s17  }
  0x57   :  { %s6258_s19 = smov [#allocation10]   ;;  %s6259_s21 = smov [#allocation13]  }
  0x58   :  { %s68_s20 = sshll.u32 %s6258_s19, 4  ;;  %s90_s24 = sshll.u32 %s6259_s21, 4  ;;  %s69_s20 = int_to_ptr.vmem [resolvable:$true] %s68_s20  ;;  %s91_s24 = int_to_ptr.vmem [resolvable:$true] %s90_s24 }
  0x59   :  { %s6149_s27 = scalar_lea.hbm %s6590_s4, 36864 }
  0x5a   :  { %p6150_p12 = scmp.ne.s32.totalorder %s6590_s4, %s6149_s27  ;;  %p6153_p13 = scmp.lt.u32.totalorder %s6149_s27, %s6590_s4 }
  0x5c   :  { %p6155_p0 = pnand %p6153_p13, %p6150_p12 }
  0x5e   :  { %6158 = shalt.err (!%p6155_p0)
}
  0x5f   :  { %s6159_s2 = scalar_lea.vmem %s69_s20, 36864  ;;  %p6164_p2 = scmp.lt.s32.totalorder %s69_s20, %s69_s20 }
  0x60   :  { %p6160_p1 = scmp.ne.s32.totalorder %s69_s20, %s6159_s2  ;;  %p6165_p3 = scmp.lt.s32.totalorder %s6159_s2, %s6159_s2 }
  0x62   :  { %p6166_p4 = por %p6165_p3, %p6164_p2 }
  0x64   :  { %p6167_p5 = pnand %p6166_p4, %p6160_p1 }
  0x66   :  { %6170 = shalt.err (!%p6167_p5)
}
  0x67   :  { %74 = dma.hbm_to_vmem [thread:$0]  %s6590_s4, 36864, %s69_s20, [#allocation9], %s6256_s0, %s6256_s0, %s6257_s17  }
  0x68   :  { %s6171_s10 = scalar_lea.hbm %s6592_s6, 18432 }
  0x69   :  { %p6172_p6 = scmp.ne.s32.totalorder %s6592_s6, %s6171_s10  ;;  %p6175_p7 = scmp.lt.u32.totalorder %s6171_s10, %s6592_s6 }
  0x6b   :  { %p6177_p8 = pnand %p6175_p7, %p6172_p6 }
  0x6d   :  { %6180 = shalt.err (!%p6177_p8)
}
  0x6e   :  { %s6181_s15 = scalar_lea.vmem %s91_s24, 18432  ;;  %p6186_p10 = scmp.lt.s32.totalorder %s91_s24, %s91_s24 }
  0x6f   :  { %p6182_p9 = scmp.ne.s32.totalorder %s91_s24, %s6181_s15  ;;  %p6187_p11 = scmp.lt.s32.totalorder %s6181_s15, %s6181_s15 }
  0x71   :  { %p6188_p12 = por %p6187_p11, %p6186_p10 }
  0x73   :  { %p6189_p13 = pnand %p6188_p12, %p6182_p9 }
  0x75   :  { %6192 = shalt.err (!%p6189_p13)
}
  0x76   :  { %s6260_s4 = smov 192   ;;  %s6261_s16 = smov 12  }
  0x77   :  { %96 = dma.hbm_to_vmem [thread:$0]  %s6592_s6, 18432, %s91_s24, [#allocation12], %s6260_s4, %s6260_s4, %s6261_s16  }
  0x78   :  { %s6262_s3 = smov [#allocation14]   ;;  %s6193_s21 = scalar_lea.hbm %s6593_s7, 48 }
  0x79   :  { %s103_s18 = sshll.u32 %s6262_s3, 4  ;;  %p6194_p0 = scmp.ne.s32.totalorder %s6593_s7, %s6193_s21  ;;  %s104_s18 = int_to_ptr.vmem [resolvable:$true] %s103_s18 }
  0x7a   :  { %p6197_p1 = scmp.lt.u32.totalorder %s6193_s21, %s6593_s7 }
  0x7c   :  { %p6199_p2 = pnand %p6197_p1, %p6194_p0 }
  0x7e   :  { %6202 = shalt.err (!%p6199_p2)
}
  0x7f   :  { %s6203_s30 = scalar_lea.vmem %s104_s18, 48  ;;  %s6207_s6 = scalar_lea.vmem %s104_s18, 64 }
  0x80   :  { %p6204_p3 = scmp.ne.s32.totalorder %s104_s18, %s6203_s30  ;;  %p6208_p4 = scmp.lt.s32.totalorder %s104_s18, %s104_s18 }
  0x81   :  { %p6209_p5 = scmp.lt.s32.totalorder %s6207_s6, %s6203_s30 }
  0x83   :  { %p6210_p6 = por %p6209_p5, %p6208_p4 }
  0x85   :  { %p6211_p7 = pnand %p6210_p6, %p6204_p3 }
  0x87   :  { %6214 = shalt.err (!%p6211_p7)
}
  0x88   :  { %106 = dma.hbm_to_vmem [thread:$0]  %s6593_s7, 48, %s104_s18, [#allocation15]  }
  0x89   :  { %6237 = dma.done.wait [#allocation3], 128  }
  0x8a   :  { %6238 = vsyncadd [#allocation3], 4294967168 }
  0x8b   :  { %6239 = dma.done.wait [#allocation6], 14336  }
  0x8c   :  { %6240 = vsyncadd [#allocation6], 4294952960 }
  0x8d   :  { %6241 = dma.done.wait [#allocation9], 36960  }
  0x8e   :  { %6242 = vsyncadd [#allocation9], 4294930336 }
  0x8f   :  { %6243 = dma.done.wait [#allocation12], 18528  }
  0x90   :  { %6244 = vsyncadd [#allocation12], 4294948768 }
  0x91   :  { %6245 = dma.done.wait [#allocation15], 48  }
  0x92   :  { %6246 = vsyncadd [#allocation15], 4294967248  ;;  %v149_v0 = vlaneseq  ;;  %v6413_v4 = vld [vmem:[#allocation2] sm:$0xff]  ;;  %v5274_v10 = vld [vmem:[#allocation7 + $0xc] ss:$24 sps:$4 sm:$0xff]   ;;  %vm589_vm0 = vcmask 1041409  }
  0x93   :  { %v5271_v7 = vld [vmem:[#allocation7 + $0x4] ss:$24 sps:$4 sm:$0xff]   ;;  %v5273_v8 = vld [vmem:[#allocation7] ss:$24 sps:$4 sm:$0xff]   ;;  %v5277_v12 = vld [vmem:[#allocation7 + $0x34] ss:$24 sps:$4 sm:$0xff]   ;;  %1135 = vmatprep.subr.bf16.mxu1 %v5274_v10 }
  0x94   :  { %v6405_v1 = vshrl.u32 %v149_v0, 7  ;;  %v5276_v11 = vld [vmem:[#allocation7 + $0x8] ss:$24 sps:$4 sm:$0xff]   ;;  %1094 = vmatprep.subr.bf16.mxu0 %v5271_v7  ;;  %v5280_v14 = vld [vmem:[#allocation7 + $0x3c] ss:$24 sps:$4 sm:$0xff]   ;;  %vm591_vm1 = vcmask 1042434  }
  0x95   :  { %v5279_v13 = vld [vmem:[#allocation7 + $0x30] ss:$24 sps:$4 sm:$0xff]   ;;  %1095 = vmatpush1.bf16.msra.mxu0 %v5273_v8  ;;  %1136 = vmatpush1.bf16.msra.mxu1 %v5276_v11  ;;  %v5283_v17 = vld [vmem:[#allocation7 + $0x64] ss:$24 sps:$4 sm:$0xff]   ;;  %v5285_v20 = vld [vmem:[#allocation7 + $0x60] ss:$24 sps:$4 sm:$0xff]  }
  0x96   :  { %v6408_v2 = vsub.s32 1, %v6405_v1  ;;  %v6411_v3 = vsub.s32 0, %v6405_v1  ;;  %v6420_v9 = vsub.s32 2, %v6405_v1  ;;  %v5282_v15 = vld [vmem:[#allocation7 + $0x38] ss:$24 sps:$4 sm:$0xff]   ;;  %v6423_v16 = vsub.s32 3, %v6405_v1  ;;  %1096 = vmatprep.subr.bf16.mxu0 %v5277_v12  ;;  %1137 = vmatprep.subr.bf16.mxu1 %v5280_v14 }
  0x97   :  { %v5286_v19 = vld [vmem:[#allocation7 + $0x6c] ss:$24 sps:$4 sm:$0xff]   ;;  %v5288_v21 = vld [vmem:[#allocation7 + $0x68] ss:$24 sps:$4 sm:$0xff]   ;;  %v6430_v24 = vsub.s32 4, %v6405_v1  ;;  %v6435_v31 = vsub.s32 5, %v6405_v1 }
  0x98   :  { %v163_v5 = vrot.slane %v6413_v4, %v6408_v2  ;;  %v152_v6 = vrot.slane %v6413_v4, %v6411_v3  ;;  %v174_v18 = vrot.slane %v6413_v4, %v6420_v9  ;;  %v5289_v22 = vld [vmem:[#allocation7 + $0x94] ss:$24 sps:$4 sm:$0xff]   ;;  %v185_v23 = vrot.slane %v6413_v4, %v6423_v16  ;;  %v5291_v26 = vld [vmem:[#allocation7 + $0x90] ss:$24 sps:$4 sm:$0xff]   ;;  %v5295_v28 = vld [vmem:[#allocation7 + $0xc4] ss:$24 sps:$4 sm:$0xff]  }
  0x99   :  { %1097 = vmatpush1.bf16.msra.mxu0 %v5279_v13  ;;  %1138 = vmatpush1.bf16.msra.mxu1 %v5282_v15  ;;  %v5292_v25 = vld [vmem:[#allocation7 + $0x9c] ss:$24 sps:$4 sm:$0xff]   ;;  %v5294_v27 = vld [vmem:[#allocation7 + $0x98] ss:$24 sps:$4 sm:$0xff]   ;;  %v5298_v29 = vld [vmem:[#allocation7 + $0xcc] ss:$24 sps:$4 sm:$0xff]   ;;  %v196_v30 = vrot.slane %v6413_v4, %v6430_v24  ;;  %v207_v36 = vrot.slane %v6413_v4, %v6435_v31 }
  0x9a   :  { %165 = vbcast.lane.b32.xlu1 %v163_v5, 256  ;;  %154 = vbcast.lane.b32.xlu0 %v152_v6, 256  ;;  %v5297_v32 = vld [vmem:[#allocation7 + $0xc0] ss:$24 sps:$4 sm:$0xff]   ;;  %v5301_v34 = vld [vmem:[#allocation7 + $0xf4] ss:$24 sps:$4 sm:$0xff]  }
  0x9b   :  { %1098 = vmatprep.subr.bf16.mxu0 %v5283_v17  ;;  %1139 = vmatprep.subr.bf16.mxu1 %v5286_v19  ;;  %v5300_v33 = vld [vmem:[#allocation7 + $0xc8] ss:$24 sps:$4 sm:$0xff]   ;;  %v5304_v35 = vld [vmem:[#allocation7 + $0xfc] ss:$24 sps:$4 sm:$0xff]   ;;  %v217_v37 = vsub.s32 6, %v6405_v1  ;;  %v228_v43 = vsub.s32 7, %v6405_v1 }
  0x9c   :  { %v5303_v38 = vld [vmem:[#allocation7 + $0xf0] ss:$24 sps:$4 sm:$0xff]   ;;  %v5307_v40 = vld [vmem:[#allocation7 + $0x124] ss:$24 sps:$4 sm:$0xff]   ;;  %v5309_v44 = vld [vmem:[#allocation7 + $0x120] ss:$24 sps:$4 sm:$0xff]  }
  0x9d   :  { %1099 = vmatpush1.bf16.msra.mxu0 %v5285_v20  ;;  %1140 = vmatpush1.bf16.msra.mxu1 %v5288_v21  ;;  %v5306_v39 = vld [vmem:[#allocation7 + $0xf8] ss:$24 sps:$4 sm:$0xff]   ;;  %v5310_v41 = vld [vmem:[#allocation7 + $0x12c] ss:$24 sps:$4 sm:$0xff]   ;;  %v218_v42 = vrot.slane %v6413_v4, %v217_v37  ;;  %v5312_v45 = vld [vmem:[#allocation7 + $0x128] ss:$24 sps:$4 sm:$0xff]   ;;  %v229_v48 = vrot.slane %v6413_v4, %v228_v43 }
  0x9e   :  { %169 = vbcast.lane.b32.xlu1 %v163_v5, 264  ;;  %158 = vbcast.lane.b32.xlu0 %v152_v6, 264  ;;  %v5313_v46 = vld [vmem:[#allocation7 + $0x154] ss:$24 sps:$4 sm:$0xff]   ;;  %v5315_v49 = vld [vmem:[#allocation7 + $0x150] ss:$24 sps:$4 sm:$0xff]  }
  0x9f   :  { %1100 = vmatprep.subr.bf16.mxu0 %v5289_v22  ;;  %1141 = vmatprep.subr.bf16.mxu1 %v5292_v25  ;;  %v5316_v47 = vld [vmem:[#allocation7 + $0x15c] ss:$24 sps:$4 sm:$0xff]   ;;  %v5318_v50 = vld [vmem:[#allocation7 + $0x158] ss:$24 sps:$4 sm:$0xff]   ;;  %v5322_v52 = vld [vmem:[#allocation7 + $0x18c] ss:$24 sps:$4 sm:$0xff]  }
  0xa0   :  { %v5319_v51 = vld [vmem:[#allocation7 + $0x184] ss:$24 sps:$4 sm:$0xff]   ;;  %v5321_v53 = vld [vmem:[#allocation7 + $0x180] ss:$24 sps:$4 sm:$0xff]   ;;  %v5325_v55 = vld [vmem:[#allocation7 + $0x1b4] ss:$24 sps:$4 sm:$0xff]  }
  0xa1   :  { %1101 = vmatpush1.bf16.msra.mxu0 %v5291_v26  ;;  %1142 = vmatpush1.bf16.msra.mxu1 %v5294_v27  ;;  %v5324_v54 = vld [vmem:[#allocation7 + $0x188] ss:$24 sps:$4 sm:$0xff]   ;;  %v5328_v56 = vld [vmem:[#allocation7 + $0x1bc] ss:$24 sps:$4 sm:$0xff]   ;;  %v5330_v58 = vld [vmem:[#allocation7 + $0x1b8] ss:$24 sps:$4 sm:$0xff]  }
  0xa2   :  { %180 = vbcast.lane.b32.xlu1 %v174_v18, 264  ;;  %176 = vbcast.lane.b32.xlu0 %v174_v18, 256  ;;  %v5327_v57 = vld [vmem:[#allocation7 + $0x1b0] ss:$24 sps:$4 sm:$0xff]   ;;  %v5331_v59 = vld [vmem:[#allocation7 + $0x1e4] ss:$24 sps:$4 sm:$0xff]  }
  0xa3   :  { %1102 = vmatprep.subr.bf16.mxu0 %v5295_v28  ;;  %1143 = vmatprep.subr.bf16.mxu1 %v5298_v29  ;;  %v5334_v60 = vld [vmem:[#allocation7 + $0x1ec] ss:$24 sps:$4 sm:$0xff]   ;;  %v5333_v61 = vld [vmem:[#allocation7 + $0x1e0] ss:$24 sps:$4 sm:$0xff]   ;;  %v5340_v0 = vld [vmem:[#allocation7 + $0x21c] ss:$24 sps:$4 sm:$0xff]  }
  0xa4   :  { %v5336_v62 = vld [vmem:[#allocation7 + $0x1e8] ss:$24 sps:$4 sm:$0xff]   ;;  %v5337_v63 = vld [vmem:[#allocation7 + $0x214] ss:$24 sps:$4 sm:$0xff]   ;;  %v5342_v4 = vld [vmem:[#allocation7 + $0x218] ss:$24 sps:$4 sm:$0xff]  }
  0xa5   :  { %1103 = vmatpush1.bf16.msra.mxu0 %v5297_v32  ;;  %1144 = vmatpush1.bf16.msra.mxu1 %v5300_v33  ;;  %v5339_v1 = vld [vmem:[#allocation7 + $0x210] ss:$24 sps:$4 sm:$0xff]   ;;  %v5343_v5 = vld [vmem:[#allocation7 + $0x244] ss:$24 sps:$4 sm:$0xff]   ;;  %v5345_v7 = vld [vmem:[#allocation7 + $0x240] ss:$24 sps:$4 sm:$0xff]  }
  0xa6   :  { %191 = vbcast.lane.b32.xlu1 %v185_v23, 264  ;;  %187 = vbcast.lane.b32.xlu0 %v185_v23, 256  ;;  %v5346_v6 = vld [vmem:[#allocation7 + $0x24c] ss:$24 sps:$4 sm:$0xff]   ;;  %v5348_v8 = vld [vmem:[#allocation7 + $0x248] ss:$24 sps:$4 sm:$0xff]  }
  0xa7   :  { %1104 = vmatprep.subr.bf16.mxu0 %v5301_v34  ;;  %1145 = vmatprep.subr.bf16.mxu1 %v5304_v35  ;;  %v5349_v10 = vld [vmem:[#allocation7 + $0x274] ss:$24 sps:$4 sm:$0xff]   ;;  %v5351_v12 = vld [vmem:[#allocation7 + $0x270] ss:$24 sps:$4 sm:$0xff]   ;;  %v5355_v14 = vld [vmem:[#allocation7 + $0x2a4] ss:$24 sps:$4 sm:$0xff]  }
  0xa8   :  { %v5352_v11 = vld [vmem:[#allocation7 + $0x27c] ss:$24 sps:$4 sm:$0xff]   ;;  %v5354_v13 = vld [vmem:[#allocation7 + $0x278] ss:$24 sps:$4 sm:$0xff]   ;;  %v5358_v15 = vld [vmem:[#allocation7 + $0x2ac] ss:$24 sps:$4 sm:$0xff]  }
  0xa9   :  { %1105 = vmatpush1.bf16.msra.mxu0 %v5303_v38  ;;  %1146 = vmatpush1.bf16.msra.mxu1 %v5306_v39  ;;  %v5357_v17 = vld [vmem:[#allocation7 + $0x2a0] ss:$24 sps:$4 sm:$0xff]   ;;  %v5361_v19 = vld [vmem:[#allocation7 + $0x2d4] ss:$24 sps:$4 sm:$0xff]   ;;  %v5363_v21 = vld [vmem:[#allocation7 + $0x2d0] ss:$24 sps:$4 sm:$0xff]  }
  0xaa   :  { %202 = vbcast.lane.b32.xlu1 %v196_v30, 264  ;;  %198 = vbcast.lane.b32.xlu0 %v196_v30, 256  ;;  %v5360_v18 = vld [vmem:[#allocation7 + $0x2a8] ss:$24 sps:$4 sm:$0xff]   ;;  %v5364_v20 = vld [vmem:[#allocation7 + $0x2dc] ss:$24 sps:$4 sm:$0xff]  }
  0xab   :  { %1106 = vmatprep.subr.bf16.mxu0 %v5307_v40  ;;  %1147 = vmatprep.subr.bf16.mxu1 %v5310_v41  ;;  %v5366_v22 = vld [vmem:[#allocation7 + $0x2d8] ss:$24 sps:$4 sm:$0xff]   ;;  %v5369_v23 = vld [vmem:[#allocation7 + $0x14] ss:$24 sps:$4 sm:$0xff]   ;;  %v133_v26 = vld [vmem:[#allocation5] sm:$0xff]  ;;  %vm593_vm2 = vcmask 1043459  }
  0xac   :  { %v135_v25 = vld [vmem:[#allocation5 + $0x10] sm:$0xff]  ;;  %v136_v27 = vld [vmem:[#allocation5 + $0x18] sm:$0xff]  ;;  %v134_v28 = vld [vmem:[#allocation5 + $0x8] sm:$0xff]  ;;  %v237_v34 = vunpack.c.l.bf16 %v133_v26  ;;  %v238_v35 = vunpack.c.h.bf16 %v133_v26  ;;  %vm595_vm3 = vcmask 1044484   ;;  %vm597_vm4 = vcmask 1045509   ;;  %s6263_s7 = smov [#allocation16]  }
  0xad   :  { %1107 = vmatpush1.bf16.msra.mxu0 %v5309_v44  ;;  %1148 = vmatpush1.bf16.msra.mxu1 %v5312_v45  ;;  %v5417_v29 = vld [vmem:[#allocation10 + $0x4] ss:$24 sps:$4 sm:$0xff]   ;;  %v241_v30 = vunpack.c.l.bf16 %v135_v25  ;;  %v242_v32 = vunpack.c.h.bf16 %v135_v25  ;;  %v243_v37 = vunpack.c.l.bf16 %v136_v27  ;;  %v244_v38 = vunpack.c.h.bf16 %v136_v27  ;;  %v140_v43 = vld [vmem:[#allocation5 + $0x38] sm:$0xff]  ;;  %s4605_s5 = sshll.u32 %s6263_s7, 4  ;;  %s4606_s5 = int_to_ptr.vmem [resolvable:$true] %s4605_s5 }
  0xae   :  { %213 = vbcast.lane.b32.xlu1 %v207_v36, 264  ;;  %209 = vbcast.lane.b32.xlu0 %v207_v36, 256  ;;  %v239_v39 = vunpack.c.l.bf16 %v134_v28  ;;  %v240_v40 = vunpack.c.h.bf16 %v134_v28  ;;  %v138_v41 = vld [vmem:[#allocation5 + $0x28] sm:$0xff]  ;;  %vm599_vm5 = vcmask 1046534   ;;  %vm601_vm6 = vcmask 1047559   ;;  %s6215_s2 = scalar_lea.vmem %s4606_s5, 192  ;;  %p6220_p9 = scmp.lt.s32.totalorder %s4606_s5, %s4606_s5 }
  0xaf   :  { %1108 = vmatprep.subr.bf16.mxu0 %v5313_v46  ;;  %1149 = vmatprep.subr.bf16.mxu1 %v5316_v47  ;;  %p6216_p8 = scmp.ne.s32.totalorder %s4606_s5, %s6215_s2  ;;  %p6221_p10 = scmp.lt.s32.totalorder %s6215_s2, %s6215_s2 }
  0xb1   :  { %1109 = vmatpush1.bf16.msra.mxu0 %v5315_v49  ;;  %1150 = vmatpush1.bf16.msra.mxu1 %v5318_v50  ;;  %v139_v50 = vld [vmem:[#allocation5 + $0x30] sm:$0xff]  ;;  %p6222_p11 = por %p6221_p10, %p6220_p9 }
  0xb2   :  { %224 = vbcast.lane.b32.xlu1 %v218_v42, 264  ;;  %220 = vbcast.lane.b32.xlu0 %v218_v42, 256  ;;  %v137_v42 = vld [vmem:[#allocation5 + $0x20] sm:$0xff] }
  0xb3   :  { %1110 = vmatprep.subr.bf16.mxu0 %v5319_v51  ;;  %1151 = vmatprep.subr.bf16.mxu1 %v5322_v52  ;;  %p6223_p12 = pnand %p6222_p11, %p6216_p8 }
  0xb5   :  { %1111 = vmatpush1.bf16.msra.mxu0 %v5321_v53  ;;  %1152 = vmatpush1.bf16.msra.mxu1 %v5324_v54 }
  0xb6   :  { %235 = vbcast.lane.b32.xlu1 %v229_v48, 264  ;;  %231 = vbcast.lane.b32.xlu0 %v229_v48, 256 }
  0xb7   :  { %1112 = vmatprep.subr.bf16.mxu0 %v5325_v55  ;;  %1153 = vmatprep.subr.bf16.mxu1 %v5328_v56  ;;  %v247_v55 = vunpack.c.l.bf16 %v138_v41  ;;  %v248_v56 = vunpack.c.h.bf16 %v138_v41 }
  0xb9   :  { %1113 = vmatpush1.bf16.msra.mxu0 %v5327_v57  ;;  %1154 = vmatpush1.bf16.msra.mxu1 %v5330_v58  ;;  %v245_v57 = vunpack.c.l.bf16 %v137_v42  ;;  %v246_v58 = vunpack.c.h.bf16 %v137_v42 }
  0xba   :  { %1114 = vmatprep.subr.bf16.mxu0 %v5331_v59  ;;  %1155 = vmatprep.subr.bf16.mxu1 %v5334_v60 }
  0xbd   :  { %1115 = vmatpush1.bf16.msra.mxu0 %v5333_v61  ;;  %1156 = vmatpush1.bf16.msra.mxu1 %v5336_v62 }
  0xbe   :  { %1116 = vmatprep.subr.bf16.mxu0 %v5337_v63  ;;  %1157 = vmatprep.subr.bf16.mxu1 %v5340_v0 }
  0xc1   :  { %1117 = vmatpush1.bf16.msra.mxu0 %v5339_v1  ;;  %1158 = vmatpush1.bf16.msra.mxu1 %v5342_v4  ;;  %v251_v1 = vunpack.c.l.bf16 %v140_v43  ;;  %v252_v4 = vunpack.c.h.bf16 %v140_v43  ;;  %v144_v43 = vld [vmem:[#allocation5 + $0x58] sm:$0xff] }
  0xc2   :  { %1118 = vmatprep.subr.bf16.mxu0 %v5343_v5  ;;  %1159 = vmatprep.subr.bf16.mxu1 %v5346_v6  ;;  %v249_v5 = vunpack.c.l.bf16 %v139_v50  ;;  %v250_v6 = vunpack.c.h.bf16 %v139_v50 }
  0xc5   :  { %1119 = vmatpush1.bf16.msra.mxu0 %v5345_v7  ;;  %1160 = vmatpush1.bf16.msra.mxu1 %v5348_v8  ;;  %v6443_v7 = vld [vmem:[#allocation5 + $0x48] sm:$0xff] }
  0xc6   :  { %1120 = vmatprep.subr.bf16.mxu0 %v5349_v10  ;;  %1161 = vmatprep.subr.bf16.mxu1 %v5352_v11  ;;  %v255_v27 = vunpack.c.l.bf16 %v6443_v7  ;;  %v256_v28 = vunpack.c.h.bf16 %v6443_v7 }
  0xc9   :  { %1121 = vmatpush1.bf16.msra.mxu0 %v5351_v12  ;;  %1162 = vmatpush1.bf16.msra.mxu1 %v5354_v13 }
  0xca   :  { %1122 = vmatprep.subr.bf16.mxu0 %v5355_v14  ;;  %1163 = vmatprep.subr.bf16.mxu1 %v5358_v15 }
  0xcd   :  { %1123 = vmatpush1.bf16.msra.mxu0 %v5357_v17  ;;  %1164 = vmatpush1.bf16.msra.mxu1 %v5360_v18 }
  0xce   :  { %1124 = vmatprep.subr.bf16.mxu0 %v5361_v19  ;;  %1165 = vmatprep.subr.bf16.mxu1 %v5364_v20 }
  0xd1   :  { %1125 = vmatpush1.bf16.msra.mxu0 %v5363_v21  ;;  %1166 = vmatpush1.bf16.msra.mxu1 %v5366_v22 }
  0xd2   :  { %1176 = vmatprep.subr.bf16.mxu0 %v5369_v23  ;;  %2983 = vmatprep.subr.bf16.mxu1 %v5417_v29  ;;  %v6447_v29 = vld [vmem:[#allocation5 + $0x40] sm:$0xff] }
 0x10c   :  { %v166_v33 = vpop.permute.xlu1 %165  ;;  %v155_v36 = vpop.permute.xlu0 %154 }
 0x10d   :  { %v273_v44 = vmul.f32 %v241_v30, %v166_v33  ;;  %v274_v45 = vmul.f32 %v242_v32, %v166_v33  ;;  %v269_v46 = vmul.f32 %v237_v34, %v155_v36  ;;  %v270_v47 = vmul.f32 %v238_v35, %v155_v36 }
 0x110   :  { %v170_v48 = vpop.permute.xlu1 %169  ;;  %v159_v49 = vpop.permute.xlu0 %158 }
 0x111   :  { %v275_v51 = vmul.f32 %v243_v37, %v170_v48  ;;  %v276_v52 = vmul.f32 %v244_v38, %v170_v48  ;;  %v271_v53 = vmul.f32 %v239_v39, %v159_v49  ;;  %v272_v54 = vmul.f32 %v240_v40, %v159_v49  ;;  %v143_v49 = vld [vmem:[#allocation5 + $0x50] sm:$0xff] }
 0x113   :  { %v315_v59 = vadd.f32 %v275_v51, %v273_v44  ;;  %v322_v60 = vadd.f32 %v276_v52, %v274_v45  ;;  %v301_v61 = vadd.f32 %v271_v53, %v269_v46  ;;  %v308_v62 = vadd.f32 %v272_v54, %v270_v47 }
 0x114   :  { %v181_v63 = vpop.permute.xlu1 %180  ;;  %v177_v0 = vpop.permute.xlu0 %176  ;;  %v253_v52 = vunpack.c.l.bf16 %v6447_v29  ;;  %v254_v53 = vunpack.c.h.bf16 %v6447_v29 }
 0x115   :  { %v316_v8 = vrot.slane %v315_v59, 4  ;;  %v323_v10 = vrot.slane %v322_v60, 4  ;;  %v302_v11 = vrot.slane %v301_v61, 4  ;;  %v309_v12 = vrot.slane %v308_v62, 4 }
 0x116   :  { %v279_v13 = vmul.f32 %v247_v55, %v181_v63  ;;  %v280_v14 = vmul.f32 %v248_v56, %v181_v63  ;;  %v277_v15 = vmul.f32 %v245_v57, %v177_v0  ;;  %v278_v17 = vmul.f32 %v246_v58, %v177_v0  ;;  %v6451_v55 = vld [vmem:[#allocation5 + $0x68] sm:$0xff]  ;;  %v6453_v0 = vld [vmem:[#allocation5 + $0x60] sm:$0xff] }
 0x117   :  { %v317_v18 = vadd.f32 %v316_v8, %v315_v59  ;;  %v324_v19 = vadd.f32 %v323_v10, %v322_v60  ;;  %v303_v20 = vadd.f32 %v302_v11, %v301_v61  ;;  %v310_v21 = vadd.f32 %v309_v12, %v308_v62  ;;  %v6457_v8 = vld [vmem:[#allocation5 + $0x70] sm:$0xff] }
 0x118   :  { %v329_v22 = vadd.f32 %v279_v13, %v277_v15  ;;  %v336_v23 = vadd.f32 %v280_v14, %v278_v17  ;;  %v192_v25 = vpop.permute.xlu1 %191  ;;  %v188_v26 = vpop.permute.xlu0 %187  ;;  %v259_v62 = vunpack.c.l.bf16 %v144_v43  ;;  %v260_v63 = vunpack.c.h.bf16 %v144_v43 }
 0x119   :  { %v318_v30 = vrot.slane %v317_v18, 2  ;;  %v325_v32 = vrot.slane %v324_v19, 2  ;;  %v304_v33 = vrot.slane %v303_v20, 2  ;;  %v311_v34 = vrot.slane %v310_v21, 2 }
 0x11a   :  { %v330_v35 = vrot.slane %v329_v22, 4  ;;  %v337_v36 = vrot.slane %v336_v23, 4  ;;  %v283_v37 = vmul.f32 %v251_v1, %v192_v25  ;;  %v284_v38 = vmul.f32 %v252_v4, %v192_v25  ;;  %v6455_v1 = vld [vmem:[#allocation5 + $0x78] sm:$0xff] }
 0x11b   :  { %v319_v39 = vadd.f32 %v318_v30, %v317_v18  ;;  %v326_v40 = vadd.f32 %v325_v32, %v324_v19  ;;  %v305_v41 = vadd.f32 %v304_v33, %v303_v20  ;;  %v312_v42 = vadd.f32 %v311_v34, %v310_v21 }
 0x11c   :  { %v331_v44 = vadd.f32 %v330_v35, %v329_v22  ;;  %v338_v45 = vadd.f32 %v337_v36, %v336_v23  ;;  %v281_v46 = vmul.f32 %v249_v5, %v188_v26  ;;  %v282_v47 = vmul.f32 %v250_v6, %v188_v26  ;;  %v203_v48 = vpop.permute.xlu1 %202  ;;  %v199_v54 = vpop.permute.xlu0 %198 }
 0x11d   :  { %v320_v50 = vrot.slane %v319_v39, 1  ;;  %v327_v51 = vrot.slane %v326_v40, 1  ;;  %v306_v56 = vrot.slane %v305_v41, 1  ;;  %v313_v57 = vrot.slane %v312_v42, 1 }
 0x11e   :  { %v343_v58 = vadd.f32 %v283_v37, %v281_v46  ;;  %v350_v59 = vadd.f32 %v284_v38, %v282_v47  ;;  %v332_v60 = vrot.slane %v331_v44, 2  ;;  %v339_v61 = vrot.slane %v338_v45, 2 }
 0x11f   :  { %v321_v4 = vadd.f32 %v320_v50, %v319_v39  ;;  %v328_v5 = vadd.f32 %v327_v51, %v326_v40  ;;  %v257_v11 = vunpack.c.l.bf16 %v143_v49  ;;  %v258_v12 = vunpack.c.h.bf16 %v143_v49 }
 0x120   :  { %v344_v6 = vrot.slane %v343_v58, 4  ;;  %v351_v7 = vrot.slane %v350_v59, 4  ;;  %v214_v10 = vpop.permute.xlu1 %213  ;;  %v263_v13 = vunpack.c.l.bf16 %v6451_v55  ;;  %v264_v14 = vunpack.c.h.bf16 %v6451_v55  ;;  %v210_v20 = vpop.permute.xlu0 %209 }
 0x121   :  { %v307_v15 = vadd.f32 %v306_v56, %v305_v41  ;;  %v314_v17 = vadd.f32 %v313_v57, %v312_v42  ;;  %v261_v21 = vunpack.c.l.bf16 %v6453_v0  ;;  %v262_v22 = vunpack.c.h.bf16 %v6453_v0 }
 0x122   :  { %v345_v18 = vadd.f32 %v344_v6, %v343_v58  ;;  %v352_v19 = vadd.f32 %v351_v7, %v350_v59  ;;  %v267_v23 = vunpack.c.l.bf16 %v6455_v1  ;;  %v268_v25 = vunpack.c.h.bf16 %v6455_v1 }
 0x123   :  { %v415_v26 = vpack.c.bf16 %v321_v4, %v321_v4  ;;  %v416_v29 = vpack.c.bf16 %v328_v5, %v328_v5  ;;  %v333_v30 = vadd.f32 %v332_v60, %v331_v44  ;;  %v340_v32 = vadd.f32 %v339_v61, %v338_v45 }
 0x124   :  { %v287_v33 = vmul.f32 %v255_v27, %v203_v48  ;;  %v288_v34 = vmul.f32 %v256_v28, %v203_v48  ;;  %v265_v35 = vunpack.c.l.bf16 %v6457_v8  ;;  %v266_v36 = vunpack.c.h.bf16 %v6457_v8  ;;  %v225_v47 = vpop.permute.xlu1 %224  ;;  %v221_v55 = vpop.permute.xlu0 %220 }
 0x125   :  { %v413_v37 = vpack.c.bf16 %v307_v15, %v307_v15  ;;  %v414_v38 = vpack.c.bf16 %v314_v17, %v314_v17  ;;  %v346_v39 = vrot.slane %v345_v18, 2  ;;  %v353_v40 = vrot.slane %v352_v19, 2 }
 0x126   :  { %v285_v41 = vmul.f32 %v253_v52, %v199_v54  ;;  %v286_v42 = vmul.f32 %v254_v53, %v199_v54  ;;  %v291_v43 = vmul.f32 %v259_v62, %v214_v10  ;;  %v292_v46 = vmul.f32 %v260_v63, %v214_v10 }
 0x127   :  { %v6467_v49 = vunpack.c.l.b16 %v415_v26  ;;  %v6469_v50 = vunpack.c.l.b16 %v416_v29  ;;  %v334_v44 = vrot.slane %v333_v30, 1  ;;  %v341_v27 = vrot.slane %v340_v32, 1 }
 0x128   :  { %v357_v28 = vadd.f32 %v287_v33, %v285_v41  ;;  %v364_v45 = vadd.f32 %v288_v34, %v286_v42  ;;  %v289_v48 = vmul.f32 %v257_v11, %v210_v20  ;;  %v290_v51 = vmul.f32 %v258_v12, %v210_v20  ;;  %v236_v7 = vpop.permute.xlu1 %235  ;;  %v232_v20 = vpop.permute.xlu0 %231 }
 0x129   :  { %v6471_v56 = vunpack.c.l.b16 %v413_v37  ;;  %v6473_v57 = vunpack.c.l.b16 %v414_v38  ;;  %v347_v52 = vadd.f32 %v346_v39, %v345_v18  ;;  %v354_v53 = vadd.f32 %v353_v40, %v352_v19 }
 0x12a   :  { %v358_v54 = vrot.slane %v357_v28, 4  ;;  %v365_v58 = vrot.slane %v364_v45, 4  ;;  %v371_v59 = vadd.f32 %v291_v43, %v289_v48  ;;  %v378_v60 = vadd.f32 %v292_v46, %v290_v51 }
 0x12b   :  { %v6475_v61 = vadd.f32 %v334_v44, %v333_v30  ;;  %v6477_v62 = vadd.f32 %v341_v27, %v340_v32  ;;  %v295_v63 = vmul.f32 %v263_v13, %v225_v47  ;;  %v296_v0 = vmul.f32 %v264_v14, %v225_v47 }
 0x12c   :  { %v359_v1 = vadd.f32 %v358_v54, %v357_v28  ;;  %v366_v4 = vadd.f32 %v365_v58, %v364_v45  ;;  %v372_v5 = vrot.slane %v371_v59, 4  ;;  %v379_v6 = vrot.slane %v378_v60, 4 }
 0x12d   :  { %v348_v8 = vrot.slane %v347_v52, 1  ;;  %v355_v10 = vrot.slane %v354_v53, 1  ;;  %v293_v11 = vmul.f32 %v261_v21, %v221_v55  ;;  %v294_v12 = vmul.f32 %v262_v22, %v221_v55 }
 0x12e   :  { %v360_v15 = vrot.slane %v359_v1, 2  ;;  %v367_v17 = vrot.slane %v366_v4, 2  ;;  %v373_v18 = vadd.f32 %v372_v5, %v371_v59  ;;  %v380_v19 = vadd.f32 %v379_v6, %v378_v60 }
 0x12f   :  { %v385_v26 = vadd.f32 %v295_v63, %v293_v11  ;;  %v392_v29 = vadd.f32 %v296_v0, %v294_v12  ;;  %v299_v30 = vmul.f32 %v267_v23, %v236_v7  ;;  %v300_v32 = vmul.f32 %v268_v25, %v236_v7 }
 0x130   :  { %v361_v13 = vadd.f32 %v360_v15, %v359_v1  ;;  %v368_v14 = vadd.f32 %v367_v17, %v366_v4  ;;  %v374_v33 = vrot.slane %v373_v18, 2  ;;  %v381_v34 = vrot.slane %v380_v19, 2 }
 0x131   :  { %v386_v37 = vrot.slane %v385_v26, 4  ;;  %v393_v38 = vrot.slane %v392_v29, 4  ;;  %v297_v39 = vmul.f32 %v265_v35, %v232_v20  ;;  %v298_v40 = vmul.f32 %v266_v36, %v232_v20 }
 0x132   :  { %v362_v41 = vrot.slane %v361_v13, 1  ;;  %v369_v21 = vrot.slane %v368_v14, 1  ;;  %v375_v22 = vadd.f32 %v374_v33, %v373_v18  ;;  %v382_v42 = vadd.f32 %v381_v34, %v380_v19 }
 0x133   :  { %v387_v43 = vadd.f32 %v386_v37, %v385_v26  ;;  %v394_v46 = vadd.f32 %v393_v38, %v392_v29  ;;  %v399_v47 = vadd.f32 %v299_v30, %v297_v39  ;;  %v406_v44 = vadd.f32 %v300_v32, %v298_v40 }
 0x134   :  { %v349_v27 = vadd.f32 %v348_v8, %v347_v52  ;;  %v356_v23 = vadd.f32 %v355_v10, %v354_v53  ;;  %v376_v25 = vrot.slane %v375_v22, 1  ;;  %v383_v28 = vrot.slane %v382_v42, 1 }
 0x135   :  { %v388_v45 = vrot.slane %v387_v43, 2  ;;  %v395_v48 = vrot.slane %v394_v46, 2  ;;  %v400_v51 = vrot.slane %v399_v47, 4  ;;  %v407_v55 = vrot.slane %v406_v44, 4 }
 0x136   :  { %v363_v35 = vadd.f32 %v362_v41, %v361_v13  ;;  %v370_v36 = vadd.f32 %v369_v21, %v368_v14  ;;  %v377_v54 = vadd.f32 %v376_v25, %v375_v22  ;;  %v384_v58 = vadd.f32 %v383_v28, %v382_v42 }
 0x137   :  { %v389_v59 = vadd.f32 %v388_v45, %v387_v43  ;;  %v396_v60 = vadd.f32 %v395_v48, %v394_v46  ;;  %v401_v63 = vadd.f32 %v400_v51, %v399_v47  ;;  %v408_v0 = vadd.f32 %v407_v55, %v406_v44  ;;  %v5367_v48 = vld [vmem:[#allocation7 + $0x10] ss:$24 sps:$4 sm:$0xff]  }
 0x138   :  { %v417_v52 = vpack.c.bf16 %v6475_v61, %v6475_v61  ;;  %v418_v53 = vpack.c.bf16 %v6477_v62, %v6477_v62  ;;  %v419_v1 = vpack.c.bf16 %v349_v27, %v349_v27  ;;  %v420_v4 = vpack.c.bf16 %v356_v23, %v356_v23 }
 0x139   :  { %v390_v5 = vrot.slane %v389_v59, 1  ;;  %v397_v6 = vrot.slane %v396_v60, 1  ;;  %v402_v7 = vrot.slane %v401_v63, 2  ;;  %v409_v8 = vrot.slane %v408_v0, 2 }
 0x13a   :  { %v421_v10 = vpack.c.bf16 %v363_v35, %v363_v35  ;;  %v422_v11 = vpack.c.bf16 %v370_v36, %v370_v36  ;;  %v423_v12 = vpack.c.bf16 %v377_v54, %v377_v54  ;;  %v424_v15 = vpack.c.bf16 %v384_v58, %v384_v58  ;;  %v5372_v36 = vld [vmem:[#allocation7 + $0x44] ss:$24 sps:$4 sm:$0xff]  }
 0x13b   :  { %v391_v17 = vadd.f32 %v390_v5, %v389_v59  ;;  %v398_v18 = vadd.f32 %v397_v6, %v396_v60  ;;  %v403_v19 = vadd.f32 %v402_v7, %v401_v63  ;;  %v410_v20 = vadd.f32 %v409_v8, %v408_v0  ;;  %v5415_v54 = vld [vmem:[#allocation10] ss:$24 sps:$4 sm:$0xff]   ;;  %v5423_v60 = vld [vmem:[#allocation10 + $0x34] ss:$24 sps:$4 sm:$0xff]  }
 0x13c   :  { %v577_v61 = vunpack.c.l.b16 %v417_v52  ;;  %v578_v26 = vunpack.c.l.b16 %v418_v53  ;;  %v579_v29 = vunpack.c.l.b16 %v419_v1  ;;  %v580_v62 = vunpack.c.l.b16 %v420_v4  ;;  %v5370_v63 = vld [vmem:[#allocation7 + $0x40] ss:$24 sps:$4 sm:$0xff]   ;;  %v5375_v0 = vld [vmem:[#allocation7 + $0x74] ss:$24 sps:$4 sm:$0xff]   ;;  %v5373_v1 = vld [vmem:[#allocation7 + $0x70] ss:$24 sps:$4 sm:$0xff]  }
 0x13d   :  { %v425_v30 = vpack.c.bf16 %v391_v17, %v391_v17  ;;  %v426_v32 = vpack.c.bf16 %v398_v18, %v398_v18  ;;  %v404_v13 = vrot.slane %v403_v19, 1  ;;  %v411_v14 = vrot.slane %v410_v20, 1  ;;  %v5421_v52 = vld [vmem:[#allocation10 + $0x30] ss:$24 sps:$4 sm:$0xff]   ;;  %v5429_v53 = vld [vmem:[#allocation10 + $0x64] ss:$24 sps:$4 sm:$0xff]  }
 0x13e   :  { %v590_v33 = vsel %vm589_vm0, %v6467_v49, %v6471_v56  ;;  %v603_v34 = vsel %vm589_vm0, %v6469_v50, %v6473_v57  ;;  %v581_v37 = vunpack.c.l.b16 %v421_v10  ;;  %v582_v38 = vunpack.c.l.b16 %v422_v11  ;;  %v5378_v4 = vld [vmem:[#allocation7 + $0xa4] ss:$24 sps:$4 sm:$0xff]   ;;  %v5376_v7 = vld [vmem:[#allocation7 + $0xa0] ss:$24 sps:$4 sm:$0xff]   ;;  %v5381_v8 = vld [vmem:[#allocation7 + $0xd4] ss:$24 sps:$4 sm:$0xff]  }
 0x13f   :  { %v583_v39 = vunpack.c.l.b16 %v423_v12  ;;  %v584_v40 = vunpack.c.l.b16 %v424_v15  ;;  %v405_v41 = vadd.f32 %v404_v13, %v403_v19  ;;  %v412_v21 = vadd.f32 %v411_v14, %v410_v20  ;;  %v5427_v5 = vld [vmem:[#allocation10 + $0x60] ss:$24 sps:$4 sm:$0xff]   ;;  %v5435_v6 = vld [vmem:[#allocation10 + $0x94] ss:$24 sps:$4 sm:$0xff]   ;;  %v5433_v10 = vld [vmem:[#allocation10 + $0x90] ss:$24 sps:$4 sm:$0xff]  }
 0x140   :  { %v592_v22 = vsel %vm591_vm1, %v577_v61, %v590_v33  ;;  %v604_v42 = vsel %vm591_vm1, %v578_v26, %v603_v34  ;;  %v585_v43 = vunpack.c.l.b16 %v425_v30  ;;  %v586_v46 = vunpack.c.l.b16 %v426_v32  ;;  %v5441_v11 = vld [vmem:[#allocation10 + $0xc4] ss:$24 sps:$4 sm:$0xff]   ;;  %v5439_v17 = vld [vmem:[#allocation10 + $0xc0] ss:$24 sps:$4 sm:$0xff]   ;;  %v5447_v18 = vld [vmem:[#allocation10 + $0xf4] ss:$24 sps:$4 sm:$0xff]  }
 0x141   :  { %v427_v47 = vpack.c.bf16 %v405_v41, %v405_v41  ;;  %v428_v44 = vpack.c.bf16 %v412_v21, %v412_v21  ;;  %v605_v49 = vsel %vm593_vm2, %v580_v62, %v604_v42  ;;  %v594_v56 = vsel %vm593_vm2, %v579_v29, %v592_v22  ;;  %v5379_v12 = vld [vmem:[#allocation7 + $0xd0] ss:$24 sps:$4 sm:$0xff]   ;;  %v5384_v15 = vld [vmem:[#allocation7 + $0x104] ss:$24 sps:$4 sm:$0xff]   ;;  %v5382_v19 = vld [vmem:[#allocation7 + $0x100] ss:$24 sps:$4 sm:$0xff]  }
 0x142   :  { %v606_v50 = vsel %vm595_vm3, %v582_v38, %v605_v49  ;;  %v596_v57 = vsel %vm595_vm3, %v581_v37, %v594_v56  ;;  %v5387_v20 = vld [vmem:[#allocation7 + $0x134] ss:$24 sps:$4 sm:$0xff]   ;;  %v5385_v29 = vld [vmem:[#allocation7 + $0x130] ss:$24 sps:$4 sm:$0xff]   ;;  %v5390_v62 = vld [vmem:[#allocation7 + $0x164] ss:$24 sps:$4 sm:$0xff]  }
 0x143   :  { %v588_v27 = vunpack.c.l.b16 %v428_v44  ;;  %v607_v23 = vsel %vm597_vm4, %v584_v40, %v606_v50  ;;  %v587_v25 = vunpack.c.l.b16 %v427_v47  ;;  %v598_v28 = vsel %vm597_vm4, %v583_v39, %v596_v57  ;;  %v5445_v61 = vld [vmem:[#allocation10 + $0xf0] ss:$24 sps:$4 sm:$0xff]   ;;  %v5453_v26 = vld [vmem:[#allocation10 + $0x124] ss:$24 sps:$4 sm:$0xff]   ;;  %v5451_v30 = vld [vmem:[#allocation10 + $0x120] ss:$24 sps:$4 sm:$0xff]  }
 0x144   :  { %v608_v45 = vsel %vm599_vm5, %v586_v46, %v607_v23  ;;  %v600_v51 = vsel %vm599_vm5, %v585_v43, %v598_v28  ;;  %v5459_v32 = vld [vmem:[#allocation10 + $0x154] ss:$24 sps:$4 sm:$0xff]   ;;  %v5457_v33 = vld [vmem:[#allocation10 + $0x150] ss:$24 sps:$4 sm:$0xff]   ;;  %v5465_v34 = vld [vmem:[#allocation10 + $0x184] ss:$24 sps:$4 sm:$0xff]  }
 0x145   :  { %v609_v55 = vsel %vm601_vm6, %v588_v27, %v608_v45  ;;  %v602_v35 = vsel %vm601_vm6, %v587_v25, %v600_v51  ;;  %v5388_v13 = vld [vmem:[#allocation7 + $0x160] ss:$24 sps:$4 sm:$0xff]   ;;  %v5393_v14 = vld [vmem:[#allocation7 + $0x194] ss:$24 sps:$4 sm:$0xff]   ;;  %v5391_v37 = vld [vmem:[#allocation7 + $0x190] ss:$24 sps:$4 sm:$0xff]  }
 0x146   :  { %v611_v58 = vpack.c.b16 %v609_v55, %v609_v55  ;;  %v6499_v59 = vpack.c.b16 %v602_v35, %v602_v35  ;;  %v5396_v38 = vld [vmem:[#allocation7 + $0x1c4] ss:$24 sps:$4 sm:$0xff]   ;;  %v5394_v41 = vld [vmem:[#allocation7 + $0x1c0] ss:$24 sps:$4 sm:$0xff]   ;;  %v5399_v21 = vld [vmem:[#allocation7 + $0x1f4] ss:$24 sps:$4 sm:$0xff]  }
 0x147   :  { %v5463_v39 = vld [vmem:[#allocation10 + $0x180] ss:$24 sps:$4 sm:$0xff]   ;;  %v5471_v40 = vld [vmem:[#allocation10 + $0x1b4] ss:$24 sps:$4 sm:$0xff]   ;;  %v5469_v22 = vld [vmem:[#allocation10 + $0x1b0] ss:$24 sps:$4 sm:$0xff]  }
 0x148   :  { %1126 = vmatprep.mubr.bf16.mxu0 %v611_v58  ;;  %1167 = vmatprep.mubr.bf16.mxu1 %v611_v58  ;;  %v5477_v42 = vld [vmem:[#allocation10 + $0x1e4] ss:$24 sps:$4 sm:$0xff]   ;;  %v5475_v47 = vld [vmem:[#allocation10 + $0x1e0] ss:$24 sps:$4 sm:$0xff]   ;;  %v5483_v44 = vld [vmem:[#allocation10 + $0x214] ss:$24 sps:$4 sm:$0xff]  }
 0x149   :  { %1127 = vmatmul.mubr.bf16.vlgmr.msra.gmra.mrb[0].mxu0 %v6499_v59  ;;  %1168 = vmatmul.mubr.bf16.vlgmr.msra.gmra.mrb[0].mxu1 %v6499_v59  ;;  %v5397_v43 = vld [vmem:[#allocation7 + $0x1f0] ss:$24 sps:$4 sm:$0xff]   ;;  %v5402_v46 = vld [vmem:[#allocation7 + $0x224] ss:$24 sps:$4 sm:$0xff]   ;;  %v5400_v49 = vld [vmem:[#allocation7 + $0x220] ss:$24 sps:$4 sm:$0xff]  }
 0x14a   :  { %1177 = vmatpush1.bf16.msra.mxu0 %v5367_v48  ;;  %1208 = vmatprep.mubr.bf16.mxu0 %v611_v58  ;;  %v5405_v56 = vld [vmem:[#allocation7 + $0x254] ss:$24 sps:$4 sm:$0xff]   ;;  %v5403_v27 = vld [vmem:[#allocation7 + $0x250] ss:$24 sps:$4 sm:$0xff]   ;;  %v5408_v23 = vld [vmem:[#allocation7 + $0x284] ss:$24 sps:$4 sm:$0xff]  }
 0x14b   :  { %1178 = vmatprep.subr.bf16.mxu0 %v5372_v36  ;;  %2984 = vmatpush1.bf16.msra.mxu1 %v5415_v54  ;;  %v5481_v50 = vld [vmem:[#allocation10 + $0x210] ss:$24 sps:$4 sm:$0xff]   ;;  %v5489_v57 = vld [vmem:[#allocation10 + $0x244] ss:$24 sps:$4 sm:$0xff]   ;;  %v5487_v25 = vld [vmem:[#allocation10 + $0x240] ss:$24 sps:$4 sm:$0xff]  }
 0x14c   :  { %2985 = vmatprep.subr.bf16.mxu1 %v5423_v60  ;;  %v5495_v28 = vld [vmem:[#allocation10 + $0x274] ss:$24 sps:$4 sm:$0xff]   ;;  %v5493_v51 = vld [vmem:[#allocation10 + $0x270] ss:$24 sps:$4 sm:$0xff]   ;;  %v5501_v55 = vld [vmem:[#allocation10 + $0x2a4] ss:$24 sps:$4 sm:$0xff]  }
 0x14d   :  { %v5406_v45 = vld [vmem:[#allocation7 + $0x280] ss:$24 sps:$4 sm:$0xff]   ;;  %v5411_v48 = vld [vmem:[#allocation7 + $0x2b4] ss:$24 sps:$4 sm:$0xff]   ;;  %v5409_v35 = vld [vmem:[#allocation7 + $0x2b0] ss:$24 sps:$4 sm:$0xff]  }
 0x14e   :  { %1179 = vmatpush1.bf16.msra.mxu0 %v5370_v63  ;;  %v5414_v36 = vld [vmem:[#allocation7 + $0x2e4] ss:$24 sps:$4 sm:$0xff]   ;;  %v5412_v58 = vld [vmem:[#allocation7 + $0x2e0] ss:$24 sps:$4 sm:$0xff]   ;;  %v5420_v60 = vld [vmem:[#allocation10 + $0xc] ss:$24 sps:$4 sm:$0xff]  }
 0x14f   :  { %1180 = vmatprep.subr.bf16.mxu0 %v5375_v0  ;;  %2986 = vmatpush1.bf16.msra.mxu1 %v5421_v52  ;;  %v5499_v54 = vld [vmem:[#allocation10 + $0x2a0] ss:$24 sps:$4 sm:$0xff]   ;;  %v5426_v0 = vld [vmem:[#allocation10 + $0x3c] ss:$24 sps:$4 sm:$0xff]  }
 0x150   :  { %2987 = vmatprep.subr.bf16.mxu1 %v5429_v53  ;;  %v5418_v63 = vld [vmem:[#allocation10 + $0x8] ss:$24 sps:$4 sm:$0xff]   ;;  %v5424_v52 = vld [vmem:[#allocation10 + $0x38] ss:$24 sps:$4 sm:$0xff]   ;;  %v5432_v53 = vld [vmem:[#allocation10 + $0x6c] ss:$24 sps:$4 sm:$0xff]  }
 0x152   :  { %1181 = vmatpush1.bf16.msra.mxu0 %v5373_v1  ;;  %v5430_v1 = vld [vmem:[#allocation10 + $0x68] ss:$24 sps:$4 sm:$0xff]  }
 0x153   :  { %1182 = vmatprep.subr.bf16.mxu0 %v5378_v4  ;;  %2988 = vmatpush1.bf16.msra.mxu1 %v5427_v5  ;;  %v5438_v4 = vld [vmem:[#allocation10 + $0x9c] ss:$24 sps:$4 sm:$0xff]   ;;  %v5436_v5 = vld [vmem:[#allocation10 + $0x98] ss:$24 sps:$4 sm:$0xff]  }
 0x154   :  { %2989 = vmatprep.subr.bf16.mxu1 %v5435_v6  ;;  %v5444_v6 = vld [vmem:[#allocation10 + $0xcc] ss:$24 sps:$4 sm:$0xff]  }
 0x156   :  { %1183 = vmatpush1.bf16.msra.mxu0 %v5376_v7  ;;  %v5442_v7 = vld [vmem:[#allocation10 + $0xc8] ss:$24 sps:$4 sm:$0xff]  }
 0x157   :  { %1184 = vmatprep.subr.bf16.mxu0 %v5381_v8  ;;  %2990 = vmatpush1.bf16.msra.mxu1 %v5433_v10  ;;  %v5450_v8 = vld [vmem:[#allocation10 + $0xfc] ss:$24 sps:$4 sm:$0xff]   ;;  %v5448_v10 = vld [vmem:[#allocation10 + $0xf8] ss:$24 sps:$4 sm:$0xff]  }
 0x158   :  { %2991 = vmatprep.subr.bf16.mxu1 %v5441_v11  ;;  %v5456_v11 = vld [vmem:[#allocation10 + $0x12c] ss:$24 sps:$4 sm:$0xff]  }
 0x15a   :  { %1185 = vmatpush1.bf16.msra.mxu0 %v5379_v12  ;;  %v5462_v12 = vld [vmem:[#allocation10 + $0x15c] ss:$24 sps:$4 sm:$0xff]  }
 0x15b   :  { %1186 = vmatprep.subr.bf16.mxu0 %v5384_v15  ;;  %2992 = vmatpush1.bf16.msra.mxu1 %v5439_v17  ;;  %v5505_v15 = vld [vmem:[#allocation10 + $0x2d0] ss:$24 sps:$4 sm:$0xff]   ;;  %v5507_v17 = vld [vmem:[#allocation10 + $0x2d4] ss:$24 sps:$4 sm:$0xff]  }
 0x15c   :  { %2993 = vmatprep.subr.bf16.mxu1 %v5447_v18  ;;  %v5460_v18 = vld [vmem:[#allocation10 + $0x158] ss:$24 sps:$4 sm:$0xff]  }
 0x15e   :  { %1187 = vmatpush1.bf16.msra.mxu0 %v5382_v19  ;;  %v5513_v19 = vld [vmem:[#allocation10 + $0x304] ss:$24 sps:$4 sm:$0xff]  }
 0x15f   :  { %1188 = vmatprep.subr.bf16.mxu0 %v5387_v20  ;;  %2994 = vmatpush1.bf16.msra.mxu1 %v5445_v61  ;;  %v5468_v20 = vld [vmem:[#allocation10 + $0x18c] ss:$24 sps:$4 sm:$0xff]   ;;  %v5466_v61 = vld [vmem:[#allocation10 + $0x188] ss:$24 sps:$4 sm:$0xff]  }
 0x160   :  { %2995 = vmatprep.subr.bf16.mxu1 %v5453_v26  ;;  %v5474_v26 = vld [vmem:[#allocation10 + $0x1bc] ss:$24 sps:$4 sm:$0xff]  }
 0x162   :  { %1189 = vmatpush1.bf16.msra.mxu0 %v5385_v29  ;;  %v5472_v29 = vld [vmem:[#allocation10 + $0x1b8] ss:$24 sps:$4 sm:$0xff]  }
 0x163   :  { %1190 = vmatprep.subr.bf16.mxu0 %v5390_v62  ;;  %2996 = vmatpush1.bf16.msra.mxu1 %v5451_v30  ;;  %v5480_v62 = vld [vmem:[#allocation10 + $0x1ec] ss:$24 sps:$4 sm:$0xff]   ;;  %v5478_v30 = vld [vmem:[#allocation10 + $0x1e8] ss:$24 sps:$4 sm:$0xff]  }
 0x164   :  { %2997 = vmatprep.subr.bf16.mxu1 %v5459_v32  ;;  %v5486_v32 = vld [vmem:[#allocation10 + $0x21c] ss:$24 sps:$4 sm:$0xff]  }
 0x166   :  { %1191 = vmatpush1.bf16.msra.mxu0 %v5388_v13  ;;  %v5484_v13 = vld [vmem:[#allocation10 + $0x218] ss:$24 sps:$4 sm:$0xff]  }
 0x167   :  { %1192 = vmatprep.subr.bf16.mxu0 %v5393_v14  ;;  %2998 = vmatpush1.bf16.msra.mxu1 %v5457_v33  ;;  %v5492_v14 = vld [vmem:[#allocation10 + $0x24c] ss:$24 sps:$4 sm:$0xff]   ;;  %v5490_v33 = vld [vmem:[#allocation10 + $0x248] ss:$24 sps:$4 sm:$0xff]  }
 0x168   :  { %2999 = vmatprep.subr.bf16.mxu1 %v5465_v34  ;;  %v5498_v34 = vld [vmem:[#allocation10 + $0x27c] ss:$24 sps:$4 sm:$0xff]  }
 0x16a   :  { %1193 = vmatpush1.bf16.msra.mxu0 %v5391_v37  ;;  %v5496_v37 = vld [vmem:[#allocation10 + $0x278] ss:$24 sps:$4 sm:$0xff]  }
 0x16b   :  { %1194 = vmatprep.subr.bf16.mxu0 %v5396_v38  ;;  %3000 = vmatpush1.bf16.msra.mxu1 %v5463_v39  ;;  %v5504_v38 = vld [vmem:[#allocation10 + $0x2ac] ss:$24 sps:$4 sm:$0xff]   ;;  %v5502_v39 = vld [vmem:[#allocation10 + $0x2a8] ss:$24 sps:$4 sm:$0xff]  }
 0x16c   :  { %3001 = vmatprep.subr.bf16.mxu1 %v5471_v40  ;;  %v5510_v40 = vld [vmem:[#allocation10 + $0x2dc] ss:$24 sps:$4 sm:$0xff]  }
 0x16e   :  { %1195 = vmatpush1.bf16.msra.mxu0 %v5394_v41  ;;  %v5508_v41 = vld [vmem:[#allocation10 + $0x2d8] ss:$24 sps:$4 sm:$0xff]  }
 0x16f   :  { %1196 = vmatprep.subr.bf16.mxu0 %v5399_v21  ;;  %3002 = vmatpush1.bf16.msra.mxu1 %v5469_v22  ;;  %v5516_v21 = vld [vmem:[#allocation10 + $0x30c] ss:$24 sps:$4 sm:$0xff]   ;;  %v6504_v22 = vld [vmem:[#allocation8] sm:$0x3f] }
 0x170   :  { %3003 = vmatprep.subr.bf16.mxu1 %v5477_v42  ;;  %v530_v42 = vrot.slane %v6504_v22, %v6411_v3 }
 0x172   :  { %1197 = vmatpush1.bf16.msra.mxu0 %v5397_v43  ;;  %v534_v43 = vrot.slane %v6504_v22, %v6408_v2 }
 0x173   :  { %1198 = vmatprep.subr.bf16.mxu0 %v5402_v46  ;;  %3004 = vmatpush1.bf16.msra.mxu1 %v5475_v47  ;;  %v542_v46 = vrot.slane %v6504_v22, %v6423_v16 }
 0x174   :  { %3005 = vmatprep.subr.bf16.mxu1 %v5483_v44 }
 0x176   :  { %1199 = vmatpush1.bf16.msra.mxu0 %v5400_v49 }
 0x177   :  { %1200 = vmatprep.subr.bf16.mxu0 %v5405_v56  ;;  %3006 = vmatpush1.bf16.msra.mxu1 %v5481_v50 }
 0x178   :  { %3007 = vmatprep.subr.bf16.mxu1 %v5489_v57 }
 0x17a   :  { %1201 = vmatpush1.bf16.msra.mxu0 %v5403_v27 }
 0x17b   :  { %1202 = vmatprep.subr.bf16.mxu0 %v5408_v23  ;;  %3008 = vmatpush1.bf16.msra.mxu1 %v5487_v25 }
 0x17c   :  { %3009 = vmatprep.subr.bf16.mxu1 %v5495_v28 }
 0x17e   :  { %1203 = vmatpush1.bf16.msra.mxu0 %v5406_v45 }
 0x17f   :  { %1204 = vmatprep.subr.bf16.mxu0 %v5411_v48  ;;  %3010 = vmatpush1.bf16.msra.mxu1 %v5493_v51  ;;  %v5511_v51 = vld [vmem:[#allocation10 + $0x300] ss:$24 sps:$4 sm:$0xff]  }
 0x180   :  { %3011 = vmatprep.subr.bf16.mxu1 %v5501_v55  ;;  %v5514_v55 = vld [vmem:[#allocation10 + $0x308] ss:$24 sps:$4 sm:$0xff]  }
 0x182   :  { %1205 = vmatpush1.bf16.msra.mxu0 %v5409_v35 }
 0x183   :  { %1206 = vmatprep.subr.bf16.mxu0 %v5414_v36  ;;  %3012 = vmatpush1.bf16.msra.mxu1 %v5499_v54  ;;  %v5519_v36 = vld [vmem:[#allocation10 + $0x334] ss:$24 sps:$4 sm:$0xff]  }
 0x184   :  { %3013 = vmatprep.subr.bf16.mxu1 %v5507_v17  ;;  %v5522_v54 = vld [vmem:[#allocation10 + $0x33c] ss:$24 sps:$4 sm:$0xff]   ;;  %v5541_v17 = vld [vmem:[#allocation10 + $0x3f0] ss:$24 sps:$4 sm:$0xff]  }
 0x186   :  { %1207 = vmatpush1.bf16.msra.mxu0 %v5412_v58 }
 0x187   :  { %3106 = vmatprep.subr.bf16.mxu0 %v5420_v60  ;;  %3014 = vmatpush1.bf16.msra.mxu1 %v5505_v15  ;;  %v5517_v60 = vld [vmem:[#allocation10 + $0x330] ss:$24 sps:$4 sm:$0xff]   ;;  %v5546_v15 = vld [vmem:[#allocation10 + $0x3fc] ss:$24 sps:$4 sm:$0xff]  }
 0x188   :  { %3024 = vmatprep.subr.bf16.mxu1 %v5513_v19  ;;  %v5549_v19 = vld [vmem:[#allocation10 + $0x424] ss:$24 sps:$4 sm:$0xff]  }
 0x189   :  { %1209 = vmatmul.mubr.bf16.vlgmr.msra.gmra.mrb[4].mxu0 %v6499_v59  ;;  %v5454_v59 = vld [vmem:[#allocation10 + $0x128] ss:$24 sps:$4 sm:$0xff]  }
 0x18a   :  { %3107 = vmatpush1.bf16.msra.mxu0 %v5418_v63  ;;  %v5520_v63 = vld [vmem:[#allocation10 + $0x338] ss:$24 sps:$4 sm:$0xff]  }
 0x18b   :  { %3108 = vmatprep.subr.bf16.mxu0 %v5426_v0  ;;  %v5525_v0 = vld [vmem:[#allocation10 + $0x364] ss:$24 sps:$4 sm:$0xff]  }
 0x18e   :  { %3109 = vmatpush1.bf16.msra.mxu0 %v5424_v52  ;;  %v5528_v52 = vld [vmem:[#allocation10 + $0x36c] ss:$24 sps:$4 sm:$0xff]  }
 0x18f   :  { %3110 = vmatprep.subr.bf16.mxu0 %v5432_v53  ;;  %v5523_v53 = vld [vmem:[#allocation10 + $0x360] ss:$24 sps:$4 sm:$0xff]  }
 0x192   :  { %3111 = vmatpush1.bf16.msra.mxu0 %v5430_v1  ;;  %v5526_v1 = vld [vmem:[#allocation10 + $0x368] ss:$24 sps:$4 sm:$0xff]  }
 0x193   :  { %3112 = vmatprep.subr.bf16.mxu0 %v5438_v4  ;;  %v5531_v4 = vld [vmem:[#allocation10 + $0x394] ss:$24 sps:$4 sm:$0xff]  }
 0x196   :  { %3113 = vmatpush1.bf16.msra.mxu0 %v5436_v5  ;;  %v5534_v5 = vld [vmem:[#allocation10 + $0x39c] ss:$24 sps:$4 sm:$0xff]  }
 0x197   :  { %3114 = vmatprep.subr.bf16.mxu0 %v5444_v6  ;;  %v5529_v6 = vld [vmem:[#allocation10 + $0x390] ss:$24 sps:$4 sm:$0xff]  }
 0x19a   :  { %3115 = vmatpush1.bf16.msra.mxu0 %v5442_v7  ;;  %v5532_v7 = vld [vmem:[#allocation10 + $0x398] ss:$24 sps:$4 sm:$0xff]  }
 0x19b   :  { %3116 = vmatprep.subr.bf16.mxu0 %v5450_v8  ;;  %v5537_v8 = vld [vmem:[#allocation10 + $0x3c4] ss:$24 sps:$4 sm:$0xff]  }
 0x19e   :  { %3117 = vmatpush1.bf16.msra.mxu0 %v5448_v10  ;;  %v5540_v10 = vld [vmem:[#allocation10 + $0x3cc] ss:$24 sps:$4 sm:$0xff]  }
 0x19f   :  { %3118 = vmatprep.subr.bf16.mxu0 %v5456_v11  ;;  %v5535_v11 = vld [vmem:[#allocation10 + $0x3c0] ss:$24 sps:$4 sm:$0xff]  }
 0x1a2   :  { %3119 = vmatpush1.bf16.msra.mxu0 %v5454_v59  ;;  %v5538_v59 = vld [vmem:[#allocation10 + $0x3c8] ss:$24 sps:$4 sm:$0xff]  }
 0x1a3   :  { %3120 = vmatprep.subr.bf16.mxu0 %v5462_v12  ;;  %v5543_v12 = vld [vmem:[#allocation10 + $0x3f4] ss:$24 sps:$4 sm:$0xff]  }
 0x1a6   :  { %3121 = vmatpush1.bf16.msra.mxu0 %v5460_v18  ;;  %v5544_v18 = vld [vmem:[#allocation10 + $0x3f8] ss:$24 sps:$4 sm:$0xff]  }
 0x1a7   :  { %3122 = vmatprep.subr.bf16.mxu0 %v5468_v20  ;;  %v5552_v20 = vld [vmem:[#allocation10 + $0x42c] ss:$24 sps:$4 sm:$0xff]  }
 0x1aa   :  { %3123 = vmatpush1.bf16.msra.mxu0 %v5466_v61  ;;  %v5547_v61 = vld [vmem:[#allocation10 + $0x420] ss:$24 sps:$4 sm:$0xff]  }
 0x1ab   :  { %3124 = vmatprep.subr.bf16.mxu0 %v5474_v26  ;;  %v5550_v26 = vld [vmem:[#allocation10 + $0x428] ss:$24 sps:$4 sm:$0xff]  }
 0x1ae   :  { %3125 = vmatpush1.bf16.msra.mxu0 %v5472_v29  ;;  %v5555_v29 = vld [vmem:[#allocation10 + $0x454] ss:$24 sps:$4 sm:$0xff]  }
 0x1af   :  { %3126 = vmatprep.subr.bf16.mxu0 %v5480_v62  ;;  %v5558_v62 = vld [vmem:[#allocation10 + $0x45c] ss:$24 sps:$4 sm:$0xff]  }
 0x1b2   :  { %3127 = vmatpush1.bf16.msra.mxu0 %v5478_v30  ;;  %v5553_v30 = vld [vmem:[#allocation10 + $0x450] ss:$24 sps:$4 sm:$0xff]  }
 0x1b3   :  { %3128 = vmatprep.subr.bf16.mxu0 %v5486_v32  ;;  %v5556_v32 = vld [vmem:[#allocation10 + $0x458] ss:$24 sps:$4 sm:$0xff]  }
 0x1b6   :  { %3129 = vmatpush1.bf16.msra.mxu0 %v5484_v13  ;;  %v5561_v13 = vld [vmem:[#allocation10 + $0x484] ss:$24 sps:$4 sm:$0xff]  }
 0x1b7   :  { %3130 = vmatprep.subr.bf16.mxu0 %v5492_v14  ;;  %v5564_v14 = vld [vmem:[#allocation10 + $0x48c] ss:$24 sps:$4 sm:$0xff]  }
 0x1ba   :  { %3131 = vmatpush1.bf16.msra.mxu0 %v5490_v33  ;;  %v5559_v33 = vld [vmem:[#allocation10 + $0x480] ss:$24 sps:$4 sm:$0xff]  }
 0x1bb   :  { %3132 = vmatprep.subr.bf16.mxu0 %v5498_v34  ;;  %v5562_v34 = vld [vmem:[#allocation10 + $0x488] ss:$24 sps:$4 sm:$0xff]  }
 0x1be   :  { %3133 = vmatpush1.bf16.msra.mxu0 %v5496_v37  ;;  %v5567_v37 = vld [vmem:[#allocation10 + $0x4b4] ss:$24 sps:$4 sm:$0xff]  }
 0x1bf   :  { %3134 = vmatprep.subr.bf16.mxu0 %v5504_v38  ;;  %v5570_v38 = vld [vmem:[#allocation10 + $0x4bc] ss:$24 sps:$4 sm:$0xff]  }
 0x1c2   :  { %3135 = vmatpush1.bf16.msra.mxu0 %v5502_v39  ;;  %v5565_v39 = vld [vmem:[#allocation10 + $0x4b0] ss:$24 sps:$4 sm:$0xff]  }
 0x1c3   :  { %3136 = vmatprep.subr.bf16.mxu0 %v5510_v40  ;;  %v5568_v40 = vld [vmem:[#allocation10 + $0x4b8] ss:$24 sps:$4 sm:$0xff]  }
 0x1c6   :  { %3137 = vmatpush1.bf16.msra.mxu0 %v5508_v41  ;;  %v5573_v41 = vld [vmem:[#allocation10 + $0x4e4] ss:$24 sps:$4 sm:$0xff]  }
 0x1c7   :  { %3147 = vmatprep.subr.bf16.mxu0 %v5516_v21  ;;  %v5576_v21 = vld [vmem:[#allocation10 + $0x4ec] ss:$24 sps:$4 sm:$0xff]  }
 0x21c   :  { %v1128_v47 = vpop.f32.mrb[0].mxu0  ;;  %v6512_v44 = vpop.f32.mrb[0].mxu1 }
 0x21d   :  { %v1129_v49 = vadd.f32 %v1128_v47, %v530_v42  ;;  %v1130_v56 = vpop.f32.mrb[1].mxu0  ;;  %v1171_v50 = vpop.f32.mrb[1].mxu1  ;;  %v5571_v42 = vld [vmem:[#allocation10 + $0x4e0] ss:$24 sps:$4 sm:$0xff]   ;;  %v5582_v47 = vld [vmem:[#allocation10 + $0x51c] ss:$24 sps:$4 sm:$0xff]  }
 0x21e   :  { %v1131_v57 = vadd.f32 %v1130_v56, %v534_v43  ;;  %v1132_v27 = vpop.f32.mrb[2].mxu0  ;;  %v1173_v23 = vpop.f32.mrb[2].mxu1  ;;  %v1172_v25 = vadd.f32 %v1171_v50, %v542_v46  ;;  %v5574_v43 = vld [vmem:[#allocation10 + $0x4e8] ss:$24 sps:$4 sm:$0xff]   ;;  %v5579_v46 = vld [vmem:[#allocation10 + $0x514] ss:$24 sps:$4 sm:$0xff]  }
 0x21f   :  { %v1133_v28 = vpop.f32.mrb[3].mxu0  ;;  %v1174_v45 = vpop.f32.mrb[3].mxu1  ;;  %v6516_v35 = vpack.c.bf16 %v1129_v49, %v1129_v49  ;;  %v5577_v49 = vld [vmem:[#allocation10 + $0x510] ss:$24 sps:$4 sm:$0xff]   ;;  %v5585_v50 = vld [vmem:[#allocation10 + $0x544] ss:$24 sps:$4 sm:$0xff]  }
 0x220   :  { %v6514_v48 = vpack.c.bf16 %v1131_v57, %v1131_v57  ;;  %v6520_v58 = vpack.c.bf16 %v1172_v25, %v1172_v25  ;;  %v5580_v56 = vld [vmem:[#allocation10 + $0x518] ss:$24 sps:$4 sm:$0xff]   ;;  %v5588_v57 = vld [vmem:[#allocation10 + $0x54c] ss:$24 sps:$4 sm:$0xff]   ;;  %v5586_v23 = vld [vmem:[#allocation10 + $0x548] ss:$24 sps:$4 sm:$0xff]  }
 0x221   :  { %v5583_v27 = vld [vmem:[#allocation10 + $0x540] ss:$24 sps:$4 sm:$0xff]   ;;  %v5591_v25 = vld [vmem:[#allocation10 + $0x574] ss:$24 sps:$4 sm:$0xff]   ;;  %v5589_v45 = vld [vmem:[#allocation10 + $0x570] ss:$24 sps:$4 sm:$0xff]  }
 0x222   :  { %3015 = vmatprep.mubr.bf16.mxu1 %v6514_v48  ;;  %3138 = vmatprep.mubr.bf16.mxu0 %v6514_v48  ;;  %v5594_v28 = vld [vmem:[#allocation10 + $0x57c] ss:$24 sps:$4 sm:$0xff]  }
 0x223   :  { %3016 = vmatmul.mubr.bf16.vlgmr.msra.gmra.mrb[4].mxu1 %v6516_v35  ;;  %3139 = vmatmul.mubr.bf16.vlgmr.msra.gmra.mrb[8].mxu0 %v6516_v35 }
 0x224   :  { %3025 = vmatpush1.bf16.msra.mxu1 %v5511_v51  ;;  %3148 = vmatpush1.bf16.msra.mxu0 %v5514_v55  ;;  %v5592_v51 = vld [vmem:[#allocation10 + $0x578] ss:$24 sps:$4 sm:$0xff]   ;;  %v5597_v55 = vld [vmem:[#allocation10 + $0x5a4] ss:$24 sps:$4 sm:$0xff]  }
 0x225   :  { %3056 = vmatprep.mubr.bf16.mxu1 %v6520_v58  ;;  %3179 = vmatprep.mubr.bf16.mxu0 %v6520_v58 }
 0x226   :  { %3026 = vmatprep.subr.bf16.mxu1 %v5519_v36  ;;  %3149 = vmatprep.subr.bf16.mxu0 %v5522_v54  ;;  %v5600_v36 = vld [vmem:[#allocation10 + $0x5ac] ss:$24 sps:$4 sm:$0xff]   ;;  %v5595_v54 = vld [vmem:[#allocation10 + $0x5a0] ss:$24 sps:$4 sm:$0xff]  }
 0x228   :  { %3027 = vmatpush1.bf16.msra.mxu1 %v5517_v60  ;;  %3150 = vmatpush1.bf16.msra.mxu0 %v5520_v63  ;;  %v5598_v60 = vld [vmem:[#allocation10 + $0x5a8] ss:$24 sps:$4 sm:$0xff]   ;;  %v538_v63 = vrot.slane %v6504_v22, %v6420_v9 }
 0x229   :  { %3028 = vmatprep.subr.bf16.mxu1 %v5525_v0  ;;  %3151 = vmatprep.subr.bf16.mxu0 %v5528_v52  ;;  %v5603_v0 = vld [vmem:[#allocation10 + $0x5d4] ss:$24 sps:$4 sm:$0xff]  }
 0x22a   :  { %v5606_v52 = vld [vmem:[#allocation10 + $0x5dc] ss:$24 sps:$4 sm:$0xff]  }
 0x22c   :  { %3029 = vmatpush1.bf16.msra.mxu1 %v5523_v53  ;;  %3152 = vmatpush1.bf16.msra.mxu0 %v5526_v1  ;;  %v550_v53 = vrot.slane %v6504_v22, %v6435_v31 }
 0x22d   :  { %3030 = vmatprep.subr.bf16.mxu1 %v5531_v4  ;;  %3153 = vmatprep.subr.bf16.mxu0 %v5534_v5  ;;  %v5601_v4 = vld [vmem:[#allocation10 + $0x5d0] ss:$24 sps:$4 sm:$0xff]  }
 0x22e   :  { %v5604_v5 = vld [vmem:[#allocation10 + $0x5d8] ss:$24 sps:$4 sm:$0xff]  }
 0x230   :  { %3031 = vmatpush1.bf16.msra.mxu1 %v5529_v6  ;;  %3154 = vmatpush1.bf16.msra.mxu0 %v5532_v7  ;;  %v1170_v6 = vadd.f32 %v6512_v44, %v538_v63  ;;  %v5618_v44 = vld [vmem:[#allocation10 + $0x63c] ss:$24 sps:$4 sm:$0xff]  }
 0x231   :  { %3032 = vmatprep.subr.bf16.mxu1 %v5537_v8  ;;  %3155 = vmatprep.subr.bf16.mxu0 %v5540_v10  ;;  %v5609_v8 = vld [vmem:[#allocation10 + $0x604] ss:$24 sps:$4 sm:$0xff]  }
 0x232   :  { %v5612_v10 = vld [vmem:[#allocation10 + $0x60c] ss:$24 sps:$4 sm:$0xff]  }
 0x233   :  { %v5669_v63 = vld [vmem:[#allocation10 + $0x7e4] ss:$24 sps:$4 sm:$0xff]  }
 0x234   :  { %3033 = vmatpush1.bf16.msra.mxu1 %v5535_v11  ;;  %3156 = vmatpush1.bf16.msra.mxu0 %v5538_v59 }
 0x235   :  { %3034 = vmatprep.subr.bf16.mxu1 %v5543_v12  ;;  %3157 = vmatprep.subr.bf16.mxu0 %v5546_v15  ;;  %v5607_v15 = vld [vmem:[#allocation10 + $0x600] ss:$24 sps:$4 sm:$0xff]  }
 0x238   :  { %3035 = vmatpush1.bf16.msra.mxu1 %v5541_v17  ;;  %3158 = vmatpush1.bf16.msra.mxu0 %v5544_v18  ;;  %v6533_v17 = vpack.c.bf16 %v1170_v6, %v1170_v6  ;;  %v5610_v18 = vld [vmem:[#allocation10 + $0x608] ss:$24 sps:$4 sm:$0xff]  }
 0x239   :  { %3036 = vmatprep.subr.bf16.mxu1 %v5549_v19  ;;  %3159 = vmatprep.subr.bf16.mxu0 %v5552_v20  ;;  %v5615_v20 = vld [vmem:[#allocation10 + $0x634] ss:$24 sps:$4 sm:$0xff]   ;;  %v5673_v6 = vld [vmem:[#allocation10 + $0x810] ss:$24 sps:$4 sm:$0xff]  }
 0x23c   :  { %3037 = vmatpush1.bf16.msra.mxu1 %v5547_v61  ;;  %3160 = vmatpush1.bf16.msra.mxu0 %v5550_v26  ;;  %v5613_v61 = vld [vmem:[#allocation10 + $0x630] ss:$24 sps:$4 sm:$0xff]  }
 0x23d   :  { %3038 = vmatprep.subr.bf16.mxu1 %v5555_v29  ;;  %3161 = vmatprep.subr.bf16.mxu0 %v5558_v62  ;;  %v5616_v26 = vld [vmem:[#allocation10 + $0x638] ss:$24 sps:$4 sm:$0xff]   ;;  %v5621_v29 = vld [vmem:[#allocation10 + $0x664] ss:$24 sps:$4 sm:$0xff]  }
 0x23e   :  { %v5624_v62 = vld [vmem:[#allocation10 + $0x66c] ss:$24 sps:$4 sm:$0xff]  }
 0x240   :  { %3039 = vmatpush1.bf16.msra.mxu1 %v5553_v30  ;;  %3162 = vmatpush1.bf16.msra.mxu0 %v5556_v32  ;;  %v5619_v30 = vld [vmem:[#allocation10 + $0x660] ss:$24 sps:$4 sm:$0xff]  }
 0x241   :  { %3040 = vmatprep.subr.bf16.mxu1 %v5561_v13  ;;  %3163 = vmatprep.subr.bf16.mxu0 %v5564_v14  ;;  %v5622_v32 = vld [vmem:[#allocation10 + $0x668] ss:$24 sps:$4 sm:$0xff]   ;;  %v5627_v13 = vld [vmem:[#allocation10 + $0x694] ss:$24 sps:$4 sm:$0xff]  }
 0x242   :  { %v5630_v14 = vld [vmem:[#allocation10 + $0x69c] ss:$24 sps:$4 sm:$0xff]  }
 0x244   :  { %3041 = vmatpush1.bf16.msra.mxu1 %v5559_v33  ;;  %3164 = vmatpush1.bf16.msra.mxu0 %v5562_v34  ;;  %v5625_v33 = vld [vmem:[#allocation10 + $0x690] ss:$24 sps:$4 sm:$0xff]  }
 0x245   :  { %3042 = vmatprep.subr.bf16.mxu1 %v5567_v37  ;;  %3165 = vmatprep.subr.bf16.mxu0 %v5570_v38  ;;  %v5628_v34 = vld [vmem:[#allocation10 + $0x698] ss:$24 sps:$4 sm:$0xff]   ;;  %v5633_v37 = vld [vmem:[#allocation10 + $0x6c4] ss:$24 sps:$4 sm:$0xff]  }
 0x246   :  { %v5636_v38 = vld [vmem:[#allocation10 + $0x6cc] ss:$24 sps:$4 sm:$0xff]  }
 0x248   :  { %3043 = vmatpush1.bf16.msra.mxu1 %v5565_v39  ;;  %3166 = vmatpush1.bf16.msra.mxu0 %v5568_v40  ;;  %v5631_v39 = vld [vmem:[#allocation10 + $0x6c0] ss:$24 sps:$4 sm:$0xff]  }
 0x249   :  { %3044 = vmatprep.subr.bf16.mxu1 %v5573_v41  ;;  %3167 = vmatprep.subr.bf16.mxu0 %v5576_v21  ;;  %v5634_v40 = vld [vmem:[#allocation10 + $0x6c8] ss:$24 sps:$4 sm:$0xff]   ;;  %v5639_v41 = vld [vmem:[#allocation10 + $0x6f4] ss:$24 sps:$4 sm:$0xff]  }
 0x24a   :  { %v5642_v21 = vld [vmem:[#allocation10 + $0x6fc] ss:$24 sps:$4 sm:$0xff]  }
 0x24c   :  { %3045 = vmatpush1.bf16.msra.mxu1 %v5571_v42  ;;  %3168 = vmatpush1.bf16.msra.mxu0 %v5574_v43  ;;  %v5637_v42 = vld [vmem:[#allocation10 + $0x6f0] ss:$24 sps:$4 sm:$0xff]  }
 0x24d   :  { %3046 = vmatprep.subr.bf16.mxu1 %v5579_v46  ;;  %3169 = vmatprep.subr.bf16.mxu0 %v5582_v47  ;;  %v5640_v43 = vld [vmem:[#allocation10 + $0x6f8] ss:$24 sps:$4 sm:$0xff]   ;;  %v5645_v46 = vld [vmem:[#allocation10 + $0x724] ss:$24 sps:$4 sm:$0xff]  }
 0x24e   :  { %v5648_v47 = vld [vmem:[#allocation10 + $0x72c] ss:$24 sps:$4 sm:$0xff]  }
 0x250   :  { %3047 = vmatpush1.bf16.msra.mxu1 %v5577_v49  ;;  %3170 = vmatpush1.bf16.msra.mxu0 %v5580_v56  ;;  %v5643_v49 = vld [vmem:[#allocation10 + $0x720] ss:$24 sps:$4 sm:$0xff]  }
 0x251   :  { %3048 = vmatprep.subr.bf16.mxu1 %v5585_v50  ;;  %3171 = vmatprep.subr.bf16.mxu0 %v5588_v57  ;;  %v5646_v56 = vld [vmem:[#allocation10 + $0x728] ss:$24 sps:$4 sm:$0xff]   ;;  %v5651_v50 = vld [vmem:[#allocation10 + $0x754] ss:$24 sps:$4 sm:$0xff]  }
 0x252   :  { %v5654_v57 = vld [vmem:[#allocation10 + $0x75c] ss:$24 sps:$4 sm:$0xff]  }
 0x254   :  { %3049 = vmatpush1.bf16.msra.mxu1 %v5583_v27  ;;  %3172 = vmatpush1.bf16.msra.mxu0 %v5586_v23  ;;  %v5649_v27 = vld [vmem:[#allocation10 + $0x750] ss:$24 sps:$4 sm:$0xff]  }
 0x255   :  { %3050 = vmatprep.subr.bf16.mxu1 %v5591_v25  ;;  %3173 = vmatprep.subr.bf16.mxu0 %v5594_v28  ;;  %v5652_v23 = vld [vmem:[#allocation10 + $0x758] ss:$24 sps:$4 sm:$0xff]   ;;  %v5657_v25 = vld [vmem:[#allocation10 + $0x784] ss:$24 sps:$4 sm:$0xff]  }
 0x256   :  { %v5660_v28 = vld [vmem:[#allocation10 + $0x78c] ss:$24 sps:$4 sm:$0xff]  }
 0x258   :  { %3051 = vmatpush1.bf16.msra.mxu1 %v5589_v45  ;;  %3174 = vmatpush1.bf16.msra.mxu0 %v5592_v51  ;;  %v5655_v45 = vld [vmem:[#allocation10 + $0x780] ss:$24 sps:$4 sm:$0xff]  }
 0x259   :  { %3052 = vmatprep.subr.bf16.mxu1 %v5597_v55  ;;  %3175 = vmatprep.subr.bf16.mxu0 %v5600_v36  ;;  %v5658_v51 = vld [vmem:[#allocation10 + $0x788] ss:$24 sps:$4 sm:$0xff]   ;;  %v5663_v55 = vld [vmem:[#allocation10 + $0x7b4] ss:$24 sps:$4 sm:$0xff]  }
 0x25a   :  { %v5666_v36 = vld [vmem:[#allocation10 + $0x7bc] ss:$24 sps:$4 sm:$0xff]  }
 0x25c   :  { %v6530_v1 = vpop.f32.mrb[4].mxu0  ;;  %3053 = vmatpush1.bf16.msra.mxu1 %v5595_v54  ;;  %3176 = vmatpush1.bf16.msra.mxu0 %v5598_v60  ;;  %v5661_v54 = vld [vmem:[#allocation10 + $0x7b0] ss:$24 sps:$4 sm:$0xff]  }
 0x25d   :  { %v1212_v7 = vpop.f32.mrb[5].mxu0  ;;  %3054 = vmatprep.subr.bf16.mxu1 %v5603_v0  ;;  %3177 = vmatprep.subr.bf16.mxu0 %v5606_v52  ;;  %v5664_v60 = vld [vmem:[#allocation10 + $0x7b8] ss:$24 sps:$4 sm:$0xff]   ;;  %v5672_v0 = vld [vmem:[#allocation10 + $0x7ec] ss:$24 sps:$4 sm:$0xff]  }
 0x25e   :  { %v1213_v11 = vadd.f32 %v1212_v7, %v550_v53  ;;  %v1214_v59 = vpop.f32.mrb[6].mxu0  ;;  %v5667_v52 = vld [vmem:[#allocation10 + $0x7e0] ss:$24 sps:$4 sm:$0xff]  }
 0x25f   :  { %v1215_v12 = vpop.f32.mrb[7].mxu0  ;;  %v5670_v53 = vld [vmem:[#allocation10 + $0x7e8] ss:$24 sps:$4 sm:$0xff]   ;;  %v5676_v7 = vld [vmem:[#allocation10 + $0x818] ss:$24 sps:$4 sm:$0xff]  }
 0x260   :  { %3055 = vmatpush1.bf16.msra.mxu1 %v5601_v4  ;;  %3178 = vmatpush1.bf16.msra.mxu0 %v5604_v5  ;;  %v6535_v19 = vpack.c.bf16 %v1213_v11, %v1213_v11  ;;  %v5675_v4 = vld [vmem:[#allocation10 + $0x814] ss:$24 sps:$4 sm:$0xff]   ;;  %v5679_v11 = vld [vmem:[#allocation10 + $0x840] ss:$24 sps:$4 sm:$0xff]  }
 0x261   :  { %3065 = vmatprep.subr.bf16.mxu1 %v5609_v8  ;;  %3188 = vmatprep.subr.bf16.mxu0 %v5612_v10  ;;  %v5678_v5 = vld [vmem:[#allocation10 + $0x81c] ss:$24 sps:$4 sm:$0xff]   ;;  %v5684_v10 = vld [vmem:[#allocation10 + $0x84c] ss:$24 sps:$4 sm:$0xff]   ;;  %v5682_v59 = vld [vmem:[#allocation10 + $0x848] ss:$24 sps:$4 sm:$0xff]  }
 0x262   :  { %v5681_v8 = vld [vmem:[#allocation10 + $0x844] ss:$24 sps:$4 sm:$0xff]   ;;  %v5687_v12 = vld [vmem:[#allocation10 + $0x874] ss:$24 sps:$4 sm:$0xff]  }
 0x263   :  { %3057 = vmatmul.mubr.bf16.vlgmr.msra.gmra.mrb[4].mxu1 %v6533_v17  ;;  %3180 = vmatmul.mubr.bf16.vlgmr.msra.gmra.mrb[8].mxu0 %v6533_v17 }
 0x264   :  { %3066 = vmatpush1.bf16.msra.mxu1 %v5607_v15  ;;  %3097 = vmatprep.mubr.bf16.mxu1 %v6535_v19  ;;  %v5690_v15 = vld [vmem:[#allocation10 + $0x87c] ss:$24 sps:$4 sm:$0xff]  }
 0x265   :  { %3189 = vmatpush1.bf16.msra.mxu0 %v5610_v18  ;;  %3220 = vmatprep.mubr.bf16.mxu0 %v6535_v19  ;;  %v5685_v18 = vld [vmem:[#allocation10 + $0x870] ss:$24 sps:$4 sm:$0xff]  }
 0x266   :  { %3067 = vmatprep.subr.bf16.mxu1 %v5615_v20  ;;  %3190 = vmatprep.subr.bf16.mxu0 %v5618_v44  ;;  %v5688_v20 = vld [vmem:[#allocation10 + $0x878] ss:$24 sps:$4 sm:$0xff]   ;;  %v5693_v44 = vld [vmem:[#allocation10 + $0x8a4] ss:$24 sps:$4 sm:$0xff]  }
 0x268   :  { %3068 = vmatpush1.bf16.msra.mxu1 %v5613_v61  ;;  %v5696_v61 = vld [vmem:[#allocation10 + $0x8ac] ss:$24 sps:$4 sm:$0xff]  }
 0x269   :  { %3191 = vmatpush1.bf16.msra.mxu0 %v5616_v26  ;;  %3069 = vmatprep.subr.bf16.mxu1 %v5621_v29  ;;  %v5691_v26 = vld [vmem:[#allocation10 + $0x8a0] ss:$24 sps:$4 sm:$0xff]   ;;  %v546_v29 = vrot.slane %v6504_v22, %v6430_v24  ;;  %v5708_v22 = vld [vmem:[#allocation10 + $0x44] ss:$24 sps:$4 sm:$0xff]  }
 0x26a   :  { %3192 = vmatprep.subr.bf16.mxu0 %v5624_v62  ;;  %v5694_v62 = vld [vmem:[#allocation10 + $0x8a8] ss:$24 sps:$4 sm:$0xff]  }
 0x26c   :  { %3070 = vmatpush1.bf16.msra.mxu1 %v5619_v30  ;;  %v5699_v30 = vld [vmem:[#allocation10 + $0x8d4] ss:$24 sps:$4 sm:$0xff]  }
 0x26d   :  { %3193 = vmatpush1.bf16.msra.mxu0 %v5622_v32  ;;  %3071 = vmatprep.subr.bf16.mxu1 %v5627_v13  ;;  %v5702_v32 = vld [vmem:[#allocation10 + $0x8dc] ss:$24 sps:$4 sm:$0xff]   ;;  %v5697_v13 = vld [vmem:[#allocation10 + $0x8d0] ss:$24 sps:$4 sm:$0xff]  }
 0x26e   :  { %3194 = vmatprep.subr.bf16.mxu0 %v5630_v14  ;;  %v1211_v14 = vadd.f32 %v6530_v1, %v546_v29  ;;  %v5711_v1 = vld [vmem:[#allocation10 + $0x74] ss:$24 sps:$4 sm:$0xff]   ;;  %v5750_v29 = vld [vmem:[#allocation10 + $0x2e4] ss:$24 sps:$4 sm:$0xff]  }
 0x270   :  { %3072 = vmatpush1.bf16.msra.mxu1 %v5625_v33  ;;  %v5700_v33 = vld [vmem:[#allocation10 + $0x8d8] ss:$24 sps:$4 sm:$0xff]  }
 0x271   :  { %3195 = vmatpush1.bf16.msra.mxu0 %v5628_v34  ;;  %3073 = vmatprep.subr.bf16.mxu1 %v5633_v37  ;;  %v5705_v34 = vld [vmem:[#allocation10 + $0x14] ss:$24 sps:$4 sm:$0xff]   ;;  %v5703_v37 = vld [vmem:[#allocation10 + $0x10] ss:$24 sps:$4 sm:$0xff]  }
 0x272   :  { %3196 = vmatprep.subr.bf16.mxu0 %v5636_v38  ;;  %v6544_v38 = vpack.c.bf16 %v1211_v14, %v1211_v14  ;;  %v5751_v14 = vld [vmem:[#allocation10 + $0x310] ss:$24 sps:$4 sm:$0xff]  }
 0x274   :  { %3074 = vmatpush1.bf16.msra.mxu1 %v5631_v39  ;;  %v5706_v39 = vld [vmem:[#allocation10 + $0x40] ss:$24 sps:$4 sm:$0xff]  }
 0x275   :  { %3197 = vmatpush1.bf16.msra.mxu0 %v5634_v40  ;;  %3075 = vmatprep.subr.bf16.mxu1 %v5639_v41  ;;  %v5709_v40 = vld [vmem:[#allocation10 + $0x70] ss:$24 sps:$4 sm:$0xff]   ;;  %v5714_v41 = vld [vmem:[#allocation10 + $0xa4] ss:$24 sps:$4 sm:$0xff]  }
 0x276   :  { %3198 = vmatprep.subr.bf16.mxu0 %v5642_v21  ;;  %v5712_v21 = vld [vmem:[#allocation10 + $0xa0] ss:$24 sps:$4 sm:$0xff]  }
 0x278   :  { %3076 = vmatpush1.bf16.msra.mxu1 %v5637_v42  ;;  %v5717_v42 = vld [vmem:[#allocation10 + $0xd4] ss:$24 sps:$4 sm:$0xff]  }
 0x279   :  { %3199 = vmatpush1.bf16.msra.mxu0 %v5640_v43  ;;  %3077 = vmatprep.subr.bf16.mxu1 %v5645_v46  ;;  %v5715_v43 = vld [vmem:[#allocation10 + $0xd0] ss:$24 sps:$4 sm:$0xff]   ;;  %v5720_v46 = vld [vmem:[#allocation10 + $0x104] ss:$24 sps:$4 sm:$0xff]  }
 0x27a   :  { %3200 = vmatprep.subr.bf16.mxu0 %v5648_v47  ;;  %v5718_v47 = vld [vmem:[#allocation10 + $0x100] ss:$24 sps:$4 sm:$0xff]  }
 0x27c   :  { %3078 = vmatpush1.bf16.msra.mxu1 %v5643_v49  ;;  %v5723_v49 = vld [vmem:[#allocation10 + $0x134] ss:$24 sps:$4 sm:$0xff]  }
 0x27d   :  { %3201 = vmatpush1.bf16.msra.mxu0 %v5646_v56  ;;  %3079 = vmatprep.subr.bf16.mxu1 %v5651_v50  ;;  %v5726_v56 = vld [vmem:[#allocation10 + $0x164] ss:$24 sps:$4 sm:$0xff]   ;;  %v5724_v50 = vld [vmem:[#allocation10 + $0x160] ss:$24 sps:$4 sm:$0xff]  }
 0x27e   :  { %3202 = vmatprep.subr.bf16.mxu0 %v5654_v57  ;;  %v5820_v57 = vld [vmem:[#allocation13] ss:$12 sps:$4 sm:$0xff]  }
 0x280   :  { %3080 = vmatpush1.bf16.msra.mxu1 %v5649_v27  ;;  %v5822_v27 = vld [vmem:[#allocation13 + $0x4] ss:$12 sps:$4 sm:$0xff]  }
 0x281   :  { %3203 = vmatpush1.bf16.msra.mxu0 %v5652_v23  ;;  %3081 = vmatprep.subr.bf16.mxu1 %v5657_v25  ;;  %v5729_v23 = vld [vmem:[#allocation10 + $0x194] ss:$24 sps:$4 sm:$0xff]   ;;  %v5727_v25 = vld [vmem:[#allocation10 + $0x190] ss:$24 sps:$4 sm:$0xff]  }
 0x282   :  { %3204 = vmatprep.subr.bf16.mxu0 %v5660_v28  ;;  %v5826_v28 = vld [vmem:[#allocation13 + $0x18] ss:$12 sps:$4 sm:$0xff]  }
 0x284   :  { %3082 = vmatpush1.bf16.msra.mxu1 %v5655_v45  ;;  %v5828_v45 = vld [vmem:[#allocation13 + $0x1c] ss:$12 sps:$4 sm:$0xff]  }
 0x285   :  { %3205 = vmatpush1.bf16.msra.mxu0 %v5658_v51  ;;  %3083 = vmatprep.subr.bf16.mxu1 %v5663_v55  ;;  %v5732_v51 = vld [vmem:[#allocation10 + $0x1c4] ss:$24 sps:$4 sm:$0xff]   ;;  %v5730_v55 = vld [vmem:[#allocation10 + $0x1c0] ss:$24 sps:$4 sm:$0xff]  }
 0x286   :  { %3206 = vmatprep.subr.bf16.mxu0 %v5666_v36  ;;  %v5832_v36 = vld [vmem:[#allocation13 + $0x30] ss:$12 sps:$4 sm:$0xff]  }
 0x288   :  { %3084 = vmatpush1.bf16.msra.mxu1 %v5661_v54  ;;  %v5834_v54 = vld [vmem:[#allocation13 + $0x34] ss:$12 sps:$4 sm:$0xff]  }
 0x289   :  { %3207 = vmatpush1.bf16.msra.mxu0 %v5664_v60  ;;  %3085 = vmatprep.subr.bf16.mxu1 %v5669_v63  ;;  %v5735_v60 = vld [vmem:[#allocation10 + $0x1f4] ss:$24 sps:$4 sm:$0xff]   ;;  %v5733_v63 = vld [vmem:[#allocation10 + $0x1f0] ss:$24 sps:$4 sm:$0xff]  }
 0x28a   :  { %3208 = vmatprep.subr.bf16.mxu0 %v5672_v0  ;;  %v5838_v0 = vld [vmem:[#allocation13 + $0x48] ss:$12 sps:$4 sm:$0xff]  }
 0x28c   :  { %3086 = vmatpush1.bf16.msra.mxu1 %v5667_v52  ;;  %v5840_v52 = vld [vmem:[#allocation13 + $0x4c] ss:$12 sps:$4 sm:$0xff]  }
 0x28d   :  { %3209 = vmatpush1.bf16.msra.mxu0 %v5670_v53  ;;  %3087 = vmatprep.subr.bf16.mxu1 %v5675_v4  ;;  %v5738_v53 = vld [vmem:[#allocation10 + $0x224] ss:$24 sps:$4 sm:$0xff]   ;;  %v5736_v4 = vld [vmem:[#allocation10 + $0x220] ss:$24 sps:$4 sm:$0xff]  }
 0x28e   :  { %3210 = vmatprep.subr.bf16.mxu0 %v5678_v5  ;;  %v5844_v5 = vld [vmem:[#allocation13 + $0x60] ss:$12 sps:$4 sm:$0xff]  }
 0x290   :  { %3088 = vmatpush1.bf16.msra.mxu1 %v5673_v6  ;;  %v5846_v6 = vld [vmem:[#allocation13 + $0x64] ss:$12 sps:$4 sm:$0xff]  }
 0x291   :  { %3211 = vmatpush1.bf16.msra.mxu0 %v5676_v7  ;;  %3089 = vmatprep.subr.bf16.mxu1 %v5681_v8  ;;  %v5741_v7 = vld [vmem:[#allocation10 + $0x254] ss:$24 sps:$4 sm:$0xff]   ;;  %v5739_v8 = vld [vmem:[#allocation10 + $0x250] ss:$24 sps:$4 sm:$0xff]  }
 0x292   :  { %3212 = vmatprep.subr.bf16.mxu0 %v5684_v10  ;;  %v5850_v10 = vld [vmem:[#allocation13 + $0x78] ss:$12 sps:$4 sm:$0xff]  }
 0x294   :  { %3090 = vmatpush1.bf16.msra.mxu1 %v5679_v11  ;;  %v5852_v11 = vld [vmem:[#allocation13 + $0x7c] ss:$12 sps:$4 sm:$0xff]  }
 0x295   :  { %3213 = vmatpush1.bf16.msra.mxu0 %v5682_v59  ;;  %3091 = vmatprep.subr.bf16.mxu1 %v5687_v12  ;;  %v5744_v59 = vld [vmem:[#allocation10 + $0x284] ss:$24 sps:$4 sm:$0xff]   ;;  %v5742_v12 = vld [vmem:[#allocation10 + $0x280] ss:$24 sps:$4 sm:$0xff]  }
 0x296   :  { %3214 = vmatprep.subr.bf16.mxu0 %v5690_v15  ;;  %v5856_v15 = vld [vmem:[#allocation13 + $0x90] ss:$12 sps:$4 sm:$0xff]  }
 0x298   :  { %3092 = vmatpush1.bf16.msra.mxu1 %v5685_v18  ;;  %v5858_v18 = vld [vmem:[#allocation13 + $0x94] ss:$12 sps:$4 sm:$0xff]  }
 0x299   :  { %3215 = vmatpush1.bf16.msra.mxu0 %v5688_v20  ;;  %3093 = vmatprep.subr.bf16.mxu1 %v5693_v44  ;;  %v5747_v20 = vld [vmem:[#allocation10 + $0x2b4] ss:$24 sps:$4 sm:$0xff]   ;;  %v5745_v44 = vld [vmem:[#allocation10 + $0x2b0] ss:$24 sps:$4 sm:$0xff]  }
 0x29a   :  { %3216 = vmatprep.subr.bf16.mxu0 %v5696_v61  ;;  %v5862_v61 = vld [vmem:[#allocation13 + $0xa8] ss:$12 sps:$4 sm:$0xff]  }
 0x29c   :  { %3094 = vmatpush1.bf16.msra.mxu1 %v5691_v26  ;;  %v5864_v26 = vld [vmem:[#allocation13 + $0xac] ss:$12 sps:$4 sm:$0xff]  }
 0x29d   :  { %3217 = vmatpush1.bf16.msra.mxu0 %v5694_v62  ;;  %3095 = vmatprep.subr.bf16.mxu1 %v5699_v30  ;;  %v5748_v62 = vld [vmem:[#allocation10 + $0x2e0] ss:$24 sps:$4 sm:$0xff]   ;;  %v5868_v30 = vld [vmem:[#allocation13 + $0xc0] ss:$12 sps:$4 sm:$0xff]  }
 0x29e   :  { %3218 = vmatprep.subr.bf16.mxu0 %v5702_v32  ;;  %v5870_v32 = vld [vmem:[#allocation13 + $0xc4] ss:$12 sps:$4 sm:$0xff]  }
 0x2a0   :  { %3096 = vmatpush1.bf16.msra.mxu1 %v5697_v13  ;;  %v5753_v13 = vld [vmem:[#allocation10 + $0x314] ss:$24 sps:$4 sm:$0xff]  }
 0x2a1   :  { %3219 = vmatpush1.bf16.msra.mxu0 %v5700_v33  ;;  %3229 = vmatprep.subr.bf16.mxu1 %v5705_v34  ;;  %v5874_v33 = vld [vmem:[#allocation13 + $0xd8] ss:$12 sps:$4 sm:$0xff]   ;;  %v5876_v34 = vld [vmem:[#allocation13 + $0xdc] ss:$12 sps:$4 sm:$0xff]  }
 0x2a2   :  { %4341 = vmatprep.subr.bf16.mxu0 %v5822_v27  ;;  %v5771_v27 = vld [vmem:[#allocation10 + $0x434] ss:$24 sps:$4 sm:$0xff]  }
 0x2a3   :  { %3098 = vmatmul.mubr.bf16.vlgmr.msra.gmra.mrb[4].mxu1 %v6544_v38 }
 0x2a4   :  { %3221 = vmatmul.mubr.bf16.vlgmr.msra.gmra.mrb[8].mxu0 %v6544_v38  ;;  %3230 = vmatpush1.bf16.msra.mxu1 %v5703_v37  ;;  %v5756_v37 = vld [vmem:[#allocation10 + $0x344] ss:$24 sps:$4 sm:$0xff]  }
 0x2a5   :  { %3261 = vmatprep.mubr.bf16.mxu1 %v6514_v48  ;;  %3231 = vmatprep.subr.bf16.mxu1 %v5708_v22  ;;  %v5721_v48 = vld [vmem:[#allocation10 + $0x130] ss:$24 sps:$4 sm:$0xff]   ;;  %v5754_v22 = vld [vmem:[#allocation10 + $0x340] ss:$24 sps:$4 sm:$0xff]  }
 0x2a6   :  { %4342 = vmatpush1.bf16.msra.mxu0 %v5820_v57  ;;  %v5766_v57 = vld [vmem:[#allocation10 + $0x400] ss:$24 sps:$4 sm:$0xff]  }
 0x2a7   :  { %4343 = vmatprep.subr.bf16.mxu0 %v5828_v45  ;;  %v5899_v45 = vld [vmem:[#allocation13 + $0x150] ss:$12 sps:$4 sm:$0xff]  }
 0x2a8   :  { %3232 = vmatpush1.bf16.msra.mxu1 %v5706_v39  ;;  %v5879_v39 = vld [vmem:[#allocation13 + $0xf0] ss:$12 sps:$4 sm:$0xff]  }
 0x2a9   :  { %3233 = vmatprep.subr.bf16.mxu1 %v5711_v1  ;;  %v5881_v1 = vld [vmem:[#allocation13 + $0xf4] ss:$12 sps:$4 sm:$0xff]  }
 0x2aa   :  { %4344 = vmatpush1.bf16.msra.mxu0 %v5826_v28  ;;  %v5774_v28 = vld [vmem:[#allocation10 + $0x464] ss:$24 sps:$4 sm:$0xff]  }
 0x2ab   :  { %4345 = vmatprep.subr.bf16.mxu0 %v5834_v54  ;;  %v5904_v54 = vld [vmem:[#allocation13 + $0x168] ss:$12 sps:$4 sm:$0xff]  }
 0x2ac   :  { %3234 = vmatpush1.bf16.msra.mxu1 %v5709_v40  ;;  %v5759_v40 = vld [vmem:[#allocation10 + $0x374] ss:$24 sps:$4 sm:$0xff]  }
 0x2ad   :  { %3235 = vmatprep.subr.bf16.mxu1 %v5714_v41  ;;  %v5757_v41 = vld [vmem:[#allocation10 + $0x370] ss:$24 sps:$4 sm:$0xff]  }
 0x2ae   :  { %4346 = vmatpush1.bf16.msra.mxu0 %v5832_v36  ;;  %v5777_v36 = vld [vmem:[#allocation10 + $0x494] ss:$24 sps:$4 sm:$0xff]  }
 0x2af   :  { %4347 = vmatprep.subr.bf16.mxu0 %v5840_v52  ;;  %v5778_v52 = vld [vmem:[#allocation10 + $0x4c0] ss:$24 sps:$4 sm:$0xff]  }
 0x2b0   :  { %3236 = vmatpush1.bf16.msra.mxu1 %v5712_v21  ;;  %v5884_v21 = vld [vmem:[#allocation13 + $0x108] ss:$12 sps:$4 sm:$0xff]  }
 0x2b1   :  { %3237 = vmatprep.subr.bf16.mxu1 %v5717_v42  ;;  %v5886_v42 = vld [vmem:[#allocation13 + $0x10c] ss:$12 sps:$4 sm:$0xff]  }
 0x2b2   :  { %4348 = vmatpush1.bf16.msra.mxu0 %v5838_v0  ;;  %v5780_v0 = vld [vmem:[#allocation10 + $0x4c4] ss:$24 sps:$4 sm:$0xff]  }
 0x2b3   :  { %4349 = vmatprep.subr.bf16.mxu0 %v5846_v6  ;;  %v5784_v6 = vld [vmem:[#allocation10 + $0x520] ss:$24 sps:$4 sm:$0xff]  }
 0x2b4   :  { %3238 = vmatpush1.bf16.msra.mxu1 %v5715_v43  ;;  %v5762_v43 = vld [vmem:[#allocation10 + $0x3a4] ss:$24 sps:$4 sm:$0xff]  }
 0x2b5   :  { %3239 = vmatprep.subr.bf16.mxu1 %v5720_v46  ;;  %v5889_v46 = vld [vmem:[#allocation13 + $0x120] ss:$12 sps:$4 sm:$0xff]  }
 0x2b6   :  { %4350 = vmatpush1.bf16.msra.mxu0 %v5844_v5  ;;  %v5786_v5 = vld [vmem:[#allocation10 + $0x524] ss:$24 sps:$4 sm:$0xff]  }
 0x2b7   :  { %4351 = vmatprep.subr.bf16.mxu0 %v5852_v11  ;;  %v5790_v11 = vld [vmem:[#allocation10 + $0x580] ss:$24 sps:$4 sm:$0xff]  }
 0x2b8   :  { %3240 = vmatpush1.bf16.msra.mxu1 %v5718_v47  ;;  %v5891_v47 = vld [vmem:[#allocation13 + $0x124] ss:$12 sps:$4 sm:$0xff]  }
 0x2b9   :  { %3241 = vmatprep.subr.bf16.mxu1 %v5723_v49  ;;  %v5763_v49 = vld [vmem:[#allocation10 + $0x3d0] ss:$24 sps:$4 sm:$0xff]  }
 0x2ba   :  { %4352 = vmatpush1.bf16.msra.mxu0 %v5850_v10  ;;  %v5792_v10 = vld [vmem:[#allocation10 + $0x584] ss:$24 sps:$4 sm:$0xff]  }
 0x2bb   :  { %4353 = vmatprep.subr.bf16.mxu0 %v5858_v18  ;;  %v5796_v18 = vld [vmem:[#allocation10 + $0x5e0] ss:$24 sps:$4 sm:$0xff]  }
 0x2bc   :  { %3242 = vmatpush1.bf16.msra.mxu1 %v5721_v48  ;;  %v5894_v48 = vld [vmem:[#allocation13 + $0x138] ss:$12 sps:$4 sm:$0xff]  }
 0x2bd   :  { %3243 = vmatprep.subr.bf16.mxu1 %v5726_v56  ;;  %v5896_v56 = vld [vmem:[#allocation13 + $0x13c] ss:$12 sps:$4 sm:$0xff]  }
 0x2be   :  { %4354 = vmatpush1.bf16.msra.mxu0 %v5856_v15  ;;  %v5798_v15 = vld [vmem:[#allocation10 + $0x5e4] ss:$24 sps:$4 sm:$0xff]  }
 0x2bf   :  { %4355 = vmatprep.subr.bf16.mxu0 %v5864_v26  ;;  %v5802_v26 = vld [vmem:[#allocation10 + $0x640] ss:$24 sps:$4 sm:$0xff]  }
 0x2c0   :  { %3244 = vmatpush1.bf16.msra.mxu1 %v5724_v50  ;;  %v5768_v50 = vld [vmem:[#allocation10 + $0x404] ss:$24 sps:$4 sm:$0xff]  }
 0x2c1   :  { %3245 = vmatprep.subr.bf16.mxu1 %v5729_v23  ;;  %v5769_v23 = vld [vmem:[#allocation10 + $0x430] ss:$24 sps:$4 sm:$0xff]  }
 0x2c2   :  { %4356 = vmatpush1.bf16.msra.mxu0 %v5862_v61  ;;  %v5804_v61 = vld [vmem:[#allocation10 + $0x644] ss:$24 sps:$4 sm:$0xff]  }
 0x2c3   :  { %4357 = vmatprep.subr.bf16.mxu0 %v5870_v32  ;;  %v5808_v32 = vld [vmem:[#allocation10 + $0x6a0] ss:$24 sps:$4 sm:$0xff]  }
 0x2c4   :  { %3246 = vmatpush1.bf16.msra.mxu1 %v5727_v25  ;;  %v5901_v25 = vld [vmem:[#allocation13 + $0x154] ss:$12 sps:$4 sm:$0xff]  }
 0x2c5   :  { %3247 = vmatprep.subr.bf16.mxu1 %v5732_v51  ;;  %v5772_v51 = vld [vmem:[#allocation10 + $0x460] ss:$24 sps:$4 sm:$0xff]  }
 0x2c6   :  { %4358 = vmatpush1.bf16.msra.mxu0 %v5868_v30  ;;  %v5810_v30 = vld [vmem:[#allocation10 + $0x6a4] ss:$24 sps:$4 sm:$0xff]  }
 0x2c7   :  { %4359 = vmatprep.subr.bf16.mxu0 %v5876_v34  ;;  %v5819_v34 = vld [vmem:[#allocation10 + $0x734] ss:$24 sps:$4 sm:$0xff]  }
 0x2c8   :  { %3248 = vmatpush1.bf16.msra.mxu1 %v5730_v55  ;;  %v5906_v55 = vld [vmem:[#allocation13 + $0x16c] ss:$12 sps:$4 sm:$0xff]  }
 0x2c9   :  { %3249 = vmatprep.subr.bf16.mxu1 %v5735_v60  ;;  %v5911_v60 = vld [vmem:[#allocation13 + $0x184] ss:$12 sps:$4 sm:$0xff]  }
 0x2ca   :  { %4360 = vmatpush1.bf16.msra.mxu0 %v5874_v33  ;;  %v5816_v33 = vld [vmem:[#allocation10 + $0x704] ss:$24 sps:$4 sm:$0xff]  }
 0x2cb   :  { %4361 = vmatprep.subr.bf16.mxu0 %v5881_v1  ;;  %v5829_v1 = vld [vmem:[#allocation10 + $0x790] ss:$24 sps:$4 sm:$0xff]  }
 0x2cc   :  { %3250 = vmatpush1.bf16.msra.mxu1 %v5733_v63  ;;  %v5775_v63 = vld [vmem:[#allocation10 + $0x490] ss:$24 sps:$4 sm:$0xff]  }
 0x2cd   :  { %3251 = vmatprep.subr.bf16.mxu1 %v5738_v53  ;;  %v5783_v53 = vld [vmem:[#allocation10 + $0x4f4] ss:$24 sps:$4 sm:$0xff]  }
 0x2ce   :  { %4362 = vmatpush1.bf16.msra.mxu0 %v5879_v39  ;;  %v5831_v39 = vld [vmem:[#allocation10 + $0x794] ss:$24 sps:$4 sm:$0xff]  }
 0x2cf   :  { %4363 = vmatprep.subr.bf16.mxu0 %v5886_v42  ;;  %v5841_v42 = vld [vmem:[#allocation10 + $0x7f0] ss:$24 sps:$4 sm:$0xff]  }
 0x2d0   :  { %3252 = vmatpush1.bf16.msra.mxu1 %v5736_v4  ;;  %v5781_v4 = vld [vmem:[#allocation10 + $0x4f0] ss:$24 sps:$4 sm:$0xff]  }
 0x2d1   :  { %3253 = vmatprep.subr.bf16.mxu1 %v5741_v7  ;;  %v5789_v7 = vld [vmem:[#allocation10 + $0x554] ss:$24 sps:$4 sm:$0xff]  }
 0x2d2   :  { %4364 = vmatpush1.bf16.msra.mxu0 %v5884_v21  ;;  %v5843_v21 = vld [vmem:[#allocation10 + $0x7f4] ss:$24 sps:$4 sm:$0xff]  }
 0x2d3   :  { %4365 = vmatprep.subr.bf16.mxu0 %v5891_v47  ;;  %v5853_v47 = vld [vmem:[#allocation10 + $0x850] ss:$24 sps:$4 sm:$0xff]  }
 0x2d4   :  { %3254 = vmatpush1.bf16.msra.mxu1 %v5739_v8  ;;  %v5787_v8 = vld [vmem:[#allocation10 + $0x550] ss:$24 sps:$4 sm:$0xff]  }
 0x2d5   :  { %3255 = vmatprep.subr.bf16.mxu1 %v5744_v59  ;;  %v5795_v59 = vld [vmem:[#allocation10 + $0x5b4] ss:$24 sps:$4 sm:$0xff]  }
 0x2d6   :  { %4366 = vmatpush1.bf16.msra.mxu0 %v5889_v46  ;;  %v5855_v46 = vld [vmem:[#allocation10 + $0x854] ss:$24 sps:$4 sm:$0xff]  }
 0x2d7   :  { %4367 = vmatprep.subr.bf16.mxu0 %v5896_v56  ;;  %v5865_v56 = vld [vmem:[#allocation10 + $0x8b0] ss:$24 sps:$4 sm:$0xff]  }
 0x2d8   :  { %3256 = vmatpush1.bf16.msra.mxu1 %v5742_v12  ;;  %v5793_v12 = vld [vmem:[#allocation10 + $0x5b0] ss:$24 sps:$4 sm:$0xff]  }
 0x2d9   :  { %3257 = vmatprep.subr.bf16.mxu1 %v5747_v20  ;;  %v5801_v20 = vld [vmem:[#allocation10 + $0x614] ss:$24 sps:$4 sm:$0xff]  }
 0x2da   :  { %4368 = vmatpush1.bf16.msra.mxu0 %v5894_v48  ;;  %v5867_v48 = vld [vmem:[#allocation10 + $0x8b4] ss:$24 sps:$4 sm:$0xff]  }
 0x2db   :  { %4369 = vmatprep.subr.bf16.mxu0 %v5901_v25  ;;  %v5882_v25 = vld [vmem:[#allocation13 + $0xe0] ss:$12 sps:$4 sm:$0xff]  }
 0x2dc   :  { %3258 = vmatpush1.bf16.msra.mxu1 %v5745_v44  ;;  %v5799_v44 = vld [vmem:[#allocation10 + $0x610] ss:$24 sps:$4 sm:$0xff]  }
 0x2dd   :  { %3259 = vmatprep.subr.bf16.mxu1 %v5750_v29  ;;  %v5807_v29 = vld [vmem:[#allocation10 + $0x674] ss:$24 sps:$4 sm:$0xff]  }
 0x2de   :  { %4370 = vmatpush1.bf16.msra.mxu0 %v5899_v45  ;;  %v5887_v45 = vld [vmem:[#allocation13 + $0xf8] ss:$12 sps:$4 sm:$0xff]  }
 0x2df   :  { %4371 = vmatprep.subr.bf16.mxu0 %v5906_v55  ;;  %v5892_v55 = vld [vmem:[#allocation13 + $0x110] ss:$12 sps:$4 sm:$0xff]  }
 0x2e0   :  { %3260 = vmatpush1.bf16.msra.mxu1 %v5748_v62  ;;  %v5805_v62 = vld [vmem:[#allocation10 + $0x670] ss:$24 sps:$4 sm:$0xff]  }
 0x2e1   :  { %3270 = vmatprep.subr.bf16.mxu1 %v5753_v13  ;;  %v5813_v13 = vld [vmem:[#allocation10 + $0x6d4] ss:$24 sps:$4 sm:$0xff]  }
 0x2e2   :  { %4372 = vmatpush1.bf16.msra.mxu0 %v5904_v54  ;;  %v5897_v54 = vld [vmem:[#allocation13 + $0x128] ss:$12 sps:$4 sm:$0xff]  }
 0x2e3   :  { %3262 = vmatmul.mubr.bf16.vlgmr.msra.gmra.mrb[8].mxu1 %v6516_v35  ;;  %v5760_v35 = vld [vmem:[#allocation10 + $0x3a0] ss:$24 sps:$4 sm:$0xff]   ;;  %4382 = vmatprep.subr.bf16.mxu0 %v5911_v60 }
 0x2e4   :  { %3271 = vmatpush1.bf16.msra.mxu1 %v5751_v14  ;;  %3302 = vmatprep.mubr.bf16.mxu1 %v6520_v58  ;;  %v5765_v58 = vld [vmem:[#allocation10 + $0x3d4] ss:$24 sps:$4 sm:$0xff]   ;;  %v5811_v14 = vld [vmem:[#allocation10 + $0x6d0] ss:$24 sps:$4 sm:$0xff]  }
 0x2e5   :  { %3272 = vmatprep.subr.bf16.mxu1 %v5756_v37  ;;  %v5825_v37 = vld [vmem:[#allocation10 + $0x764] ss:$24 sps:$4 sm:$0xff]  }
 0x2e6   :  { %v5898_v60 = vld [vmem:[#allocation13 + $0x68] ss:$12 sps:$4 sm:$0xff]  }
 0x2e8   :  { %3273 = vmatpush1.bf16.msra.mxu1 %v5754_v22  ;;  %v5823_v22 = vld [vmem:[#allocation10 + $0x760] ss:$24 sps:$4 sm:$0xff]  }
 0x2e9   :  { %3274 = vmatprep.subr.bf16.mxu1 %v5759_v40  ;;  %v5837_v40 = vld [vmem:[#allocation10 + $0x7c4] ss:$24 sps:$4 sm:$0xff]  }
 0x2ec   :  { %3275 = vmatpush1.bf16.msra.mxu1 %v5757_v41  ;;  %v5835_v41 = vld [vmem:[#allocation10 + $0x7c0] ss:$24 sps:$4 sm:$0xff]  }
 0x2ed   :  { %3276 = vmatprep.subr.bf16.mxu1 %v5762_v43  ;;  %v5849_v43 = vld [vmem:[#allocation10 + $0x824] ss:$24 sps:$4 sm:$0xff]  }
 0x2f0   :  { %3277 = vmatpush1.bf16.msra.mxu1 %v5760_v35  ;;  %v5847_v35 = vld [vmem:[#allocation10 + $0x820] ss:$24 sps:$4 sm:$0xff]  }
 0x2f1   :  { %3278 = vmatprep.subr.bf16.mxu1 %v5765_v58  ;;  %v5861_v58 = vld [vmem:[#allocation10 + $0x884] ss:$24 sps:$4 sm:$0xff]  }
 0x2f4   :  { %3279 = vmatpush1.bf16.msra.mxu1 %v5763_v49  ;;  %v5859_v49 = vld [vmem:[#allocation10 + $0x880] ss:$24 sps:$4 sm:$0xff]  }
 0x2f5   :  { %3280 = vmatprep.subr.bf16.mxu1 %v5768_v50  ;;  %v5873_v50 = vld [vmem:[#allocation10 + $0x8e4] ss:$24 sps:$4 sm:$0xff]  }
 0x2f8   :  { %3281 = vmatpush1.bf16.msra.mxu1 %v5766_v57  ;;  %v5871_v57 = vld [vmem:[#allocation10 + $0x8e0] ss:$24 sps:$4 sm:$0xff]  }
 0x2f9   :  { %3282 = vmatprep.subr.bf16.mxu1 %v5771_v27  ;;  %v5877_v27 = vld [vmem:[#allocation13 + $0xc8] ss:$12 sps:$4 sm:$0xff]  }
 0x2fc   :  { %3283 = vmatpush1.bf16.msra.mxu1 %v5769_v23  ;;  %v5878_v23 = vld [vmem:[#allocation13 + $0x8] ss:$12 sps:$4 sm:$0xff]  }
 0x2fd   :  { %3284 = vmatprep.subr.bf16.mxu1 %v5774_v28  ;;  %v5883_v28 = vld [vmem:[#allocation13 + $0x20] ss:$12 sps:$4 sm:$0xff]  }
 0x300   :  { %3285 = vmatpush1.bf16.msra.mxu1 %v5772_v51  ;;  %v5888_v51 = vld [vmem:[#allocation13 + $0x38] ss:$12 sps:$4 sm:$0xff]  }
 0x301   :  { %3286 = vmatprep.subr.bf16.mxu1 %v5777_v36  ;;  %v5893_v36 = vld [vmem:[#allocation13 + $0x50] ss:$12 sps:$4 sm:$0xff]  }
 0x304   :  { %3287 = vmatpush1.bf16.msra.mxu1 %v5775_v63  ;;  %v6554_v63 = vld [vmem:[#allocation11] sm:$0x3f] }
 0x305   :  { %3288 = vmatprep.subr.bf16.mxu1 %v5780_v0  ;;  %v5902_v0 = vld [vmem:[#allocation13 + $0x140] ss:$12 sps:$4 sm:$0xff]  }
 0x308   :  { %3289 = vmatpush1.bf16.msra.mxu1 %v5778_v52  ;;  %v1520_v52 = vrot.slane %v6554_v63, %v6408_v2 }
 0x309   :  { %3290 = vmatprep.subr.bf16.mxu1 %v5783_v53  ;;  %v5903_v53 = vld [vmem:[#allocation13 + $0x80] ss:$12 sps:$4 sm:$0xff]  }
 0x30c   :  { %3291 = vmatpush1.bf16.msra.mxu1 %v5781_v4  ;;  %v1528_v4 = vrot.slane %v6554_v63, %v6423_v16 }
 0x30d   :  { %3292 = vmatprep.subr.bf16.mxu1 %v5786_v5  ;;  %v5907_v5 = vld [vmem:[#allocation13 + $0x158] ss:$12 sps:$4 sm:$0xff]  }
 0x310   :  { %3293 = vmatpush1.bf16.msra.mxu1 %v5784_v6 }
 0x311   :  { %3294 = vmatprep.subr.bf16.mxu1 %v5789_v7 }
 0x314   :  { %3295 = vmatpush1.bf16.msra.mxu1 %v5787_v8 }
 0x315   :  { %3296 = vmatprep.subr.bf16.mxu1 %v5792_v10 }
 0x318   :  { %3297 = vmatpush1.bf16.msra.mxu1 %v5790_v11 }
 0x319   :  { %3298 = vmatprep.subr.bf16.mxu1 %v5795_v59 }
 0x31c   :  { %3299 = vmatpush1.bf16.msra.mxu1 %v5793_v12 }
 0x31d   :  { %3300 = vmatprep.subr.bf16.mxu1 %v5798_v15  ;;  %v5908_v15 = vld [vmem:[#allocation13 + $0x98] ss:$12 sps:$4 sm:$0xff]  }
 0x320   :  { %3301 = vmatpush1.bf16.msra.mxu1 %v5796_v18 }
 0x321   :  { %3311 = vmatprep.subr.bf16.mxu1 %v5801_v20 }
 0x323   :  { %3303 = vmatmul.mubr.bf16.vlgmr.msra.gmra.mrb[8].mxu1 %v6533_v17  ;;  %v5814_v17 = vld [vmem:[#allocation10 + $0x700] ss:$24 sps:$4 sm:$0xff]  }
 0x324   :  { %3312 = vmatpush1.bf16.msra.mxu1 %v5799_v44  ;;  %3343 = vmatprep.mubr.bf16.mxu1 %v6535_v19  ;;  %v5817_v19 = vld [vmem:[#allocation10 + $0x730] ss:$24 sps:$4 sm:$0xff]  }
 0x325   :  { %3313 = vmatprep.subr.bf16.mxu1 %v5804_v61 }
 0x328   :  { %3314 = vmatpush1.bf16.msra.mxu1 %v5802_v26  ;;  %v5912_v26 = vld [vmem:[#allocation13 + $0x170] ss:$12 sps:$4 sm:$0xff]  }
 0x329   :  { %3315 = vmatprep.subr.bf16.mxu1 %v5807_v29 }
 0x32c   :  { %3316 = vmatpush1.bf16.msra.mxu1 %v5805_v62 }
 0x32d   :  { %3317 = vmatprep.subr.bf16.mxu1 %v5810_v30 }
 0x330   :  { %3318 = vmatpush1.bf16.msra.mxu1 %v5808_v32  ;;  %v5909_v32 = vld [vmem:[#allocation13 + $0x180] ss:$12 sps:$4 sm:$0xff]  }
 0x331   :  { %3319 = vmatprep.subr.bf16.mxu1 %v5813_v13 }
 0x334   :  { %3320 = vmatpush1.bf16.msra.mxu1 %v5811_v14  ;;  %v5913_v14 = vld [vmem:[#allocation13 + $0xb0] ss:$12 sps:$4 sm:$0xff]  }
 0x335   :  { %3321 = vmatprep.subr.bf16.mxu1 %v5816_v33  ;;  %v5916_v33 = vld [vmem:[#allocation13 + $0x19c] ss:$12 sps:$4 sm:$0xff]  }
 0x338   :  { %3322 = vmatpush1.bf16.msra.mxu1 %v5814_v17 }
 0x339   :  { %3323 = vmatprep.subr.bf16.mxu1 %v5819_v34  ;;  %v5917_v34 = vld [vmem:[#allocation13 + $0x248] ss:$12 sps:$4 sm:$0xff]  }
 0x33c   :  { %3324 = vmatpush1.bf16.msra.mxu1 %v5817_v19  ;;  %v5914_v19 = vld [vmem:[#allocation13 + $0x198] ss:$12 sps:$4 sm:$0xff]  }
 0x33d   :  { %3325 = vmatprep.subr.bf16.mxu1 %v5825_v37  ;;  %v5918_v37 = vld [vmem:[#allocation13 + $0x188] ss:$12 sps:$4 sm:$0xff]  }
 0x340   :  { %3326 = vmatpush1.bf16.msra.mxu1 %v5823_v22  ;;  %v5921_v22 = vld [vmem:[#allocation13 + $0x1b4] ss:$12 sps:$4 sm:$0xff]  }
 0x341   :  { %3327 = vmatprep.subr.bf16.mxu1 %v5831_v39  ;;  %v5922_v39 = vld [vmem:[#allocation13 + $0x260] ss:$12 sps:$4 sm:$0xff]  }
 0x344   :  { %3328 = vmatpush1.bf16.msra.mxu1 %v5829_v1  ;;  %v5919_v1 = vld [vmem:[#allocation13 + $0x1b0] ss:$12 sps:$4 sm:$0xff]  }
 0x345   :  { %3329 = vmatprep.subr.bf16.mxu1 %v5837_v40  ;;  %v5923_v40 = vld [vmem:[#allocation13 + $0x1a0] ss:$12 sps:$4 sm:$0xff]  }
 0x348   :  { %3330 = vmatpush1.bf16.msra.mxu1 %v5835_v41  ;;  %v5926_v41 = vld [vmem:[#allocation13 + $0x1cc] ss:$12 sps:$4 sm:$0xff]  }
 0x349   :  { %3331 = vmatprep.subr.bf16.mxu1 %v5843_v21  ;;  %v5927_v21 = vld [vmem:[#allocation13 + $0x278] ss:$12 sps:$4 sm:$0xff]  }
 0x34c   :  { %3332 = vmatpush1.bf16.msra.mxu1 %v5841_v42  ;;  %v5924_v42 = vld [vmem:[#allocation13 + $0x1c8] ss:$12 sps:$4 sm:$0xff]  }
 0x34d   :  { %3333 = vmatprep.subr.bf16.mxu1 %v5849_v43  ;;  %v5928_v43 = vld [vmem:[#allocation13 + $0x1b8] ss:$12 sps:$4 sm:$0xff]  }
 0x350   :  { %3334 = vmatpush1.bf16.msra.mxu1 %v5847_v35  ;;  %v5931_v35 = vld [vmem:[#allocation13 + $0x1e4] ss:$12 sps:$4 sm:$0xff]  }
 0x351   :  { %3335 = vmatprep.subr.bf16.mxu1 %v5855_v46  ;;  %v5932_v46 = vld [vmem:[#allocation13 + $0x290] ss:$12 sps:$4 sm:$0xff]  }
 0x354   :  { %3336 = vmatpush1.bf16.msra.mxu1 %v5853_v47  ;;  %v5929_v47 = vld [vmem:[#allocation13 + $0x1e0] ss:$12 sps:$4 sm:$0xff]  }
 0x355   :  { %3337 = vmatprep.subr.bf16.mxu1 %v5861_v58  ;;  %v5933_v58 = vld [vmem:[#allocation13 + $0x1d0] ss:$12 sps:$4 sm:$0xff]  }
 0x358   :  { %3338 = vmatpush1.bf16.msra.mxu1 %v5859_v49  ;;  %v5936_v49 = vld [vmem:[#allocation13 + $0x1fc] ss:$12 sps:$4 sm:$0xff]  }
 0x359   :  { %3339 = vmatprep.subr.bf16.mxu1 %v5867_v48  ;;  %v5937_v48 = vld [vmem:[#allocation13 + $0x2a8] ss:$12 sps:$4 sm:$0xff]  }
 0x35c   :  { %3340 = vmatpush1.bf16.msra.mxu1 %v5865_v56  ;;  %v5934_v56 = vld [vmem:[#allocation13 + $0x1f8] ss:$12 sps:$4 sm:$0xff]  }
 0x35d   :  { %3341 = vmatprep.subr.bf16.mxu1 %v5873_v50  ;;  %v5938_v50 = vld [vmem:[#allocation13 + $0x1e8] ss:$12 sps:$4 sm:$0xff]  }
 0x360   :  { %3342 = vmatpush1.bf16.msra.mxu1 %v5871_v57  ;;  %v5941_v57 = vld [vmem:[#allocation13 + $0x214] ss:$12 sps:$4 sm:$0xff]  }
 0x361   :  { %5150 = vmatprep.subr.bf16.mxu1 %v5877_v27  ;;  %v5942_v27 = vld [vmem:[#allocation13 + $0x2c0] ss:$12 sps:$4 sm:$0xff]  }
 0x363   :  { %3344 = vmatmul.mubr.bf16.vlgmr.msra.gmra.mrb[8].mxu1 %v6544_v38  ;;  %v1516_v38 = vrot.slane %v6554_v63, %v6411_v3 }
 0x364   :  { %5151 = vmatpush3.bf16.msra.mxu1 %v5878_v23  ;;  %v5939_v23 = vld [vmem:[#allocation13 + $0x210] ss:$12 sps:$4 sm:$0xff]  }
 0x365   :  { %5152 = vmatprep.subr.bf16.mxu1 %v5882_v25  ;;  %v5943_v25 = vld [vmem:[#allocation13 + $0x200] ss:$12 sps:$4 sm:$0xff]  }
 0x368   :  { %5153 = vmatpush3.bf16.msra.mxu1 %v5883_v28  ;;  %v5946_v28 = vld [vmem:[#allocation13 + $0x22c] ss:$12 sps:$4 sm:$0xff]  }
 0x369   :  { %5154 = vmatprep.subr.bf16.mxu1 %v5887_v45  ;;  %v1524_v45 = vrot.slane %v6554_v63, %v6420_v9 }
 0x36c   :  { %5155 = vmatpush3.bf16.msra.mxu1 %v5888_v51  ;;  %v5947_v51 = vld [vmem:[#allocation13 + $0x2d8] ss:$12 sps:$4 sm:$0xff]  }
 0x36d   :  { %5156 = vmatprep.subr.bf16.mxu1 %v5892_v55  ;;  %v5944_v55 = vld [vmem:[#allocation13 + $0x228] ss:$12 sps:$4 sm:$0xff]  }
 0x370   :  { %5157 = vmatpush3.bf16.msra.mxu1 %v5893_v36  ;;  %v5948_v36 = vld [vmem:[#allocation13 + $0x218] ss:$12 sps:$4 sm:$0xff]  }
 0x371   :  { %5158 = vmatprep.subr.bf16.mxu1 %v5897_v54  ;;  %v5951_v54 = vld [vmem:[#allocation13 + $0x244] ss:$12 sps:$4 sm:$0xff]  }
 0x374   :  { %5159 = vmatpush3.bf16.msra.mxu1 %v5898_v60 }
 0x375   :  { %5160 = vmatprep.subr.bf16.mxu1 %v5902_v0  ;;  %v5952_v0 = vld [vmem:[#allocation13 + $0x2f0] ss:$12 sps:$4 sm:$0xff]  }
 0x376   :  { %v3099_v6 = vpop.f32.mrb[4].mxu1 }
 0x377   :  { %v5216_v7 = vadd.f32 %v3099_v6, %v1516_v38  ;;  %v6562_v8 = vpop.f32.mrb[8].mxu0  ;;  %v3101_v10 = vpop.f32.mrb[5].mxu1  ;;  %v5949_v38 = vld [vmem:[#allocation13 + $0x240] ss:$12 sps:$4 sm:$0xff]  }
 0x378   :  { %v5217_v11 = vadd.f32 %v3101_v10, %v1520_v52  ;;  %v3224_v59 = vpop.f32.mrb[9].mxu0  ;;  %v3103_v12 = vpop.f32.mrb[6].mxu1  ;;  %5161 = vmatpush3.bf16.msra.mxu1 %v5903_v53  ;;  %v5218_v60 = vadd.f32 %v6562_v8, %v1524_v45  ;;  %v5953_v52 = vld [vmem:[#allocation13 + $0x230] ss:$12 sps:$4 sm:$0xff]   ;;  %v5959_v6 = vld [vmem:[#allocation13 + $0x274] ss:$12 sps:$4 sm:$0xff]   ;;  %v1532_v45 = vrot.slane %v6554_v63, %v6430_v24 }
 0x379   :  { %v3352_v18 = vmax.f32 %v5216_v7, 0.0  ;;  %v5219_v20 = vadd.f32 %v3224_v59, %v1528_v4  ;;  %v3226_v44 = vpop.f32.mrb[10].mxu0  ;;  %v3104_v61 = vpop.f32.mrb[7].mxu1  ;;  %5162 = vmatprep.subr.bf16.mxu1 %v5907_v5  ;;  %v5956_v53 = vld [vmem:[#allocation13 + $0x25c] ss:$12 sps:$4 sm:$0xff]  }
 0x37a   :  { %v3353_v29 = vmax.f32 %v5217_v11, 0.0  ;;  %v3227_v16 = vpop.f32.mrb[11].mxu0  ;;  %v3354_v4 = vmax.f32 %v5218_v60, 0.0  ;;  %v5954_v5 = vld [vmem:[#allocation13 + $0x258] ss:$12 sps:$4 sm:$0xff]  }
 0x37b   :  { %v3355_v62 = vmax.f32 %v5219_v20, 0.0  ;;  %v3358_v13 = vpack.c.bf16 %v3352_v18, %v3352_v18  ;;  %v5957_v10 = vld [vmem:[#allocation13 + $0x270] ss:$12 sps:$4 sm:$0xff]   ;;  %v5962_v8 = vld [vmem:[#allocation13 + $0x28c] ss:$12 sps:$4 sm:$0xff]  }
 0x37c   :  { %v3359_v30 = vpack.c.bf16 %v3353_v29, %v3353_v29  ;;  %5163 = vmatpush3.bf16.msra.mxu1 %v5908_v15  ;;  %v3360_v7 = vpack.c.bf16 %v3354_v4, %v3354_v4  ;;  %v5960_v11 = vld [vmem:[#allocation13 + $0x288] ss:$12 sps:$4 sm:$0xff]   ;;  %v5965_v59 = vld [vmem:[#allocation13 + $0x2a4] ss:$12 sps:$4 sm:$0xff]   ;;  %v5963_v12 = vld [vmem:[#allocation13 + $0x2a0] ss:$12 sps:$4 sm:$0xff]  }
 0x37d   :  { %5164 = vmatprep.subr.bf16.mxu1 %v5912_v26  ;;  %v3361_v17 = vpack.c.bf16 %v3355_v62, %v3355_v62  ;;  %v5968_v15 = vld [vmem:[#allocation13 + $0x2bc] ss:$12 sps:$4 sm:$0xff]   ;;  %v5966_v18 = vld [vmem:[#allocation13 + $0x2b8] ss:$12 sps:$4 sm:$0xff]   ;;  %v5971_v20 = vld [vmem:[#allocation13 + $0x2d4] ss:$12 sps:$4 sm:$0xff]  }
 0x37e   :  { %4373 = vmatprep.mubr.bf16.mxu0 %v3359_v30  ;;  %4496 = vmatprep.mubr.bf16.mxu1 %v3359_v30  ;;  %v5969_v44 = vld [vmem:[#allocation13 + $0x2d0] ss:$12 sps:$4 sm:$0xff]   ;;  %v5974_v61 = vld [vmem:[#allocation13 + $0x2ec] ss:$12 sps:$4 sm:$0xff]   ;;  %v5972_v26 = vld [vmem:[#allocation13 + $0x2e8] ss:$12 sps:$4 sm:$0xff]  }
 0x37f   :  { %4374 = vmatmul.mubr.bf16.vlgmr.msra.gmra.mrb[12].mxu0 %v3358_v13  ;;  %v5977_v29 = vld [vmem:[#allocation13 + $0x304] ss:$12 sps:$4 sm:$0xff]   ;;  %v5975_v16 = vld [vmem:[#allocation13 + $0x300] ss:$12 sps:$4 sm:$0xff]   ;;  %v5980_v62 = vld [vmem:[#allocation13 + $0x31c] ss:$12 sps:$4 sm:$0xff]  }
 0x380   :  { %4383 = vmatpush1.bf16.msra.mxu0 %v5909_v32  ;;  %4414 = vmatprep.mubr.bf16.mxu0 %v3361_v17  ;;  %v5978_v30 = vld [vmem:[#allocation13 + $0x318] ss:$12 sps:$4 sm:$0xff]   ;;  %v5983_v32 = vld [vmem:[#allocation13 + $0x334] ss:$12 sps:$4 sm:$0xff]  }
 0x381   :  { %5165 = vmatpush3.bf16.msra.mxu1 %v5913_v14  ;;  %4384 = vmatprep.subr.bf16.mxu0 %v5916_v33  ;;  %v5986_v14 = vld [vmem:[#allocation13 + $0x34c] ss:$12 sps:$4 sm:$0xff]   ;;  %v5984_v33 = vld [vmem:[#allocation13 + $0x348] ss:$12 sps:$4 sm:$0xff]  }
 0x382   :  { %5172 = vmatprep.subr.bf16.mxu1 %v5917_v34  ;;  %v5987_v34 = vld [vmem:[#allocation13 + $0x360] ss:$12 sps:$4 sm:$0xff]  }
 0x383   :  { %v6026_v24 = vld [vmem:[#allocation13 + $0x320] ss:$12 sps:$4 sm:$0xff]  }
 0x384   :  { %4385 = vmatpush1.bf16.msra.mxu0 %v5914_v19  ;;  %4497 = vmatmul.mubr.bf16.vlgmr.msra.gmra.mrb[12].mxu1 %v3358_v13  ;;  %v5981_v13 = vld [vmem:[#allocation13 + $0x330] ss:$12 sps:$4 sm:$0xff]  }
 0x385   :  { %5173 = vmatpush3.bf16.msra.mxu1 %v5918_v37  ;;  %4536 = vmatprep.mubr.bf16.mxu1 %v3361_v17  ;;  %v5989_v17 = vld [vmem:[#allocation13 + $0x364] ss:$12 sps:$4 sm:$0xff]   ;;  %v5992_v19 = vld [vmem:[#allocation13 + $0x37c] ss:$12 sps:$4 sm:$0xff]  }
 0x386   :  { %4386 = vmatprep.subr.bf16.mxu0 %v5921_v22  ;;  %5174 = vmatprep.subr.bf16.mxu1 %v5922_v39  ;;  %v5990_v37 = vld [vmem:[#allocation13 + $0x378] ss:$12 sps:$4 sm:$0xff]   ;;  %v5995_v22 = vld [vmem:[#allocation13 + $0x394] ss:$12 sps:$4 sm:$0xff]   ;;  %v5993_v39 = vld [vmem:[#allocation13 + $0x390] ss:$12 sps:$4 sm:$0xff]  }
 0x388   :  { %4387 = vmatpush1.bf16.msra.mxu0 %v5919_v1  ;;  %v5998_v1 = vld [vmem:[#allocation13 + $0x3ac] ss:$12 sps:$4 sm:$0xff]  }
 0x389   :  { %5175 = vmatpush3.bf16.msra.mxu1 %v5923_v40  ;;  %4388 = vmatprep.subr.bf16.mxu0 %v5926_v41  ;;  %v5996_v40 = vld [vmem:[#allocation13 + $0x3a8] ss:$12 sps:$4 sm:$0xff]   ;;  %v6001_v41 = vld [vmem:[#allocation13 + $0x3c4] ss:$12 sps:$4 sm:$0xff]  }
 0x38a   :  { %5176 = vmatprep.subr.bf16.mxu1 %v5927_v21  ;;  %v5999_v21 = vld [vmem:[#allocation13 + $0x3c0] ss:$12 sps:$4 sm:$0xff]  }
 0x38c   :  { %4389 = vmatpush1.bf16.msra.mxu0 %v5924_v42  ;;  %v6004_v42 = vld [vmem:[#allocation13 + $0x3dc] ss:$12 sps:$4 sm:$0xff]  }
 0x38d   :  { %5177 = vmatpush3.bf16.msra.mxu1 %v5928_v43  ;;  %4390 = vmatprep.subr.bf16.mxu0 %v5931_v35  ;;  %v6002_v43 = vld [vmem:[#allocation13 + $0x3d8] ss:$12 sps:$4 sm:$0xff]   ;;  %v6007_v35 = vld [vmem:[#allocation13 + $0x3f4] ss:$12 sps:$4 sm:$0xff]  }
 0x38e   :  { %5178 = vmatprep.subr.bf16.mxu1 %v5932_v46  ;;  %v6005_v46 = vld [vmem:[#allocation13 + $0x3f0] ss:$12 sps:$4 sm:$0xff]  }
 0x390   :  { %4391 = vmatpush1.bf16.msra.mxu0 %v5929_v47  ;;  %v6010_v47 = vld [vmem:[#allocation13 + $0x40c] ss:$12 sps:$4 sm:$0xff]  }
 0x391   :  { %5179 = vmatpush3.bf16.msra.mxu1 %v5933_v58  ;;  %4392 = vmatprep.subr.bf16.mxu0 %v5936_v49  ;;  %v6008_v58 = vld [vmem:[#allocation13 + $0x408] ss:$12 sps:$4 sm:$0xff]   ;;  %v6013_v49 = vld [vmem:[#allocation13 + $0x424] ss:$12 sps:$4 sm:$0xff]  }
 0x392   :  { %5180 = vmatprep.subr.bf16.mxu1 %v5937_v48  ;;  %v6011_v48 = vld [vmem:[#allocation13 + $0x420] ss:$12 sps:$4 sm:$0xff]  }
 0x394   :  { %4393 = vmatpush1.bf16.msra.mxu0 %v5934_v56  ;;  %v6016_v56 = vld [vmem:[#allocation13 + $0x43c] ss:$12 sps:$4 sm:$0xff]  }
 0x395   :  { %5181 = vmatpush3.bf16.msra.mxu1 %v5938_v50  ;;  %4394 = vmatprep.subr.bf16.mxu0 %v5941_v57  ;;  %v6014_v50 = vld [vmem:[#allocation13 + $0x438] ss:$12 sps:$4 sm:$0xff]   ;;  %v6019_v57 = vld [vmem:[#allocation13 + $0x454] ss:$12 sps:$4 sm:$0xff]  }
 0x396   :  { %5182 = vmatprep.subr.bf16.mxu1 %v5942_v27  ;;  %v6017_v27 = vld [vmem:[#allocation13 + $0x450] ss:$12 sps:$4 sm:$0xff]  }
 0x398   :  { %4395 = vmatpush1.bf16.msra.mxu0 %v5939_v23  ;;  %v6022_v23 = vld [vmem:[#allocation13 + $0x46c] ss:$12 sps:$4 sm:$0xff]  }
 0x399   :  { %5183 = vmatpush3.bf16.msra.mxu1 %v5943_v25  ;;  %4396 = vmatprep.subr.bf16.mxu0 %v5946_v28  ;;  %v6020_v25 = vld [vmem:[#allocation13 + $0x468] ss:$12 sps:$4 sm:$0xff]  }
 0x39a   :  { %5184 = vmatprep.subr.bf16.mxu1 %v5947_v51  ;;  %v6023_v28 = vld [vmem:[#allocation13 + $0x3c8] ss:$12 sps:$4 sm:$0xff]   ;;  %v1536_v51 = vrot.slane %v6554_v63, %v6435_v31  ;;  %v6028_v31 = vld [vmem:[#allocation13 + $0x338] ss:$12 sps:$4 sm:$0xff]   ;;  %v6029_v63 = vld [vmem:[#allocation13 + $0x410] ss:$12 sps:$4 sm:$0xff]  }
 0x39c   :  { %4397 = vmatpush1.bf16.msra.mxu0 %v5944_v55 }
 0x39d   :  { %5185 = vmatpush3.bf16.msra.mxu1 %v5948_v36  ;;  %4398 = vmatprep.subr.bf16.mxu0 %v5951_v54 }
 0x39e   :  { %5186 = vmatprep.subr.bf16.mxu1 %v5952_v0 }
 0x3a0   :  { %4399 = vmatpush1.bf16.msra.mxu0 %v5949_v38 }
 0x3a1   :  { %5187 = vmatpush3.bf16.msra.mxu1 %v5953_v52  ;;  %4400 = vmatprep.subr.bf16.mxu0 %v5956_v53 }
 0x3a4   :  { %4401 = vmatpush1.bf16.msra.mxu0 %v5954_v5  ;;  %4537 = vmatmul.mubr.bf16.vlgmr.msra.gmra.mrb[16].mxu1 %v3360_v7  ;;  %v6024_v5 = vld [vmem:[#allocation13 + $0x308] ss:$12 sps:$4 sm:$0xff]  }
 0x3a5   :  { %4402 = vmatprep.subr.bf16.mxu0 %v5959_v6 }
 0x3a8   :  { %4403 = vmatpush1.bf16.msra.mxu0 %v5957_v10  ;;  %v6027_v10 = vld [vmem:[#allocation13 + $0x3f8] ss:$12 sps:$4 sm:$0xff]  }
 0x3a9   :  { %4404 = vmatprep.subr.bf16.mxu0 %v5962_v8  ;;  %v6030_v8 = vld [vmem:[#allocation13 + $0x350] ss:$12 sps:$4 sm:$0xff]  }
 0x3ac   :  { %4405 = vmatpush1.bf16.msra.mxu0 %v5960_v11  ;;  %v6031_v11 = vld [vmem:[#allocation13 + $0x428] ss:$12 sps:$4 sm:$0xff]  }
 0x3ad   :  { %4406 = vmatprep.subr.bf16.mxu0 %v5965_v59  ;;  %v6032_v59 = vld [vmem:[#allocation13 + $0x368] ss:$12 sps:$4 sm:$0xff]  }
 0x3b0   :  { %4407 = vmatpush1.bf16.msra.mxu0 %v5963_v12  ;;  %v6033_v12 = vld [vmem:[#allocation13 + $0x440] ss:$12 sps:$4 sm:$0xff]  }
 0x3b1   :  { %4408 = vmatprep.subr.bf16.mxu0 %v5968_v15  ;;  %v6034_v15 = vld [vmem:[#allocation13 + $0x380] ss:$12 sps:$4 sm:$0xff]  }
 0x3b4   :  { %4409 = vmatpush1.bf16.msra.mxu0 %v5966_v18  ;;  %v6035_v18 = vld [vmem:[#allocation13 + $0x458] ss:$12 sps:$4 sm:$0xff]  }
 0x3b5   :  { %4410 = vmatprep.subr.bf16.mxu0 %v5971_v20  ;;  %v6036_v20 = vld [vmem:[#allocation13 + $0x398] ss:$12 sps:$4 sm:$0xff]  }
 0x3b8   :  { %4411 = vmatpush1.bf16.msra.mxu0 %v5969_v44  ;;  %v6037_v44 = vld [vmem:[#allocation13 + $0x470] ss:$12 sps:$4 sm:$0xff]  }
 0x3b9   :  { %4412 = vmatprep.subr.bf16.mxu0 %v5974_v61 }
 0x3bc   :  { %4413 = vmatpush1.bf16.msra.mxu0 %v5972_v26 }
 0x3bd   :  { %4423 = vmatprep.subr.bf16.mxu0 %v5977_v29  ;;  %v6038_v29 = vld [vmem:[#allocation13 + $0x3b0] ss:$12 sps:$4 sm:$0xff]  }
 0x3bf   :  { %4415 = vmatmul.mubr.bf16.vlgmr.msra.gmra.mrb[12].mxu0 %v3360_v7  ;;  %v6025_v7 = vld [vmem:[#allocation13 + $0x3e0] ss:$12 sps:$4 sm:$0xff]  }
 0x3c0   :  { %4424 = vmatpush1.bf16.msra.mxu0 %v5975_v16 }
 0x3c1   :  { %4425 = vmatprep.subr.bf16.mxu0 %v5980_v62 }
 0x3c4   :  { %4426 = vmatpush1.bf16.msra.mxu0 %v5978_v30 }
 0x3c5   :  { %4427 = vmatprep.subr.bf16.mxu0 %v5983_v32  ;;  %v3556_v32 = vld [vmem:[#allocation14] sm:$0x7] }
 0x3c8   :  { %4428 = vmatpush1.bf16.msra.mxu0 %v5981_v13  ;;  %v3569_v13 = vrot.slane %v3556_v32, %v6420_v9 }
 0x3c9   :  { %4429 = vmatprep.subr.bf16.mxu0 %v5986_v14 }
 0x3cc   :  { %4430 = vmatpush1.bf16.msra.mxu0 %v5984_v33 }
 0x3cd   :  { %4431 = vmatprep.subr.bf16.mxu0 %v5989_v17 }
 0x3d0   :  { %4432 = vmatpush1.bf16.msra.mxu0 %v5987_v34 }
 0x3d1   :  { %4433 = vmatprep.subr.bf16.mxu0 %v5992_v19 }
 0x3d4   :  { %4434 = vmatpush1.bf16.msra.mxu0 %v5990_v37 }
 0x3d5   :  { %4435 = vmatprep.subr.bf16.mxu0 %v5995_v22 }
 0x3d8   :  { %4436 = vmatpush1.bf16.msra.mxu0 %v5993_v39  ;;  %v3561_v39 = vrot.slane %v3556_v32, %v6411_v3 }
 0x3d9   :  { %4437 = vmatprep.subr.bf16.mxu0 %v5998_v1  ;;  %v3565_v1 = vrot.slane %v3556_v32, %v6408_v2 }
 0x3dc   :  { %4438 = vmatpush1.bf16.msra.mxu0 %v5996_v40 }
 0x3dd   :  { %4439 = vmatprep.subr.bf16.mxu0 %v6001_v41 }
 0x3e0   :  { %4440 = vmatpush1.bf16.msra.mxu0 %v5999_v21 }
 0x3e1   :  { %4441 = vmatprep.subr.bf16.mxu0 %v6004_v42 }
 0x3e4   :  { %4442 = vmatpush1.bf16.msra.mxu0 %v6002_v43 }
 0x3e5   :  { %4443 = vmatprep.subr.bf16.mxu0 %v6007_v35 }
 0x3e8   :  { %4444 = vmatpush1.bf16.msra.mxu0 %v6005_v46 }
 0x3e9   :  { %4445 = vmatprep.subr.bf16.mxu0 %v6010_v47 }
 0x3ec   :  { %4446 = vmatpush1.bf16.msra.mxu0 %v6008_v58 }
 0x3ed   :  { %4447 = vmatprep.subr.bf16.mxu0 %v6013_v49 }
 0x3f0   :  { %4448 = vmatpush1.bf16.msra.mxu0 %v6011_v48 }
 0x3f1   :  { %4449 = vmatprep.subr.bf16.mxu0 %v6016_v56 }
 0x3f4   :  { %4450 = vmatpush1.bf16.msra.mxu0 %v6014_v50 }
 0x3f5   :  { %4451 = vmatprep.subr.bf16.mxu0 %v6019_v57 }
 0x3f8   :  { %4452 = vmatpush1.bf16.msra.mxu0 %v6017_v27 }
 0x3f9   :  { %4453 = vmatprep.subr.bf16.mxu0 %v6022_v23 }
 0x3fc   :  { %4454 = vmatpush1.bf16.msra.mxu0 %v6020_v25 }
 0x3fd   :  { %5194 = vmatprep.subr.bf16.mxu0 %v6023_v28 }
 0x436   :  { %v3345_v55 = vpop.f32.mrb[8].mxu1 }
 0x437   :  { %v5220_v36 = vadd.f32 %v3345_v55, %v1532_v45  ;;  %v3347_v54 = vpop.f32.mrb[9].mxu1 }
 0x438   :  { %v5221_v60 = vadd.f32 %v3347_v54, %v1536_v51  ;;  %v3349_v0 = vpop.f32.mrb[10].mxu1 }
 0x439   :  { %v3356_v38 = vmax.f32 %v5220_v36, 0.0  ;;  %v3350_v52 = vpop.f32.mrb[11].mxu1 }
 0x43a   :  { %v3357_v53 = vmax.f32 %v5221_v60, 0.0 }
 0x43b   :  { %v3362_v6 = vpack.c.bf16 %v3356_v38, %v3356_v38 }
 0x43c   :  { %v3363_v4 = vpack.c.bf16 %v3357_v53, %v3357_v53 }
 0x43e   :  { %4455 = vmatprep.mubr.bf16.mxu0 %v3363_v4 }
 0x43f   :  { %4456 = vmatmul.mubr.bf16.vlgmr.msra.gmra.mrb[12].mxu0 %v3362_v6 }
 0x440   :  { %5195 = vmatpush3.bf16.msra.mxu0 %v6024_v5  ;;  %4576 = vmatprep.mubr.bf16.mxu0 %v3363_v4 }
 0x441   :  { %5196 = vmatprep.subr.bf16.mxu0 %v6025_v7 }
 0x444   :  { %5197 = vmatpush3.bf16.msra.mxu0 %v6026_v24 }
 0x445   :  { %5198 = vmatprep.subr.bf16.mxu0 %v6027_v10 }
 0x448   :  { %5199 = vmatpush3.bf16.msra.mxu0 %v6028_v31 }
 0x449   :  { %5200 = vmatprep.subr.bf16.mxu0 %v6029_v63 }
 0x44c   :  { %5201 = vmatpush3.bf16.msra.mxu0 %v6030_v8 }
 0x44d   :  { %5202 = vmatprep.subr.bf16.mxu0 %v6031_v11 }
 0x450   :  { %5203 = vmatpush3.bf16.msra.mxu0 %v6032_v59 }
 0x451   :  { %5204 = vmatprep.subr.bf16.mxu0 %v6033_v12 }
 0x454   :  { %5205 = vmatpush3.bf16.msra.mxu0 %v6034_v15 }
 0x455   :  { %5206 = vmatprep.subr.bf16.mxu0 %v6035_v18 }
 0x457   :  { %v5166_v61 = vpop.f32.mrb[12].mxu1 }
 0x458   :  { %v5167_v26 = vpop.f32.mrb[13].mxu1  ;;  %5207 = vmatpush3.bf16.msra.mxu0 %v6036_v20 }
 0x459   :  { %v5168_v16 = vadd.f32 %v5167_v26, %v5166_v61  ;;  %v5169_v62 = vpop.f32.mrb[14].mxu1  ;;  %5208 = vmatprep.subr.bf16.mxu0 %v6037_v44 }
 0x45a   :  { %v5170_v30 = vpop.f32.mrb[15].mxu1 }
 0x45b   :  { %v4499_v17 = vadd.f32 %v5168_v16, %v3569_v13 }
 0x45c   :  { %5209 = vmatpush3.bf16.msra.mxu0 %v6038_v29 }
 0x45f   :  { %4577 = vmatmul.mubr.bf16.vlgmr.msra.gmra.mrb[16].mxu0 %v3362_v6 }
 0x477   :  { %v5188_v14 = vpop.f32.mrb[16].mxu1 }
 0x478   :  { %v5189_v33 = vpop.f32.mrb[17].mxu1 }
 0x479   :  { %v5190_v34 = vadd.f32 %v5189_v33, %v5188_v14  ;;  %v5191_v19 = vpop.f32.mrb[18].mxu1 }
 0x47a   :  { %v5192_v37 = vpop.f32.mrb[19].mxu1 }
 0x47b   :  { %v4539_v22 = vadd.f32 %v5190_v34, %v4499_v17 }
 0x512   :  { %v4457_v40 = vpop.f32.mrb[12].mxu0 }
 0x513   :  { %v5222_v41 = vadd.f32 %v4457_v40, %v3561_v39  ;;  %v4459_v21 = vpop.f32.mrb[13].mxu0 }
 0x514   :  { %v5223_v42 = vadd.f32 %v4459_v21, %v3565_v1  ;;  %v4461_v43 = vpop.f32.mrb[14].mxu0 }
 0x515   :  { %v4462_v35 = vpop.f32.mrb[15].mxu0 }
 0x516   :  { %v5148_v46 = vpack.c.bf16 %v5223_v42, %v5222_v41 }
 0x518   :  { %4597 = vst [vmem:[#allocation16] sm:$0xff] %v5148_v46 }
 0x532   :  { %v5210_v9 = vpop.f32.mrb[16].mxu0 }
 0x533   :  { %v5211_v47 = vpop.f32.mrb[17].mxu0 }
 0x534   :  { %v5212_v58 = vadd.f32 %v5211_v47, %v5210_v9  ;;  %v5213_v49 = vpop.f32.mrb[18].mxu0 }
 0x535   :  { %v5214_v48 = vpop.f32.mrb[19].mxu0 }
 0x536   :  { %v4579_v56 = vadd.f32 %v5212_v58, %v4539_v22 }
 0x538   :  { %v5149_v50 = vpack.c.bf16 %v4579_v56, %v4579_v56 }
 0x53a   :  { %4598 = vst [vmem:[#allocation16 + $0x8] sm:$0xf] %v5149_v50 }
 0x53b   :  { %6226 = shalt.err (!%p6223_p12)
}
 0x53c   :  { %s6227_s28 = scalar_lea.hbm %s6594_s8, 192 }
 0x53d   :  { %p6228_p13 = scmp.ne.s32.totalorder %s6594_s8, %s6227_s28  ;;  %p6231_p0 = scmp.lt.u32.totalorder %s6227_s28, %s6594_s8 }
 0x53f   :  { %p6233_p1 = pnand %p6231_p0, %p6228_p13 }
 0x541   :  { %6236 = shalt.err (!%p6233_p1)
}
 0x542   :  { %4608 = dma.vmem_to_hbm [thread:$0]  %s4606_s5, 192, %s6594_s8, [#allocation4]  }
 0x543   :  { %6247 = dma.done.wait [#allocation4], 192  }
 0x544   :  { %6248 = vsyncadd [#allocation4], 4294967104 }
 0x545   :  { %4612 = vsyncpa [#allocation3], 1 }
 0x546   :  { %4613 = vsyncpa [#allocation6], 1 }
 0x547   :  { %4614 = vsyncpa [#allocation9], 1 }
 0x548   :  { %4615 = vsyncpa [#allocation12], 1 }
 0x549   :  { %4616 = vsyncpa [#allocation15], 1 }
 0x54a   :  { %4617 = vsyncpa [#allocation4], 1 }

</bundles_post_ra>
